<compile_context>
chip_gen: v7x
topology: tpu7x:2x2x1
jax: 0.10.0
libtpu: 0.0.40
codegen_flags: <defaults>
</compile_context>

<pallas_src>
import jax
import jax.numpy as jnp
from jax.experimental import pallas as pl
from jax.experimental.pallas import tpu as pltpu

CPAD = 128          # lane-dense channel padding
_EPS = 1e-5
_VMEM = pl.BlockSpec(memory_space=pltpu.MemorySpace.VMEM)


# ----------------------------------------------------------------------------
# Pallas kernels
# ----------------------------------------------------------------------------
def _conv_bn_sq_kernel(p_ref, w_ref, b_ref, g_ref, be_ref, o_ref):
    """conv (as matmul on im2col patches) + BatchNorm (batch stats) + square.

    p: [M, Kpad] patches, w: [Kpad, 128], b/g/be: [1, 128]; out: [M, 128].
    Padded channels of w/b/be are zero, so padded output columns stay exactly 0.
    """
    m = p_ref.shape[0]
    c = jnp.dot(p_ref[...], w_ref[...], preferred_element_type=jnp.float32) + b_ref[...]
    # Single-pass per-channel stats, pushed onto the MXU via a ones-row matmul.
    ones = jnp.ones((1, m), jnp.float32)
    inv_m = 1.0 / m
    mean = jnp.dot(ones, c, preferred_element_type=jnp.float32) * inv_m
    ex2 = jnp.dot(ones, c * c, preferred_element_type=jnp.float32) * inv_m
    var = ex2 - mean * mean                       # biased variance (PyTorch BN normalization)
    y = (c - mean) * jax.lax.rsqrt(var + _EPS) * g_ref[...] + be_ref[...]
    o_ref[...] = y * y                            # fused .pow(2)


def _conv_bn_sq_fc_kernel(p_ref, w_ref, b_ref, g_ref, be_ref, wfc_ref, bfc_ref,
                          o_ref, act_ref, fc_ref):
    """conv2 + BN2 + square + flatten + fc1, all resident in VMEM.

    p: [N*S, Kpad], w: [Kpad, 128], wfc: [S*128, 128], out: [N, 128].
    act_ref: VMEM scratch [N*S, 128]; fc_ref: VMEM scratch [N, S*128].
    """
    m = p_ref.shape[0]            # N * S   (S = 4*4 spatial positions)
    n = o_ref.shape[0]            # batch
    s = m // n
    cpad = act_ref.shape[1]       # 128

    c = jnp.dot(p_ref[...], w_ref[...], preferred_element_type=jnp.float32) + b_ref[...]
    ones = jnp.ones((1, m), jnp.float32)
    inv_m = 1.0 / m
    mean = jnp.dot(ones, c, preferred_element_type=jnp.float32) * inv_m
    ex2 = jnp.dot(ones, c * c, preferred_element_type=jnp.float32) * inv_m
    var = ex2 - mean * mean
    y = (c - mean) * jax.lax.rsqrt(var + _EPS) * g_ref[...] + be_ref[...]
    act_ref[...] = y * y

    # Flatten (n, s) rows -> (n, s*128) columns inside VMEM (static row copies).
    # Column order (s, c) matches the pre-permuted fc weight packing.
    for bi in range(n):
        for si in range(s):
            fc_ref[bi:bi + 1, si * cpad:(si + 1) * cpad] = \
                act_ref[bi * s + si:bi * s + si + 1, :]

    o_ref[...] = (jnp.dot(fc_ref[...], wfc_ref[...], preferred_element_type=jnp.float32)
                  + bfc_ref[...])


# ----------------------------------------------------------------------------
# Pallas wrappers (full-array VMEM blocks, gridless: everything fits on-chip)
# ----------------------------------------------------------------------------
def pallas_conv_bn_sq(p, w, b, g, be):
    m = p.shape[0]
    cpad = w.shape[1]
    return pl.pallas_call(
        _conv_bn_sq_kernel,
        out_shape=jax.ShapeDtypeStruct((m, cpad), jnp.float32),
        in_specs=[_VMEM] * 5,
        out_specs=_VMEM,
    )(p, w, b, g, be)


def pallas_conv_bn_sq_fc(p, w, b, g, be, wfc, bfc, n_batch):
    m = p.shape[0]
    cpad = w.shape[1]
    s = m // n_batch
    opad = wfc.shape[1]
    return pl.pallas_call(
        _conv_bn_sq_fc_kernel,
        out_shape=jax.ShapeDtypeStruct((n_batch, opad), jnp.float32),
        in_specs=[_VMEM] * 7,
        out_specs=_VMEM,
        scratch_shapes=[pltpu.VMEM((m, cpad), jnp.float32),
                        pltpu.VMEM((n_batch, s * cpad), jnp.float32)],
    )(p, w, b, g, be, wfc, bfc)


# ----------------------------------------------------------------------------
# XLA glue: channels-last im2col (tap order (kh, kw), channels innermost)
# ----------------------------------------------------------------------------
def _extract_patches(x_nhwc, k, stride, oh, ow):
    """(N, H, W, C) -> (N*oh*ow, k*k*C); column index = (kh*k + kw)*C + c."""
    taps = [x_nhwc[:, kh:kh + stride * oh:stride, kw:kw + stride * ow:stride, :]
            for kh in range(k) for kw in range(k)]
    p = jnp.concatenate(taps, axis=-1)                   # (N, oh, ow, k*k*C)
    return p.reshape(-1, k * k * x_nhwc.shape[-1])


# ----------------------------------------------------------------------------
# Parameters: PyTorch-layout init + one-time host-side packing
# ----------------------------------------------------------------------------
def init_params(key):
    ks = jax.random.split(key, 6)
    p = {}
    fan1 = 1 * 5 * 5
    bnd1 = 1.0 / fan1 ** 0.5
    p["w1"] = jax.random.uniform(ks[0], (5, 1, 5, 5), jnp.float32, -bnd1, bnd1)
    p["b1"] = jax.random.uniform(ks[1], (5,), jnp.float32, -bnd1, bnd1)
    p["g1"] = jnp.ones((5,), jnp.float32)
    p["be1"] = jnp.zeros((5,), jnp.float32)
    fan2 = 5 * 5 * 5
    bnd2 = 1.0 / fan2 ** 0.5
    p["w2"] = jax.random.uniform(ks[2], (50, 5, 5, 5), jnp.float32, -bnd2, bnd2)
    p["b2"] = jax.random.uniform(ks[3], (50,), jnp.float32, -bnd2, bnd2)
    p["g2"] = jnp.ones((50,), jnp.float32)
    p["be2"] = jnp.zeros((50,), jnp.float32)
    fan3 = 800
    bnd3 = 1.0 / fan3 ** 0.5
    p["wfc"] = jax.random.uniform(ks[4], (10, 800), jnp.float32, -bnd3, bnd3)
    p["bfc"] = jax.random.uniform(ks[5], (10,), jnp.float32, -bnd3, bnd3)
    return p


def _pad_vec(v, width=CPAD):
    return jnp.zeros((1, width), jnp.float32).at[0, :v.shape[0]].set(v)


def pack_params(p):
    """Pre-pack PyTorch-layout params into lane-dense, kernel-ready slabs (runs once)."""
    packed = {}
    # conv1 (5,1,5,5): patch col = kh*5+kw  ->  (25, 5) -> zero-pad to (128, 128)
    w1 = p["w1"].reshape(5, 25).T
    packed["w1"] = jnp.zeros((CPAD, CPAD), jnp.float32).at[:25, :5].set(w1)
    packed["b1"] = _pad_vec(p["b1"])
    packed["g1"] = _pad_vec(p["g1"])
    packed["be1"] = _pad_vec(p["be1"])
    # conv2 (50,5,5,5): patch col = (kh*5+kw)*128 + c  ->  (kh,kw,c,o), padded -> (3200, 128)
    w2 = jnp.transpose(p["w2"], (2, 3, 1, 0))                          # (5, 5, 5, 50)
    w2p = jnp.zeros((5, 5, CPAD, CPAD), jnp.float32).at[:, :, :5, :50].set(w2)
    packed["w2"] = w2p.reshape(25 * CPAD, CPAD)
    packed["b2"] = _pad_vec(p["b2"])
    packed["g2"] = _pad_vec(p["g2"])
    packed["be2"] = _pad_vec(p["be2"])
    # fc1 (10, 800), 800 indexed as (c, h, w) in PyTorch's .view(-1, 800);
    # our flatten is (s = h*4+w, c), so permute columns -> rows = s*128 + c.
    wfc = p["wfc"].reshape(10, 50, 4, 4)                               # (o, c, h, w)
    wfc = jnp.transpose(wfc, (2, 3, 1, 0))                             # (h, w, c, o)
    wfcp = jnp.zeros((4, 4, CPAD, CPAD), jnp.float32).at[:, :, :50, :10].set(wfc)
    packed["wfc"] = wfcp.reshape(16 * CPAD, CPAD)
    packed["bfc"] = _pad_vec(p["bfc"])
    return packed


# ----------------------------------------------------------------------------
# Forward (matches ConvNet.forward)
# ----------------------------------------------------------------------------
@jax.jit
def convnet_forward(packed, x):
    # x: (N, 1, 28, 28) float32 (NCHW, like PyTorch)
    n = x.shape[0]
    x_nhwc = jnp.transpose(x, (0, 2, 3, 1))                        # (N, 28, 28, 1)

    # conv1 + bn1 + square  (fused kernel 1)
    p1 = _extract_patches(x_nhwc, 5, 2, 12, 12)                    # (N*144, 25)
    p1 = jnp.pad(p1, ((0, 0), (0, CPAD - p1.shape[1])))            # (N*144, 128)
    a1 = pallas_conv_bn_sq(p1, packed["w1"], packed["b1"],
                           packed["g1"], packed["be1"])            # (N*144, 128)

    # conv2 + bn2 + square + flatten + fc1  (fused kernel 2)
    a1 = a1.reshape(n, 12, 12, CPAD)                               # channels-last, padded
    p2 = _extract_patches(a1, 5, 2, 4, 4)                          # (N*16, 25*128)
    out = pallas_conv_bn_sq_fc(p2, packed["w2"], packed["b2"],
                               packed["g2"], packed["be2"],
                               packed["wfc"], packed["bfc"], n)    # (N, 128) lane-dense
    return out[:, :10]


# ----------------------------------------------------------------------------
if __name__ == "__main__":
    key = jax.random.PRNGKey(0)
    pkey, xkey = jax.random.split(key)
    params = init_params(pkey)
    packed = pack_params(params)          # one-time host-side weight packing

    # The architecture requires 28x28 inputs so the conv stack yields 50*4*4 = 800.
    batch = 2
    x = jax.random.normal(xkey, (batch, 1, 28, 28), dtype=jnp.float32)

    out = convnet_forward(packed, x)
    out = jax.block_until_ready(out)
    assert out.shape == (batch, 10), out.shape
    assert out.dtype == jnp.float32
    assert bool(jnp.all(jnp.isfinite(out)))
    print("KERNEL_OK")
</pallas_src>

<mosaic_0001>
module attributes {stable_mosaic.version = 11 : i64} {
  func.func @_conv_bn_sq_kernel(%arg0: memref<288x128xf32, #tpu.memory_space<vmem>>, %arg1: memref<128x128xf32, #tpu.memory_space<vmem>>, %arg2: memref<1x128xf32, #tpu.memory_space<vmem>>, %arg3: memref<1x128xf32, #tpu.memory_space<vmem>>, %arg4: memref<1x128xf32, #tpu.memory_space<vmem>>, %arg5: memref<288x128xf32, #tpu.memory_space<vmem>>) attributes {dimension_semantics = [], scalar_prefetch = 0 : i64, scratch_operands = 0 : i64, tpu.core_type = #tpu.core_type<tc>} {
    %c0 = arith.constant 0 : index
    %c0_0 = arith.constant 0 : index
    %0 = vector.load %arg0[%c0, %c0_0] : memref<288x128xf32, #tpu.memory_space<vmem>>, vector<288x128xf32>
    %c0_1 = arith.constant 0 : index
    %c0_2 = arith.constant 0 : index
    %1 = vector.load %arg1[%c0_1, %c0_2] : memref<128x128xf32, #tpu.memory_space<vmem>>, vector<128x128xf32>
    %cst = arith.constant dense<0.000000e+00> : vector<288x128xf32>
    %2 = tpu.matmul %0, %1, %cst {dimension_numbers = #tpu.dot_dimension_numbers<[1], [0], [0], [1], [0, 0, 1, 1], [], []>} : vector<288x128xf32>, vector<128x128xf32>, vector<288x128xf32> -> vector<288x128xf32>
    %c0_3 = arith.constant 0 : index
    %c0_4 = arith.constant 0 : index
    %3 = vector.load %arg2[%c0_3, %c0_4] : memref<1x128xf32, #tpu.memory_space<vmem>>, vector<1x128xf32>
    %4 = vector.broadcast %3 : vector<1x128xf32> to vector<288x128xf32>
    %5 = arith.addf %2, %4 : vector<288x128xf32>
    %cst_5 = arith.constant 1.000000e+00 : f32
    %6 = vector.broadcast %cst_5 : f32 to vector<1x288xf32>
    %cst_6 = arith.constant dense<0.000000e+00> : vector<1x128xf32>
    %7 = tpu.matmul %6, %5, %cst_6 {dimension_numbers = #tpu.dot_dimension_numbers<[1], [0], [0], [1], [0, 0, 1, 1], [], []>} : vector<1x288xf32>, vector<288x128xf32>, vector<1x128xf32> -> vector<1x128xf32>
    %cst_7 = arith.constant 0.00347222225 : f32
    %8 = vector.broadcast %cst_7 : f32 to vector<1x128xf32>
    %9 = arith.mulf %7, %8 : vector<1x128xf32>
    %10 = arith.mulf %5, %5 : vector<288x128xf32>
    %cst_8 = arith.constant dense<0.000000e+00> : vector<1x128xf32>
    %11 = tpu.matmul %6, %10, %cst_8 {dimension_numbers = #tpu.dot_dimension_numbers<[1], [0], [0], [1], [0, 0, 1, 1], [], []>} : vector<1x288xf32>, vector<288x128xf32>, vector<1x128xf32> -> vector<1x128xf32>
    %cst_9 = arith.constant 0.00347222225 : f32
    %12 = vector.broadcast %cst_9 : f32 to vector<1x128xf32>
    %13 = arith.mulf %11, %12 : vector<1x128xf32>
    %14 = arith.mulf %9, %9 : vector<1x128xf32>
    %15 = arith.subf %13, %14 : vector<1x128xf32>
    %16 = vector.broadcast %9 : vector<1x128xf32> to vector<288x128xf32>
    %17 = arith.subf %5, %16 : vector<288x128xf32>
    %cst_10 = arith.constant 9.99999974E-6 : f32
    %18 = vector.broadcast %cst_10 : f32 to vector<1x128xf32>
    %19 = arith.addf %15, %18 : vector<1x128xf32>
    %20 = math.rsqrt %19 : vector<1x128xf32>
    %21 = vector.broadcast %20 : vector<1x128xf32> to vector<288x128xf32>
    %22 = arith.mulf %17, %21 : vector<288x128xf32>
    %c0_11 = arith.constant 0 : index
    %c0_12 = arith.constant 0 : index
    %23 = vector.load %arg3[%c0_11, %c0_12] : memref<1x128xf32, #tpu.memory_space<vmem>>, vector<1x128xf32>
    %24 = vector.broadcast %23 : vector<1x128xf32> to vector<288x128xf32>
    %25 = arith.mulf %22, %24 : vector<288x128xf32>
    %c0_13 = arith.constant 0 : index
    %c0_14 = arith.constant 0 : index
    %26 = vector.load %arg4[%c0_13, %c0_14] : memref<1x128xf32, #tpu.memory_space<vmem>>, vector<1x128xf32>
    %27 = vector.broadcast %26 : vector<1x128xf32> to vector<288x128xf32>
    %28 = arith.addf %25, %27 : vector<288x128xf32>
    %29 = arith.mulf %28, %28 : vector<288x128xf32>
    %c0_15 = arith.constant 0 : index
    %c0_16 = arith.constant 0 : index
    %30 = vector.load %arg5[%c0_15, %c0_16] : memref<288x128xf32, #tpu.memory_space<vmem>>, vector<288x128xf32>
    tpu.vector_store %arg5[%c0_15, %c0_16], %29 {strides = array<i32>} : memref<288x128xf32, #tpu.memory_space<vmem>>, vector<288x128xf32>,
    return
  }
}

module attributes {stable_mosaic.version = 11 : i64} {
  func.func @_conv_bn_sq_fc_kernel(%arg0: memref<32x3200xf32, #tpu.memory_space<vmem>>, %arg1: memref<3200x128xf32, #tpu.memory_space<vmem>>, %arg2: memref<1x128xf32, #tpu.memory_space<vmem>>, %arg3: memref<1x128xf32, #tpu.memory_space<vmem>>, %arg4: memref<1x128xf32, #tpu.memory_space<vmem>>, %arg5: memref<2048x128xf32, #tpu.memory_space<vmem>>, %arg6: memref<1x128xf32, #tpu.memory_space<vmem>>, %arg7: memref<2x128xf32, #tpu.memory_space<vmem>>, %arg8: memref<32x128xf32, #tpu.memory_space<vmem>>, %arg9: memref<2x2048xf32, #tpu.memory_space<vmem>>) attributes {dimension_semantics = [], scalar_prefetch = 0 : i64, scratch_operands = 2 : i64, tpu.core_type = #tpu.core_type<tc>} {
    %c0 = arith.constant 0 : index
    %c0_0 = arith.constant 0 : index
    %0 = vector.load %arg0[%c0, %c0_0] : memref<32x3200xf32, #tpu.memory_space<vmem>>, vector<32x3200xf32>
    %c0_1 = arith.constant 0 : index
    %c0_2 = arith.constant 0 : index
    %1 = vector.load %arg1[%c0_1, %c0_2] : memref<3200x128xf32, #tpu.memory_space<vmem>>, vector<3200x128xf32>
    %cst = arith.constant dense<0.000000e+00> : vector<32x128xf32>
    %2 = tpu.matmul %0, %1, %cst {dimension_numbers = #tpu.dot_dimension_numbers<[1], [0], [0], [1], [0, 0, 1, 1], [], []>} : vector<32x3200xf32>, vector<3200x128xf32>, vector<32x128xf32> -> vector<32x128xf32>
    %c0_3 = arith.constant 0 : index
    %c0_4 = arith.constant 0 : index
    %3 = vector.load %arg2[%c0_3, %c0_4] : memref<1x128xf32, #tpu.memory_space<vmem>>, vector<1x128xf32>
    %4 = vector.broadcast %3 : vector<1x128xf32> to vector<32x128xf32>
    %5 = arith.addf %2, %4 : vector<32x128xf32>
    %cst_5 = arith.constant 1.000000e+00 : f32
    %6 = vector.broadcast %cst_5 : f32 to vector<1x32xf32>
    %cst_6 = arith.constant dense<0.000000e+00> : vector<1x128xf32>
    %7 = tpu.matmul %6, %5, %cst_6 {dimension_numbers = #tpu.dot_dimension_numbers<[1], [0], [0], [1], [0, 0, 1, 1], [], []>} : vector<1x32xf32>, vector<32x128xf32>, vector<1x128xf32> -> vector<1x128xf32>
    %cst_7 = arith.constant 3.125000e-02 : f32
    %8 = vector.broadcast %cst_7 : f32 to vector<1x128xf32>
    %9 = arith.mulf %7, %8 : vector<1x128xf32>
    %10 = arith.mulf %5, %5 : vector<32x128xf32>
    %cst_8 = arith.constant dense<0.000000e+00> : vector<1x128xf32>
    %11 = tpu.matmul %6, %10, %cst_8 {dimension_numbers = #tpu.dot_dimension_numbers<[1], [0], [0], [1], [0, 0, 1, 1], [], []>} : vector<1x32xf32>, vector<32x128xf32>, vector<1x128xf32> -> vector<1x128xf32>
    %cst_9 = arith.constant 3.125000e-02 : f32
    %12 = vector.broadcast %cst_9 : f32 to vector<1x128xf32>
    %13 = arith.mulf %11, %12 : vector<1x128xf32>
    %14 = arith.mulf %9, %9 : vector<1x128xf32>
    %15 = arith.subf %13, %14 : vector<1x128xf32>
    %16 = vector.broadcast %9 : vector<1x128xf32> to vector<32x128xf32>
    %17 = arith.subf %5, %16 : vector<32x128xf32>
    %cst_10 = arith.constant 9.99999974E-6 : f32
    %18 = vector.broadcast %cst_10 : f32 to vector<1x128xf32>
    %19 = arith.addf %15, %18 : vector<1x128xf32>
    %20 = math.rsqrt %19 : vector<1x128xf32>
    %21 = vector.broadcast %20 : vector<1x128xf32> to vector<32x128xf32>
    %22 = arith.mulf %17, %21 : vector<32x128xf32>
    %c0_11 = arith.constant 0 : index
    %c0_12 = arith.constant 0 : index
    %23 = vector.load %arg3[%c0_11, %c0_12] : memref<1x128xf32, #tpu.memory_space<vmem>>, vector<1x128xf32>
    %24 = vector.broadcast %23 : vector<1x128xf32> to vector<32x128xf32>
    %25 = arith.mulf %22, %24 : vector<32x128xf32>
    %c0_13 = arith.constant 0 : index
    %c0_14 = arith.constant 0 : index
    %26 = vector.load %arg4[%c0_13, %c0_14] : memref<1x128xf32, #tpu.memory_space<vmem>>, vector<1x128xf32>
    %27 = vector.broadcast %26 : vector<1x128xf32> to vector<32x128xf32>
    %28 = arith.addf %25, %27 : vector<32x128xf32>
    %29 = arith.mulf %28, %28 : vector<32x128xf32>
    %c0_15 = arith.constant 0 : index
    %c0_16 = arith.constant 0 : index
    %30 = vector.load %arg8[%c0_15, %c0_16] : memref<32x128xf32, #tpu.memory_space<vmem>>, vector<32x128xf32>
    tpu.vector_store %arg8[%c0_15, %c0_16], %29 {strides = array<i32>} : memref<32x128xf32, #tpu.memory_space<vmem>>, vector<32x128xf32>,
    %c0_17 = arith.constant 0 : index
    %c0_18 = arith.constant 0 : index
    %31 = vector.load %arg8[%c0_17, %c0_18] : memref<32x128xf32, #tpu.memory_space<vmem>>, vector<1x128xf32>
    %c0_19 = arith.constant 0 : index
    %c0_20 = arith.constant 0 : index
    %32 = vector.load %arg9[%c0_19, %c0_20] : memref<2x2048xf32, #tpu.memory_space<vmem>>, vector<1x128xf32>
    tpu.vector_store %arg9[%c0_19, %c0_20], %31 {strides = array<i32>} : memref<2x2048xf32, #tpu.memory_space<vmem>>, vector<1x128xf32>,
    %c1 = arith.constant 1 : index
    %c0_21 = arith.constant 0 : index
    %33 = vector.load %arg8[%c1, %c0_21] : memref<32x128xf32, #tpu.memory_space<vmem>>, vector<1x128xf32>
    %c0_22 = arith.constant 0 : index
    %c128 = arith.constant 128 : index
    %34 = vector.load %arg9[%c0_22, %c128] : memref<2x2048xf32, #tpu.memory_space<vmem>>, vector<1x128xf32>
    tpu.vector_store %arg9[%c0_22, %c128], %33 {strides = array<i32>} : memref<2x2048xf32, #tpu.memory_space<vmem>>, vector<1x128xf32>,
    %c2 = arith.constant 2 : index
    %c0_23 = arith.constant 0 : index
    %35 = vector.load %arg8[%c2, %c0_23] : memref<32x128xf32, #tpu.memory_space<vmem>>, vector<1x128xf32>
    %c0_24 = arith.constant 0 : index
    %c256 = arith.constant 256 : index
    %36 = vector.load %arg9[%c0_24, %c256] : memref<2x2048xf32, #tpu.memory_space<vmem>>, vector<1x128xf32>
    tpu.vector_store %arg9[%c0_24, %c256], %35 {strides = array<i32>} : memref<2x2048xf32, #tpu.memory_space<vmem>>, vector<1x128xf32>,
    %c3 = arith.constant 3 : index
    %c0_25 = arith.constant 0 : index
    %37 = vector.load %arg8[%c3, %c0_25] : memref<32x128xf32, #tpu.memory_space<vmem>>, vector<1x128xf32>
    %c0_26 = arith.constant 0 : index
    %c384 = arith.constant 384 : index
    %38 = vector.load %arg9[%c0_26, %c384] : memref<2x2048xf32, #tpu.memory_space<vmem>>, vector<1x128xf32>
    tpu.vector_store %arg9[%c0_26, %c384], %37 {strides = array<i32>} : memref<2x2048xf32, #tpu.memory_space<vmem>>, vector<1x128xf32>,
    %c4 = arith.constant 4 : index
    %c0_27 = arith.constant 0 : index
    %39 = vector.load %arg8[%c4, %c0_27] : memref<32x128xf32, #tpu.memory_space<vmem>>, vector<1x128xf32>
    %c0_28 = arith.constant 0 : index
    %c512 = arith.constant 512 : index
    %40 = vector.load %arg9[%c0_28, %c512] : memref<2x2048xf32, #tpu.memory_space<vmem>>, vector<1x128xf32>
    tpu.vector_store %arg9[%c0_28, %c512], %39 {strides = array<i32>} : memref<2x2048xf32, #tpu.memory_space<vmem>>, vector<1x128xf32>,
    %c5 = arith.constant 5 : index
    %c0_29 = arith.constant 0 : index
    %41 = vector.load %arg8[%c5, %c0_29] : memref<32x128xf32, #tpu.memory_space<vmem>>, vector<1x128xf32>
    %c0_30 = arith.constant 0 : index
    %c640 = arith.constant 640 : index
    %42 = vector.load %arg9[%c0_30, %c640] : memref<2x2048xf32, #tpu.memory_space<vmem>>, vector<1x128xf32>
    tpu.vector_store %arg9[%c0_30, %c640], %41 {strides = array<i32>} : memref<2x2048xf32, #tpu.memory_space<vmem>>, vector<1x128xf32>,
    %c6 = arith.constant 6 : index
    %c0_31 = arith.constant 0 : index
    %43 = vector.load %arg8[%c6, %c0_31] : memref<32x128xf32, #tpu.memory_space<vmem>>, vector<1x128xf32>
    %c0_32 = arith.constant 0 : index
    %c768 = arith.constant 768 : index
    %44 = vector.load %arg9[%c0_32, %c768] : memref<2x2048xf32, #tpu.memory_space<vmem>>, vector<1x128xf32>
    tpu.vector_store %arg9[%c0_32, %c768], %43 {strides = array<i32>} : memref<2x2048xf32, #tpu.memory_space<vmem>>, vector<1x128xf32>,
    %c7 = arith.constant 7 : index
    %c0_33 = arith.constant 0 : index
    %45 = vector.load %arg8[%c7, %c0_33] : memref<32x128xf32, #tpu.memory_space<vmem>>, vector<1x128xf32>
    %c0_34 = arith.constant 0 : index
    %c896 = arith.constant 896 : index
    %46 = vector.load %arg9[%c0_34, %c896] : memref<2x2048xf32, #tpu.memory_space<vmem>>, vector<1x128xf32>
    tpu.vector_store %arg9[%c0_34, %c896], %45 {strides = array<i32>} : memref<2x2048xf32, #tpu.memory_space<vmem>>, vector<1x128xf32>,
    %c8 = arith.constant 8 : index
    %c0_35 = arith.constant 0 : index
    %47 = vector.load %arg8[%c8, %c0_35] : memref<32x128xf32, #tpu.memory_space<vmem>>, vector<1x128xf32>
    %c0_36 = arith.constant 0 : index
    %c1024 = arith.constant 1024 : index
    %48 = vector.load %arg9[%c0_36, %c1024] : memref<2x2048xf32, #tpu.memory_space<vmem>>, vector<1x128xf32>
    tpu.vector_store %arg9[%c0_36, %c1024], %47 {strides = array<i32>} : memref<2x2048xf32, #tpu.memory_space<vmem>>, vector<1x128xf32>,
    %c9 = arith.constant 9 : index
    %c0_37 = arith.constant 0 : index
    %49 = vector.load %arg8[%c9, %c0_37] : memref<32x128xf32, #tpu.memory_space<vmem>>, vector<1x128xf32>
    %c0_38 = arith.constant 0 : index
    %c1152 = arith.constant 1152 : index
    %50 = vector.load %arg9[%c0_38, %c1152] : memref<2x2048xf32, #tpu.memory_space<vmem>>, vector<1x128xf32>
    tpu.vector_store %arg9[%c0_38, %c1152], %49 {strides = array<i32>} : memref<2x2048xf32, #tpu.memory_space<vmem>>, vector<1x128xf32>,
    %c10 = arith.constant 10 : index
    %c0_39 = arith.constant 0 : index
    %51 = vector.load %arg8[%c10, %c0_39] : memref<32x128xf32, #tpu.memory_space<vmem>>, vector<1x128xf32>
    %c0_40 = arith.constant 0 : index
    %c1280 = arith.constant 1280 : index
    %52 = vector.load %arg9[%c0_40, %c1280] : memref<2x2048xf32, #tpu.memory_space<vmem>>, vector<1x128xf32>
    tpu.vector_store %arg9[%c0_40, %c1280], %51 {strides = array<i32>} : memref<2x2048xf32, #tpu.memory_space<vmem>>, vector<1x128xf32>,
    %c11 = arith.constant 11 : index
    %c0_41 = arith.constant 0 : index
    %53 = vector.load %arg8[%c11, %c0_41] : memref<32x128xf32, #tpu.memory_space<vmem>>, vector<1x128xf32>
    %c0_42 = arith.constant 0 : index
    %c1408 = arith.constant 1408 : index
    %54 = vector.load %arg9[%c0_42, %c1408] : memref<2x2048xf32, #tpu.memory_space<vmem>>, vector<1x128xf32>
    tpu.vector_store %arg9[%c0_42, %c1408], %53 {strides = array<i32>} : memref<2x2048xf32, #tpu.memory_space<vmem>>, vector<1x128xf32>,
    %c12 = arith.constant 12 : index
    %c0_43 = arith.constant 0 : index
    %55 = vector.load %arg8[%c12, %c0_43] : memref<32x128xf32, #tpu.memory_space<vmem>>, vector<1x128xf32>
    %c0_44 = arith.constant 0 : index
    %c1536 = arith.constant 1536 : index
    %56 = vector.load %arg9[%c0_44, %c1536] : memref<2x2048xf32, #tpu.memory_space<vmem>>, vector<1x128xf32>
    tpu.vector_store %arg9[%c0_44, %c1536], %55 {strides = array<i32>} : memref<2x2048xf32, #tpu.memory_space<vmem>>, vector<1x128xf32>,
    %c13 = arith.constant 13 : index
    %c0_45 = arith.constant 0 : index
    %57 = vector.load %arg8[%c13, %c0_45] : memref<32x128xf32, #tpu.memory_space<vmem>>, vector<1x128xf32>
    %c0_46 = arith.constant 0 : index
    %c1664 = arith.constant 1664 : index
    %58 = vector.load %arg9[%c0_46, %c1664] : memref<2x2048xf32, #tpu.memory_space<vmem>>, vector<1x128xf32>
    tpu.vector_store %arg9[%c0_46, %c1664], %57 {strides = array<i32>} : memref<2x2048xf32, #tpu.memory_space<vmem>>, vector<1x128xf32>,
    %c14 = arith.constant 14 : index
    %c0_47 = arith.constant 0 : index
    %59 = vector.load %arg8[%c14, %c0_47] : memref<32x128xf32, #tpu.memory_space<vmem>>, vector<1x128xf32>
    %c0_48 = arith.constant 0 : index
    %c1792 = arith.constant 1792 : index
    %60 = vector.load %arg9[%c0_48, %c1792] : memref<2x2048xf32, #tpu.memory_space<vmem>>, vector<1x128xf32>
    tpu.vector_store %arg9[%c0_48, %c1792], %59 {strides = array<i32>} : memref<2x2048xf32, #tpu.memory_space<vmem>>, vector<1x128xf32>,
    %c15 = arith.constant 15 : index
    %c0_49 = arith.constant 0 : index
    %61 = vector.load %arg8[%c15, %c0_49] : memref<32x128xf32, #tpu.memory_space<vmem>>, vector<1x128xf32>
    %c0_50 = arith.constant 0 : index
    %c1920 = arith.constant 1920 : index
    %62 = vector.load %arg9[%c0_50, %c1920] : memref<2x2048xf32, #tpu.memory_space<vmem>>, vector<1x128xf32>
    tpu.vector_store %arg9[%c0_50, %c1920], %61 {strides = array<i32>} : memref<2x2048xf32, #tpu.memory_space<vmem>>, vector<1x128xf32>,
    %c16 = arith.constant 16 : index
    %c0_51 = arith.constant 0 : index
    %63 = vector.load %arg8[%c16, %c0_51] : memref<32x128xf32, #tpu.memory_space<vmem>>, vector<1x128xf32>
    %c1_52 = arith.constant 1 : index
    %c0_53 = arith.constant 0 : index
    %64 = vector.load %arg9[%c1_52, %c0_53] : memref<2x2048xf32, #tpu.memory_space<vmem>>, vector<1x128xf32>
    tpu.vector_store %arg9[%c1_52, %c0_53], %63 {strides = array<i32>} : memref<2x2048xf32, #tpu.memory_space<vmem>>, vector<1x128xf32>,
    %c17 = arith.constant 17 : index
    %c0_54 = arith.constant 0 : index
    %65 = vector.load %arg8[%c17, %c0_54] : memref<32x128xf32, #tpu.memory_space<vmem>>, vector<1x128xf32>
    %c1_55 = arith.constant 1 : index
    %c128_56 = arith.constant 128 : index
    %66 = vector.load %arg9[%c1_55, %c128_56] : memref<2x2048xf32, #tpu.memory_space<vmem>>, vector<1x128xf32>
    tpu.vector_store %arg9[%c1_55, %c128_56], %65 {strides = array<i32>} : memref<2x2048xf32, #tpu.memory_space<vmem>>, vector<1x128xf32>,
    %c18 = arith.constant 18 : index
    %c0_57 = arith.constant 0 : index
    %67 = vector.load %arg8[%c18, %c0_57] : memref<32x128xf32, #tpu.memory_space<vmem>>, vector<1x128xf32>
    %c1_58 = arith.constant 1 : index
    %c256_59 = arith.constant 256 : index
    %68 = vector.load %arg9[%c1_58, %c256_59] : memref<2x2048xf32, #tpu.memory_space<vmem>>, vector<1x128xf32>
    tpu.vector_store %arg9[%c1_58, %c256_59], %67 {strides = array<i32>} : memref<2x2048xf32, #tpu.memory_space<vmem>>, vector<1x128xf32>,
    %c19 = arith.constant 19 : index
    %c0_60 = arith.constant 0 : index
    %69 = vector.load %arg8[%c19, %c0_60] : memref<32x128xf32, #tpu.memory_space<vmem>>, vector<1x128xf32>
    %c1_61 = arith.constant 1 : index
    %c384_62 = arith.constant 384 : index
    %70 = vector.load %arg9[%c1_61, %c384_62] : memref<2x2048xf32, #tpu.memory_space<vmem>>, vector<1x128xf32>
    tpu.vector_store %arg9[%c1_61, %c384_62], %69 {strides = array<i32>} : memref<2x2048xf32, #tpu.memory_space<vmem>>, vector<1x128xf32>,
    %c20 = arith.constant 20 : index
    %c0_63 = arith.constant 0 : index
    %71 = vector.load %arg8[%c20, %c0_63] : memref<32x128xf32, #tpu.memory_space<vmem>>, vector<1x128xf32>
    %c1_64 = arith.constant 1 : index
    %c512_65 = arith.constant 512 : index
    %72 = vector.load %arg9[%c1_64, %c512_65] : memref<2x2048xf32, #tpu.memory_space<vmem>>, vector<1x128xf32>
    tpu.vector_store %arg9[%c1_64, %c512_65], %71 {strides = array<i32>} : memref<2x2048xf32, #tpu.memory_space<vmem>>, vector<1x128xf32>,
    %c21 = arith.constant 21 : index
    %c0_66 = arith.constant 0 : index
    %73 = vector.load %arg8[%c21, %c0_66] : memref<32x128xf32, #tpu.memory_space<vmem>>, vector<1x128xf32>
    %c1_67 = arith.constant 1 : index
    %c640_68 = arith.constant 640 : index
    %74 = vector.load %arg9[%c1_67, %c640_68] : memref<2x2048xf32, #tpu.memory_space<vmem>>, vector<1x128xf32>
    tpu.vector_store %arg9[%c1_67, %c640_68], %73 {strides = array<i32>} : memref<2x2048xf32, #tpu.memory_space<vmem>>, vector<1x128xf32>,
    %c22 = arith.constant 22 : index
    %c0_69 = arith.constant 0 : index
    %75 = vector.load %arg8[%c22, %c0_69] : memref<32x128xf32, #tpu.memory_space<vmem>>, vector<1x128xf32>
    %c1_70 = arith.constant 1 : index
    %c768_71 = arith.constant 768 : index
    %76 = vector.load %arg9[%c1_70, %c768_71] : memref<2x2048xf32, #tpu.memory_space<vmem>>, vector<1x128xf32>
    tpu.vector_store %arg9[%c1_70, %c768_71], %75 {strides = array<i32>} : memref<2x2048xf32, #tpu.memory_space<vmem>>, vector<1x128xf32>,
    %c23 = arith.constant 23 : index
    %c0_72 = arith.constant 0 : index
    %77 = vector.load %arg8[%c23, %c0_72] : memref<32x128xf32, #tpu.memory_space<vmem>>, vector<1x128xf32>
    %c1_73 = arith.constant 1 : index
    %c896_74 = arith.constant 896 : index
    %78 = vector.load %arg9[%c1_73, %c896_74] : memref<2x2048xf32, #tpu.memory_space<vmem>>, vector<1x128xf32>
    tpu.vector_store %arg9[%c1_73, %c896_74], %77 {strides = array<i32>} : memref<2x2048xf32, #tpu.memory_space<vmem>>, vector<1x128xf32>,
    %c24 = arith.constant 24 : index
    %c0_75 = arith.constant 0 : index
    %79 = vector.load %arg8[%c24, %c0_75] : memref<32x128xf32, #tpu.memory_space<vmem>>, vector<1x128xf32>
    %c1_76 = arith.constant 1 : index
    %c1024_77 = arith.constant 1024 : index
    %80 = vector.load %arg9[%c1_76, %c1024_77] : memref<2x2048xf32, #tpu.memory_space<vmem>>, vector<1x128xf32>
    tpu.vector_store %arg9[%c1_76, %c1024_77], %79 {strides = array<i32>} : memref<2x2048xf32, #tpu.memory_space<vmem>>, vector<1x128xf32>,
    %c25 = arith.constant 25 : index
    %c0_78 = arith.constant 0 : index
    %81 = vector.load %arg8[%c25, %c0_78] : memref<32x128xf32, #tpu.memory_space<vmem>>, vector<1x128xf32>
    %c1_79 = arith.constant 1 : index
    %c1152_80 = arith.constant 1152 : index
    %82 = vector.load %arg9[%c1_79, %c1152_80] : memref<2x2048xf32, #tpu.memory_space<vmem>>, vector<1x128xf32>
    tpu.vector_store %arg9[%c1_79, %c1152_80], %81 {strides = array<i32>} : memref<2x2048xf32, #tpu.memory_space<vmem>>, vector<1x128xf32>,
    %c26 = arith.constant 26 : index
    %c0_81 = arith.constant 0 : index
    %83 = vector.load %arg8[%c26, %c0_81] : memref<32x128xf32, #tpu.memory_space<vmem>>, vector<1x128xf32>
    %c1_82 = arith.constant 1 : index
    %c1280_83 = arith.constant 1280 : index
    %84 = vector.load %arg9[%c1_82, %c1280_83] : memref<2x2048xf32, #tpu.memory_space<vmem>>, vector<1x128xf32>
    tpu.vector_store %arg9[%c1_82, %c1280_83], %83 {strides = array<i32>} : memref<2x2048xf32, #tpu.memory_space<vmem>>, vector<1x128xf32>,
    %c27 = arith.constant 27 : index
    %c0_84 = arith.constant 0 : index
    %85 = vector.load %arg8[%c27, %c0_84] : memref<32x128xf32, #tpu.memory_space<vmem>>, vector<1x128xf32>
    %c1_85 = arith.constant 1 : index
    %c1408_86 = arith.constant 1408 : index
    %86 = vector.load %arg9[%c1_85, %c1408_86] : memref<2x2048xf32, #tpu.memory_space<vmem>>, vector<1x128xf32>
    tpu.vector_store %arg9[%c1_85, %c1408_86], %85 {strides = array<i32>} : memref<2x2048xf32, #tpu.memory_space<vmem>>, vector<1x128xf32>,
    %c28 = arith.constant 28 : index
    %c0_87 = arith.constant 0 : index
    %87 = vector.load %arg8[%c28, %c0_87] : memref<32x128xf32, #tpu.memory_space<vmem>>, vector<1x128xf32>
    %c1_88 = arith.constant 1 : index
    %c1536_89 = arith.constant 1536 : index
    %88 = vector.load %arg9[%c1_88, %c1536_89] : memref<2x2048xf32, #tpu.memory_space<vmem>>, vector<1x128xf32>
    tpu.vector_store %arg9[%c1_88, %c1536_89], %87 {strides = array<i32>} : memref<2x2048xf32, #tpu.memory_space<vmem>>, vector<1x128xf32>,
    %c29 = arith.constant 29 : index
    %c0_90 = arith.constant 0 : index
    %89 = vector.load %arg8[%c29, %c0_90] : memref<32x128xf32, #tpu.memory_space<vmem>>, vector<1x128xf32>
    %c1_91 = arith.constant 1 : index
    %c1664_92 = arith.constant 1664 : index
    %90 = vector.load %arg9[%c1_91, %c1664_92] : memref<2x2048xf32, #tpu.memory_space<vmem>>, vector<1x128xf32>
    tpu.vector_store %arg9[%c1_91, %c1664_92], %89 {strides = array<i32>} : memref<2x2048xf32, #tpu.memory_space<vmem>>, vector<1x128xf32>,
    %c30 = arith.constant 30 : index
    %c0_93 = arith.constant 0 : index
    %91 = vector.load %arg8[%c30, %c0_93] : memref<32x128xf32, #tpu.memory_space<vmem>>, vector<1x128xf32>
    %c1_94 = arith.constant 1 : index
    %c1792_95 = arith.constant 1792 : index
    %92 = vector.load %arg9[%c1_94, %c1792_95] : memref<2x2048xf32, #tpu.memory_space<vmem>>, vector<1x128xf32>
    tpu.vector_store %arg9[%c1_94, %c1792_95], %91 {strides = array<i32>} : memref<2x2048xf32, #tpu.memory_space<vmem>>, vector<1x128xf32>,
    %c31 = arith.constant 31 : index
    %c0_96 = arith.constant 0 : index
    %93 = vector.load %arg8[%c31, %c0_96] : memref<32x128xf32, #tpu.memory_space<vmem>>, vector<1x128xf32>
    %c1_97 = arith.constant 1 : index
    %c1920_98 = arith.constant 1920 : index
    %94 = vector.load %arg9[%c1_97, %c1920_98] : memref<2x2048xf32, #tpu.memory_space<vmem>>, vector<1x128xf32>
    tpu.vector_store %arg9[%c1_97, %c1920_98], %93 {strides = array<i32>} : memref<2x2048xf32, #tpu.memory_space<vmem>>, vector<1x128xf32>,
    %c0_99 = arith.constant 0 : index
    %c0_100 = arith.constant 0 : index
    %95 = vector.load %arg9[%c0_99, %c0_100] : memref<2x2048xf32, #tpu.memory_space<vmem>>, vector<2x2048xf32>
    %c0_101 = arith.constant 0 : index
    %c0_102 = arith.constant 0 : index
    %96 = vector.load %arg5[%c0_101, %c0_102] : memref<2048x128xf32, #tpu.memory_space<vmem>>, vector<2048x128xf32>
    %cst_103 = arith.constant dense<0.000000e+00> : vector<2x128xf32>
    %97 = tpu.matmul %95, %96, %cst_103 {dimension_numbers = #tpu.dot_dimension_numbers<[1], [0], [0], [1], [0, 0, 1, 1], [], []>} : vector<2x2048xf32>, vector<2048x128xf32>, vector<2x128xf32> -> vector<2x128xf32>
    %c0_104 = arith.constant 0 : index
    %c0_105 = arith.constant 0 : index
    %98 = vector.load %arg6[%c0_104, %c0_105] : memref<1x128xf32, #tpu.memory_space<vmem>>, vector<1x128xf32>
    %99 = vector.broadcast %98 : vector<1x128xf32> to vector<2x128xf32>
    %100 = arith.addf %97, %99 : vector<2x128xf32>
    %c0_106 = arith.constant 0 : index
    %c0_107 = arith.constant 0 : index
    %101 = vector.load %arg7[%c0_106, %c0_107] : memref<2x128xf32, #tpu.memory_space<vmem>>, vector<2x128xf32>
    tpu.vector_store %arg7[%c0_106, %c0_107], %100 {strides = array<i32>} : memref<2x128xf32, #tpu.memory_space<vmem>>, vector<2x128xf32>,
    return
  }
}

</mosaic_0001>

<bundles_post_ra>
// kernel: convnet_forward.2
= control target key start
LH: loop header
LB: loop body
LE: loop exit
PB: predicated region body
PF: predicated region fallthrough
CT: control target
= control target key end

     0   :  { %v1251_v60 = vmov 1.0   ;;  %vm1253_vm0 = vmmov 0   ;;  %vm324_vm1 = vcmask 261120   ;;  %s1878_s1 = inlined_call_operand.vmem [shape: f32[128,128], index: 1, kind: input, shape index: {}]   ;;  %s1879_s0 = inlined_call_operand.vmem [shape: f32[288,128], index: 0, kind: input, shape index: {}]   ;;  %s1880_s2 = inlined_call_operand.vmem [shape: f32[1,128], index: 2, kind: input, shape index: {}]   ;;  %s1881_s3 = inlined_call_operand.vmem [shape: f32[1,128], index: 3, kind: input, shape index: {}]   ;;  %s1882_s4 = inlined_call_operand.vmem [shape: f32[1,128], index: 4, kind: input, shape index: {}]   ;;  %s1883_s5 = inlined_call_operand.vmem [shape: f32[288,128], index: 5, kind: output, shape index: {}]  }
   0x1   :  { %v56_v0 = vld [vmem:[%s1878_s1] sm:$0xff]  ;;  %v57_v1 = vld [vmem:[%s1878_s1 + $0x8] sm:$0xff]  ;;  %v58_v2 = vld [vmem:[%s1878_s1 + $0x10] sm:$0xff]  ;;  %392 = vmatprep.mubr.f32.mxu1 %v1251_v60 }
   0x2   :  { %v1137_v3 = vpack.c.bf16 %v57_v1, %v56_v0  ;;  %v59_v4 = vld [vmem:[%s1878_s1 + $0x18] sm:$0xff]  ;;  %v60_v6 = vld [vmem:[%s1878_s1 + $0x20] sm:$0xff]  ;;  %v61_v7 = vld [vmem:[%s1878_s1 + $0x28] sm:$0xff] }
   0x3   :  { %v1141_v5 = vpack.c.bf16 %v59_v4, %v58_v2  ;;  %v1145_v8 = vpack.c.bf16 %v61_v7, %v60_v6  ;;  %v20_v9 = vld [vmem:[%s1879_s0] sm:$0xff]  ;;  %v62_v10 = vld [vmem:[%s1878_s1 + $0x30] sm:$0xff]  ;;  %v63_v11 = vld [vmem:[%s1878_s1 + $0x38] sm:$0xff] }
   0x4   :  { %1138 = vmatprep.subr.bf16.mxu0 %v1137_v3  ;;  %1061 = vmatprep.mubr.f32.mxu0 %v20_v9  ;;  %v1149_v12 = vpack.c.bf16 %v63_v11, %v62_v10  ;;  %v64_v13 = vld [vmem:[%s1878_s1 + $0x40] sm:$0xff]  ;;  %v65_v14 = vld [vmem:[%s1878_s1 + $0x48] sm:$0xff]  ;;  %v66_v16 = vld [vmem:[%s1878_s1 + $0x50] sm:$0xff] }
   0x5   :  { %1140 = vmatpush3.bf16.msra.mxu0 %v1137_v3  ;;  %v1153_v15 = vpack.c.bf16 %v65_v14, %v64_v13  ;;  %v67_v17 = vld [vmem:[%s1878_s1 + $0x58] sm:$0xff]  ;;  %v68_v19 = vld [vmem:[%s1878_s1 + $0x60] sm:$0xff]  ;;  %v69_v20 = vld [vmem:[%s1878_s1 + $0x68] sm:$0xff] }
   0x6   :  { %1142 = vmatprep.subr.bf16.mxu0 %v1141_v5  ;;  %v1157_v18 = vpack.c.bf16 %v67_v17, %v66_v16  ;;  %v1161_v21 = vpack.c.bf16 %v69_v20, %v68_v19  ;;  %v70_v22 = vld [vmem:[%s1878_s1 + $0x70] sm:$0xff]  ;;  %v71_v23 = vld [vmem:[%s1878_s1 + $0x78] sm:$0xff]  ;;  %v21_v25 = vld [vmem:[%s1879_s0 + $0x8] sm:$0xff] }
   0x7   :  { %v1165_v24 = vpack.c.bf16 %v71_v23, %v70_v22  ;;  %v22_v26 = vld [vmem:[%s1879_s0 + $0x10] sm:$0xff]  ;;  %v23_v27 = vld [vmem:[%s1879_s0 + $0x18] sm:$0xff]  ;;  %v24_v28 = vld [vmem:[%s1879_s0 + $0x20] sm:$0xff] }
   0x8   :  { %v25_v29 = vld [vmem:[%s1879_s0 + $0x28] sm:$0xff]  ;;  %v26_v30 = vld [vmem:[%s1879_s0 + $0x30] sm:$0xff]  ;;  %v27_v31 = vld [vmem:[%s1879_s0 + $0x38] sm:$0xff] }
   0x9   :  { %1144 = vmatpush3.bf16.msra.mxu0 %v1141_v5  ;;  %v28_v32 = vld [vmem:[%s1879_s0 + $0x40] sm:$0xff]  ;;  %v29_v33 = vld [vmem:[%s1879_s0 + $0x48] sm:$0xff]  ;;  %v30_v34 = vld [vmem:[%s1879_s0 + $0x50] sm:$0xff] }
   0xa   :  { %1146 = vmatprep.subr.bf16.mxu0 %v1145_v8  ;;  %v31_v35 = vld [vmem:[%s1879_s0 + $0x58] sm:$0xff]  ;;  %v32_v36 = vld [vmem:[%s1879_s0 + $0x60] sm:$0xff]  ;;  %v33_v37 = vld [vmem:[%s1879_s0 + $0x68] sm:$0xff] }
   0xb   :  { %v34_v38 = vld [vmem:[%s1879_s0 + $0x70] sm:$0xff]  ;;  %v35_v39 = vld [vmem:[%s1879_s0 + $0x78] sm:$0xff]  ;;  %v36_v40 = vld [vmem:[%s1879_s0 + $0x80] sm:$0xff] }
   0xc   :  { %v37_v41 = vld [vmem:[%s1879_s0 + $0x88] sm:$0xff]  ;;  %v38_v42 = vld [vmem:[%s1879_s0 + $0x90] sm:$0xff]  ;;  %v39_v43 = vld [vmem:[%s1879_s0 + $0x98] sm:$0xff] }
   0xd   :  { %1148 = vmatpush3.bf16.msra.mxu0 %v1145_v8  ;;  %v40_v44 = vld [vmem:[%s1879_s0 + $0xa0] sm:$0xff]  ;;  %v41_v45 = vld [vmem:[%s1879_s0 + $0xa8] sm:$0xff]  ;;  %v42_v46 = vld [vmem:[%s1879_s0 + $0xb0] sm:$0xff] }
   0xe   :  { %1150 = vmatprep.subr.bf16.mxu0 %v1149_v12  ;;  %v43_v47 = vld [vmem:[%s1879_s0 + $0xb8] sm:$0xff]  ;;  %v44_v48 = vld [vmem:[%s1879_s0 + $0xc0] sm:$0xff]  ;;  %v45_v49 = vld [vmem:[%s1879_s0 + $0xc8] sm:$0xff] }
   0xf   :  { %v46_v50 = vld [vmem:[%s1879_s0 + $0xd0] sm:$0xff]  ;;  %v47_v51 = vld [vmem:[%s1879_s0 + $0xd8] sm:$0xff]  ;;  %v48_v52 = vld [vmem:[%s1879_s0 + $0xe0] sm:$0xff] }
  0x10   :  { %v49_v53 = vld [vmem:[%s1879_s0 + $0xe8] sm:$0xff]  ;;  %v50_v54 = vld [vmem:[%s1879_s0 + $0xf0] sm:$0xff]  ;;  %v51_v55 = vld [vmem:[%s1879_s0 + $0xf8] sm:$0xff] }
  0x11   :  { %1152 = vmatpush3.bf16.msra.mxu0 %v1149_v12  ;;  %v52_v56 = vld [vmem:[%s1879_s0 + $0x100] sm:$0xff]  ;;  %v53_v57 = vld [vmem:[%s1879_s0 + $0x108] sm:$0xff]  ;;  %v54_v58 = vld [vmem:[%s1879_s0 + $0x110] sm:$0xff] }
  0x12   :  { %1154 = vmatprep.subr.bf16.mxu0 %v1153_v15  ;;  %v55_v59 = vld [vmem:[%s1879_s0 + $0x118] sm:$0xff]  ;;  %v1453_v13 = vld [vmem:[%s1880_s2] ss:$0 sm:$0xff] }
  0x15   :  { %1156 = vmatpush3.bf16.msra.mxu0 %v1153_v15 }
  0x16   :  { %1158 = vmatprep.subr.bf16.mxu0 %v1157_v18 }
  0x19   :  { %1160 = vmatpush3.bf16.msra.mxu0 %v1157_v18 }
  0x1a   :  { %1162 = vmatprep.subr.bf16.mxu0 %v1161_v21 }
  0x1d   :  { %1164 = vmatpush3.bf16.msra.mxu0 %v1161_v21 }
  0x1e   :  { %1166 = vmatprep.subr.bf16.mxu0 %v1165_v24 }
  0x21   :  { %1168 = vmatpush3.bf16.msra.mxu0 %v1165_v24 }
  0x24   :  { %1062 = vmatmul.mubr.f32.vlgmr.msra.gmra.mrb[0].mxu0 %v21_v25 }
  0x25   :  { %1064 = vmatprep.mubr.f32.mxu0 %v22_v26 }
  0x28   :  { %1065 = vmatmul.mubr.f32.gmra.mrb[2].mxu0 %v23_v27 }
  0x29   :  { %1067 = vmatprep.mubr.f32.mxu0 %v24_v28 }
  0x2c   :  { %1068 = vmatmul.mubr.f32.gmra.mrb[4].mxu0 %v25_v29 }
  0x2d   :  { %1070 = vmatprep.mubr.f32.mxu0 %v26_v30 }
  0x30   :  { %1071 = vmatmul.mubr.f32.gmra.mrb[6].mxu0 %v27_v31 }
  0x31   :  { %1073 = vmatprep.mubr.f32.mxu0 %v28_v32 }
  0x34   :  { %1074 = vmatmul.mubr.f32.gmra.mrb[8].mxu0 %v29_v33 }
  0x35   :  { %1076 = vmatprep.mubr.f32.mxu0 %v30_v34 }
  0x38   :  { %1077 = vmatmul.mubr.f32.gmra.mrb[10].mxu0 %v31_v35 }
  0x39   :  { %1079 = vmatprep.mubr.f32.mxu0 %v32_v36 }
  0x3c   :  { %1080 = vmatmul.mubr.f32.gmra.mrb[12].mxu0 %v33_v37 }
  0x3d   :  { %1082 = vmatprep.mubr.f32.mxu0 %v34_v38 }
  0x40   :  { %1083 = vmatmul.mubr.f32.gmra.mrb[14].mxu0 %v35_v39 }
  0x41   :  { %1085 = vmatprep.mubr.f32.mxu0 %v36_v40 }
  0x44   :  { %1086 = vmatmul.mubr.f32.gmra.mrb[16].mxu0 %v37_v41 }
  0x45   :  { %1088 = vmatprep.mubr.f32.mxu0 %v38_v42 }
  0x48   :  { %1089 = vmatmul.mubr.f32.gmra.mrb[18].mxu0 %v39_v43 }
  0x49   :  { %1091 = vmatprep.mubr.f32.mxu0 %v40_v44 }
  0x4c   :  { %1092 = vmatmul.mubr.f32.gmra.mrb[20].mxu0 %v41_v45 }
  0x4d   :  { %1094 = vmatprep.mubr.f32.mxu0 %v42_v46 }
  0x50   :  { %1095 = vmatmul.mubr.f32.gmra.mrb[22].mxu0 %v43_v47 }
  0x51   :  { %1097 = vmatprep.mubr.f32.mxu0 %v44_v48 }
  0x54   :  { %1098 = vmatmul.mubr.f32.gmra.mrb[24].mxu0 %v45_v49 }
  0x55   :  { %1100 = vmatprep.mubr.f32.mxu0 %v46_v50 }
  0x58   :  { %1101 = vmatmul.mubr.f32.gmra.mrb[26].mxu0 %v47_v51 }
  0x59   :  { %1103 = vmatprep.mubr.f32.mxu0 %v48_v52 }
  0x5c   :  { %1104 = vmatmul.mubr.f32.gmra.mrb[28].mxu0 %v49_v53 }
  0x5d   :  { %1106 = vmatprep.mubr.f32.mxu0 %v50_v54 }
  0x60   :  { %1107 = vmatmul.mubr.f32.gmra.mrb[30].mxu0 %v51_v55 }
  0x61   :  { %1109 = vmatprep.mubr.f32.mxu0 %v52_v56 }
  0x64   :  { %1110 = vmatmul.mubr.f32.gmra.mrb[32].mxu0 %v53_v57 }
  0x65   :  { %1112 = vmatprep.mubr.f32.mxu0 %v54_v58 }
  0x68   :  { %1113 = vmatmul.mubr.f32.gmra.mrb[34].mxu0 %v55_v59 }
  0xf7   :  { %v1063_v61 = vpop.f32.mrb[0].mxu0 }
  0xf8   :  { %v145_v62 = vpop.f32.mrb[1].mxu0  ;;  %v1456_v15 = vadd.f32 %v1063_v61, %v1453_v13 }
  0xf9   :  { %v1459_v16 = vadd.f32 %v1453_v13, %v145_v62 }
  0xfb   :  { %v1066_v63 = vpop.f32.mrb[2].mxu0  ;;  %v1171_v26 = vpack.c.bf16 %v1456_v15, %v1459_v16 }
  0xfc   :  { %v155_v0 = vpop.f32.mrb[3].mxu0  ;;  %v1470_v22 = vadd.f32 %v1066_v63, %v1453_v13 }
  0xfd   :  { %v1473_v23 = vadd.f32 %v1453_v13, %v155_v0 }
  0xff   :  { %v1069_v1 = vpop.f32.mrb[4].mxu0  ;;  %v1175_v34 = vpack.c.bf16 %v1470_v22, %v1473_v23 }
 0x100   :  { %v165_v2 = vpop.f32.mrb[5].mxu0  ;;  %v1486_v30 = vadd.f32 %v1069_v1, %v1453_v13 }
 0x101   :  { %v1489_v31 = vadd.f32 %v1453_v13, %v165_v2 }
 0x103   :  { %v1072_v3 = vpop.f32.mrb[6].mxu0  ;;  %v1179_v42 = vpack.c.bf16 %v1486_v30, %v1489_v31 }
 0x104   :  { %v175_v4 = vpop.f32.mrb[7].mxu0  ;;  %v1502_v38 = vadd.f32 %v1072_v3, %v1453_v13 }
 0x105   :  { %v1505_v39 = vadd.f32 %v1453_v13, %v175_v4 }
 0x107   :  { %v1075_v5 = vpop.f32.mrb[8].mxu0  ;;  %v1183_v50 = vpack.c.bf16 %v1502_v38, %v1505_v39 }
 0x108   :  { %v185_v6 = vpop.f32.mrb[9].mxu0  ;;  %v1518_v46 = vadd.f32 %v1075_v5, %v1453_v13 }
 0x109   :  { %v1521_v47 = vadd.f32 %v1453_v13, %v185_v6 }
 0x10b   :  { %v1078_v7 = vpop.f32.mrb[10].mxu0  ;;  %v1187_v58 = vpack.c.bf16 %v1518_v46, %v1521_v47 }
 0x10c   :  { %v195_v8 = vpop.f32.mrb[11].mxu0  ;;  %v1534_v54 = vadd.f32 %v1078_v7, %v1453_v13 }
 0x10d   :  { %v1537_v55 = vadd.f32 %v1453_v13, %v195_v8 }
 0x10f   :  { %v1442_v9 = vpop.f32.mrb[12].mxu0  ;;  %v1191_v3 = vpack.c.bf16 %v1534_v54, %v1537_v55 }
 0x110   :  { %v1444_v10 = vpop.f32.mrb[13].mxu0  ;;  %v1551_v63 = vadd.f32 %v1442_v9, %v1453_v13 }
 0x111   :  { %v1555_v0 = vadd.f32 %v1453_v13, %v1444_v10 }
 0x113   :  { %v1446_v11 = vpop.f32.mrb[14].mxu0 }
 0x114   :  { %v1448_v12 = vpop.f32.mrb[15].mxu0  ;;  %v1569_v7 = vadd.f32 %v1446_v11, %v1453_v13 }
 0x115   :  { %v1573_v8 = vadd.f32 %v1453_v13, %v1448_v12 }
 0x117   :  { %v1087_v14 = vpop.f32.mrb[16].mxu0 }
 0x118   :  { %v1462_v17 = vadd.f32 %v1087_v14, %v1453_v13  ;;  %v225_v18 = vpop.f32.mrb[17].mxu0  ;;  %v1195_v14 = vpack.c.bf16 %v1551_v63, %v1555_v0 }
 0x119   :  { %v1465_v19 = vadd.f32 %v1453_v13, %v225_v18 }
 0x11b   :  { %v1090_v20 = vpop.f32.mrb[18].mxu0  ;;  %v1169_v21 = vpack.c.bf16 %v1462_v17, %v1465_v19 }
 0x11c   :  { %v1476_v24 = vadd.f32 %v1090_v20, %v1453_v13  ;;  %v235_v25 = vpop.f32.mrb[19].mxu0 }
 0x11d   :  { %v1481_v27 = vadd.f32 %v1453_v13, %v235_v25  ;;  %1170 = vmatprep.subr.bf16.mxu1 %v1169_v21  ;;  %v1199_v25 = vpack.c.bf16 %v1569_v7, %v1573_v8 }
 0x11e   :  { %1172 = vmatpush3.bf16.msra.mxu1 %v1171_v26 }
 0x11f   :  { %v1093_v28 = vpop.f32.mrb[20].mxu0  ;;  %v1173_v29 = vpack.c.bf16 %v1476_v24, %v1481_v27 }
 0x120   :  { %v1492_v32 = vadd.f32 %v1093_v28, %v1453_v13  ;;  %v245_v33 = vpop.f32.mrb[21].mxu0 }
 0x121   :  { %v1497_v35 = vadd.f32 %v1453_v13, %v245_v33  ;;  %1174 = vmatprep.subr.bf16.mxu1 %v1173_v29  ;;  %v1252_v33 = vmov 0.0|0.0  }
 0x122   :  { %1176 = vmatpush3.bf16.msra.mxu1 %v1175_v34 }
 0x123   :  { %v1096_v36 = vpop.f32.mrb[22].mxu0  ;;  %v1177_v37 = vpack.c.bf16 %v1492_v32, %v1497_v35 }
 0x124   :  { %v1508_v40 = vadd.f32 %v1096_v36, %v1453_v13  ;;  %v255_v41 = vpop.f32.mrb[23].mxu0 }
 0x125   :  { %v1513_v43 = vadd.f32 %v1453_v13, %v255_v41  ;;  %1178 = vmatprep.subr.bf16.mxu1 %v1177_v37  ;;  %v486_v37 = vmul.f32 %v1462_v17, %v1462_v17  ;;  %v485_v41 = vmul.f32 %v1465_v19, %v1465_v19 }
 0x126   :  { %1180 = vmatpush3.bf16.msra.mxu1 %v1179_v42 }
 0x127   :  { %v1099_v44 = vpop.f32.mrb[24].mxu0  ;;  %v1181_v45 = vpack.c.bf16 %v1508_v40, %v1513_v43 }
 0x128   :  { %v1524_v48 = vadd.f32 %v1099_v44, %v1453_v13  ;;  %v265_v49 = vpop.f32.mrb[25].mxu0  ;;  %v1254_v44 = vmov 0.0  }
 0x129   :  { %v1529_v51 = vadd.f32 %v1453_v13, %v265_v49  ;;  %1182 = vmatprep.subr.bf16.mxu1 %v1181_v45  ;;  %v470_v49 = vmul.f32 %v1456_v15, %v1456_v15 }
 0x12a   :  { %1184 = vmatpush3.bf16.msra.mxu1 %v1183_v50  ;;  %v488_v50 = vmul.f32 %v1476_v24, %v1476_v24 }
 0x12b   :  { %v1102_v52 = vpop.f32.mrb[26].mxu0  ;;  %v1185_v53 = vpack.c.bf16 %v1524_v48, %v1529_v51 }
 0x12c   :  { %v1540_v56 = vadd.f32 %v1102_v52, %v1453_v13  ;;  %v275_v57 = vpop.f32.mrb[27].mxu0  ;;  %v487_v52 = vmul.f32 %v1481_v27, %v1481_v27 }
 0x12d   :  { %v1545_v59 = vadd.f32 %v1453_v13, %v275_v57  ;;  %1186 = vmatprep.subr.bf16.mxu1 %v1185_v53  ;;  %v1207_v53 = vpack.c.bf16 %v486_v37, %v485_v41 }
 0x12e   :  { %1188 = vmatpush3.bf16.msra.mxu1 %v1187_v58  ;;  %v472_v58 = vmul.f32 %v1470_v22, %v1470_v22 }
 0x12f   :  { %v1105_v61 = vpop.f32.mrb[28].mxu0  ;;  %v1189_v62 = vpack.c.bf16 %v1540_v56, %v1545_v59 }
 0x130   :  { %v1558_v1 = vadd.f32 %v1105_v61, %v1453_v13  ;;  %v285_v2 = vpop.f32.mrb[29].mxu0  ;;  %v471_v61 = vmul.f32 %v1473_v23, %v1473_v23 }
 0x131   :  { %v1563_v4 = vadd.f32 %v1453_v13, %v285_v2  ;;  %1190 = vmatprep.subr.bf16.mxu1 %v1189_v62  ;;  %v490_v62 = vmul.f32 %v1492_v32, %v1492_v32  ;;  %v489_v2 = vmul.f32 %v1497_v35, %v1497_v35 }
 0x132   :  { %1192 = vmatpush3.bf16.msra.mxu1 %v1191_v3  ;;  %v1211_v3 = vpack.c.bf16 %v488_v50, %v487_v52  ;;  %v495_v50 = vmul.f32 %v1545_v59, %v1545_v59 }
 0x133   :  { %v1108_v5 = vpop.f32.mrb[30].mxu0  ;;  %v1193_v6 = vpack.c.bf16 %v1558_v1, %v1563_v4 }
 0x134   :  { %v1576_v9 = vadd.f32 %v1108_v5, %v1453_v13  ;;  %v295_v10 = vpop.f32.mrb[31].mxu0  ;;  %v1213_v5 = vpack.c.bf16 %v472_v58, %v471_v61  ;;  %v479_v58 = vmul.f32 %v1537_v55, %v1537_v55  ;;  %v498_v61 = vmul.f32 %v1558_v1, %v1558_v1 }
 0x135   :  { %v1581_v18 = vadd.f32 %v1453_v13, %v295_v10  ;;  %1194 = vmatprep.subr.bf16.mxu1 %v1193_v6  ;;  %v474_v6 = vmul.f32 %v1486_v30, %v1486_v30  ;;  %v473_v10 = vmul.f32 %v1489_v31, %v1489_v31 }
 0x136   :  { %1196 = vmatpush3.bf16.msra.mxu1 %v1195_v14  ;;  %v492_v14 = vmul.f32 %v1508_v40, %v1508_v40 }
 0x137   :  { %v1111_v20 = vpop.f32.mrb[32].mxu0  ;;  %v1197_v11 = vpack.c.bf16 %v1576_v9, %v1581_v18 }
 0x138   :  { %v1586_v21 = vadd.f32 %v1111_v20, %v1453_v13  ;;  %v305_v12 = vpop.f32.mrb[33].mxu0  ;;  %v491_v20 = vmul.f32 %v1513_v43, %v1513_v43 }
 0x139   :  { %v1591_v26 = vadd.f32 %v1453_v13, %v305_v12  ;;  %1198 = vmatprep.subr.bf16.mxu1 %v1197_v11  ;;  %v1215_v11 = vpack.c.bf16 %v490_v62, %v489_v2  ;;  %v1217_v12 = vpack.c.bf16 %v474_v6, %v473_v10  ;;  %v497_v62 = vmul.f32 %v1563_v4, %v1563_v4 }
 0x13a   :  { %1200 = vmatpush3.bf16.msra.mxu1 %v1199_v25  ;;  %v476_v25 = vmul.f32 %v1502_v38, %v1502_v38  ;;  %v1219_v37 = vpack.c.bf16 %v492_v14, %v491_v20  ;;  %v481_v6 = vmul.f32 %v1555_v0, %v1555_v0  ;;  %v500_v10 = vmul.f32 %v1576_v9, %v1576_v9 }
 0x13b   :  { %v1202_v28 = vpack.c.bf16 %v1586_v21, %v1591_v26  ;;  %v1114_v29 = vpop.f32.mrb[34].mxu0  ;;  %1201 = vmatprep.subr.bf16.mxu1 %v1252_v33  ;;  %v499_v14 = vmul.f32 %v1581_v18, %v1581_v18  ;;  %v1231_v20 = vpack.c.bf16 %v498_v61, %v497_v62 }
 0x13c   :  { %v1597_v34 = vadd.f32 %v1114_v29, %v1453_v13  ;;  %v315_v36 = vpop.f32.mrb[35].mxu0  ;;  %v494_v29 = vmul.f32 %v1524_v48, %v1524_v48 }
 0x13d   :  { %v1604_v42 = vadd.f32 %v1453_v13, %v315_v36  ;;  %393 = vmatmul.mubr.f32.vlgmr.msra.gmra.mrb[0].mxu1 %v1251_v60  ;;  %v469_v13 = vmul.f32 %v1459_v16, %v1459_v16  ;;  %v493_v36 = vmul.f32 %v1529_v51, %v1529_v51 }
 0x13e   :  { %1203 = vmatpush3.bf16.msra.mxu1 %v1202_v28  ;;  %1123 = vmatprep.mubr.msk.f32.mxu1 %vm1253_vm0, %v1254_v44  ;;  %v475_v28 = vmul.f32 %v1505_v39, %v1505_v39 }
 0x13f   :  { %v1205_v45 = vpack.c.bf16 %v1597_v34, %v1604_v42  ;;  %1204 = vmatprep.subr.bf16.mxu1 %v1252_v33  ;;  %v1209_v57 = vpack.c.bf16 %v470_v49, %v469_v13  ;;  %v477_v49 = vmul.f32 %v1521_v47, %v1521_v47  ;;  %v496_v13 = vmul.f32 %v1540_v56, %v1540_v56 }
 0x140   :  { %v1221_v41 = vpack.c.bf16 %v476_v25, %v475_v28  ;;  %v1223_v52 = vpack.c.bf16 %v494_v29, %v493_v36  ;;  %v483_v25 = vmul.f32 %v1573_v8, %v1573_v8  ;;  %v1235_v28 = vpack.c.bf16 %v500_v10, %v499_v14 }
 0x141   :  { %v1227_v2 = vpack.c.bf16 %v496_v13, %v495_v50  ;;  %v502_v36 = vmul.f32 %v1586_v21, %v1586_v21 }
 0x142   :  { %1206 = vmatpush3.bf16.msra.mxu1 %v1205_v45  ;;  %v478_v45 = vmul.f32 %v1518_v46, %v1518_v46 }
 0x143   :  { %1208 = vmatprep.subr.bf16.mxu1 %v1207_v53 }
 0x144   :  { %v1225_v53 = vpack.c.bf16 %v478_v45, %v477_v49  ;;  %v504_v45 = vmul.f32 %v1597_v34, %v1597_v34  ;;  %v503_v49 = vmul.f32 %v1604_v42, %v1604_v42 }
 0x145   :  { %1124 = vmatmul.mubr.msk.f32.vlgmr.msra.gmra.mrb[2].mxu1 %vm324_vm1, %v1251_v60 }
 0x146   :  { %1210 = vmatpush3.bf16.msra.mxu1 %v1209_v57  ;;  %569 = vmatprep.mubr.f32.mxu1 %v1251_v60  ;;  %v480_v57 = vmul.f32 %v1534_v54, %v1534_v54  ;;  %v1243_v13 = vpack.c.bf16 %v504_v45, %v503_v49 }
 0x147   :  { %1212 = vmatprep.subr.bf16.mxu1 %v1211_v3 }
 0x148   :  { %v1229_v3 = vpack.c.bf16 %v480_v57, %v479_v58 }
 0x14a   :  { %1214 = vmatpush3.bf16.msra.mxu1 %v1213_v5  ;;  %v482_v5 = vmul.f32 %v1551_v63, %v1551_v63 }
 0x14b   :  { %1216 = vmatprep.subr.bf16.mxu1 %v1215_v11 }
 0x14c   :  { %v1233_v11 = vpack.c.bf16 %v482_v5, %v481_v6  ;;  %v648_v5 = vlaneseq }
 0x14e   :  { %1218 = vmatpush3.bf16.msra.mxu1 %v1217_v12  ;;  %v484_v12 = vmul.f32 %v1569_v7, %v1569_v7  ;;  %v649_v10 = vshrl.u32 %v648_v5, 7 }
 0x14f   :  { %1220 = vmatprep.subr.bf16.mxu1 %v1219_v37  ;;  %v501_v37 = vmul.f32 %v1591_v26, %v1591_v26 }
 0x150   :  { %v1237_v29 = vpack.c.bf16 %v484_v12, %v483_v25  ;;  %v650_v12 = vsub.s32 0, %v649_v10 }
 0x152   :  { %1222 = vmatpush3.bf16.msra.mxu1 %v1221_v41  ;;  %v1240_v41 = vpack.c.bf16 %v502_v36, %v501_v37 }
 0x153   :  { %1224 = vmatprep.subr.bf16.mxu1 %v1223_v52 }
 0x156   :  { %1226 = vmatpush3.bf16.msra.mxu1 %v1225_v53 }
 0x157   :  { %1228 = vmatprep.subr.bf16.mxu1 %v1227_v2 }
 0x15a   :  { %1230 = vmatpush3.bf16.msra.mxu1 %v1229_v3 }
 0x15b   :  { %1232 = vmatprep.subr.bf16.mxu1 %v1231_v20 }
 0x15e   :  { %1234 = vmatpush3.bf16.msra.mxu1 %v1233_v11 }
 0x15f   :  { %1236 = vmatprep.subr.bf16.mxu1 %v1235_v28 }
 0x162   :  { %1238 = vmatpush3.bf16.msra.mxu1 %v1237_v29 }
 0x163   :  { %1239 = vmatprep.subr.bf16.mxu1 %v1252_v33 }
 0x165   :  { %570 = vmatmul.mubr.f32.vlgmr.msra.gmra.mrb[4].mxu1 %v1251_v60 }
 0x166   :  { %1241 = vmatpush3.bf16.msra.mxu1 %v1240_v41  ;;  %1134 = vmatprep.mubr.msk.f32.mxu1 %vm1253_vm0, %v1254_v44 }
 0x167   :  { %1242 = vmatprep.subr.bf16.mxu1 %v1252_v33 }
 0x16a   :  { %1244 = vmatpush3.bf16.msra.mxu1 %v1243_v13 }
 0x16d   :  { %1135 = vmatmul.mubr.msk.f32.vlgmr.msra.gmra.mrb[6].mxu1 %vm324_vm1, %v1251_v60 }
 0x210   :  { %v981_v50 = vpop.f32.mrb[0].mxu1 }
 0x211   :  { %v982_v52 = vpop.f32.mrb[1].mxu1 }
 0x212   :  { %v983_v53 = vadd.f32 %v982_v52, %v981_v50 }
 0x218   :  { %v464_v57 = vpop.f32.mrb[2].mxu1 }
 0x219   :  { %v465_v58 = vadd.f32 %v983_v53, %v464_v57  ;;  %v1125_v61 = vpop.f32.mrb[3].mxu1 }
 0x21b   :  { %v468_v6 = vmul.f32 0.0034722222, %v465_v58 }
 0x21d   :  { %v646_v20 = vmul.f32 %v468_v6, %v468_v6  ;;  %v1690_v28 = vrot.slane %v468_v6, %v650_v12 }
 0x21f   :  { %v652_v29 = vsub.f32 %v1459_v16, %v1690_v28  ;;  %v653_v36 = vsub.f32 %v1456_v15, %v1690_v28  ;;  %v654_v37 = vsub.f32 %v1473_v23, %v1690_v28  ;;  %v655_v41 = vsub.f32 %v1470_v22, %v1690_v28 }
 0x220   :  { %v656_v45 = vsub.f32 %v1489_v31, %v1690_v28  ;;  %v657_v49 = vsub.f32 %v1486_v30, %v1690_v28  ;;  %v658_v13 = vsub.f32 %v1505_v39, %v1690_v28  ;;  %v659_v16 = vsub.f32 %v1502_v38, %v1690_v28 }
 0x221   :  { %v660_v15 = vsub.f32 %v1521_v47, %v1690_v28  ;;  %v661_v23 = vsub.f32 %v1518_v46, %v1690_v28  ;;  %v662_v22 = vsub.f32 %v1537_v55, %v1690_v28  ;;  %v663_v31 = vsub.f32 %v1534_v54, %v1690_v28 }
 0x222   :  { %v664_v30 = vsub.f32 %v1555_v0, %v1690_v28  ;;  %v665_v39 = vsub.f32 %v1551_v63, %v1690_v28  ;;  %v666_v38 = vsub.f32 %v1573_v8, %v1690_v28  ;;  %v667_v47 = vsub.f32 %v1569_v7, %v1690_v28 }
 0x223   :  { %v668_v46 = vsub.f32 %v1465_v19, %v1690_v28  ;;  %v669_v55 = vsub.f32 %v1462_v17, %v1690_v28  ;;  %v670_v54 = vsub.f32 %v1481_v27, %v1690_v28  ;;  %v671_v0 = vsub.f32 %v1476_v24, %v1690_v28 }
 0x224   :  { %v672_v63 = vsub.f32 %v1497_v35, %v1690_v28  ;;  %v673_v8 = vsub.f32 %v1492_v32, %v1690_v28  ;;  %v674_v7 = vsub.f32 %v1513_v43, %v1690_v28  ;;  %v675_v19 = vsub.f32 %v1508_v40, %v1690_v28 }
 0x225   :  { %v676_v17 = vsub.f32 %v1529_v51, %v1690_v28  ;;  %v677_v27 = vsub.f32 %v1524_v48, %v1690_v28  ;;  %v678_v24 = vsub.f32 %v1545_v59, %v1690_v28  ;;  %v679_v35 = vsub.f32 %v1540_v56, %v1690_v28 }
 0x226   :  { %v680_v32 = vsub.f32 %v1563_v4, %v1690_v28  ;;  %v681_v43 = vsub.f32 %v1558_v1, %v1690_v28  ;;  %v682_v40 = vsub.f32 %v1581_v18, %v1690_v28  ;;  %v683_v51 = vsub.f32 %v1576_v9, %v1690_v28 }
 0x227   :  { %v684_v48 = vsub.f32 %v1591_v26, %v1690_v28  ;;  %v685_v59 = vsub.f32 %v1586_v21, %v1690_v28  ;;  %v686_v56 = vsub.f32 %v1604_v42, %v1690_v28  ;;  %v687_v4 = vsub.f32 %v1597_v34, %v1690_v28 }
 0x238   :  { %v1021_v62 = vpop.f32.mrb[4].mxu1 }
 0x239   :  { %v1022_v2 = vpop.f32.mrb[5].mxu1 }
 0x23a   :  { %v1023_v3 = vadd.f32 %v1022_v2, %v1021_v62 }
 0x240   :  { %v641_v44 = vpop.f32.mrb[6].mxu1 }
 0x241   :  { %v642_v14 = vadd.f32 %v1023_v3, %v641_v44  ;;  %v1136_v33 = vpop.f32.mrb[7].mxu1 }
 0x243   :  { %v645_v11 = vmul.f32 0.0034722222, %v642_v14 }
 0x245   :  { %v647_v25 = vsub.f32 %v645_v11, %v646_v20 }
 0x247   :  { %v688_v60 = vadd.f32 1e-05, %v647_v25 }
 0x249   :  { %1249 = vrsqrt.f32 %v688_v60 }
 0x253   :  { %v1250_v50 = vpop.eup %1249 }
 0x254   :  { %v693_v52 = vrot.slane %v1250_v50, %v650_v12 }
 0x256   :  { %v694_v1 = vmul.f32 %v693_v52, %v652_v29  ;;  %v695_v53 = vmul.f32 %v693_v52, %v653_v36  ;;  %v696_v57 = vmul.f32 %v693_v52, %v654_v37  ;;  %v697_v18 = vmul.f32 %v693_v52, %v655_v41  ;;  %v895_v37 = vld [vmem:[%s1881_s3] ss:$0 sm:$0xff] }
 0x257   :  { %v698_v58 = vmul.f32 %v693_v52, %v656_v45  ;;  %v699_v61 = vmul.f32 %v693_v52, %v657_v49  ;;  %v700_v9 = vmul.f32 %v693_v52, %v658_v13  ;;  %v701_v62 = vmul.f32 %v693_v52, %v659_v16 }
 0x258   :  { %v702_v2 = vmul.f32 %v693_v52, %v660_v15  ;;  %v703_v3 = vmul.f32 %v693_v52, %v661_v23  ;;  %v704_v26 = vmul.f32 %v693_v52, %v662_v22  ;;  %v705_v5 = vmul.f32 %v693_v52, %v663_v31 }
 0x259   :  { %v706_v6 = vmul.f32 %v693_v52, %v664_v30  ;;  %v707_v21 = vmul.f32 %v693_v52, %v665_v39  ;;  %v708_v10 = vmul.f32 %v693_v52, %v666_v38  ;;  %v709_v44 = vmul.f32 %v693_v52, %v667_v47 }
 0x25a   :  { %v710_v42 = vmul.f32 %v693_v52, %v668_v46  ;;  %v711_v14 = vmul.f32 %v693_v52, %v669_v55  ;;  %v712_v33 = vmul.f32 %v693_v52, %v670_v54  ;;  %v713_v34 = vmul.f32 %v693_v52, %v671_v0 }
 0x25b   :  { %v714_v20 = vmul.f32 %v693_v52, %v672_v63  ;;  %v715_v11 = vmul.f32 %v693_v52, %v673_v8  ;;  %v716_v12 = vmul.f32 %v693_v52, %v674_v7  ;;  %v717_v25 = vmul.f32 %v693_v52, %v675_v19 }
 0x25c   :  { %v718_v60 = vmul.f32 %v693_v52, %v676_v17  ;;  %v719_v28 = vmul.f32 %v693_v52, %v677_v27  ;;  %v720_v29 = vmul.f32 %v693_v52, %v678_v24  ;;  %v721_v36 = vmul.f32 %v693_v52, %v679_v35 }
 0x25d   :  { %v722_v41 = vmul.f32 %v693_v52, %v680_v32  ;;  %v723_v45 = vmul.f32 %v693_v52, %v681_v43  ;;  %v724_v49 = vmul.f32 %v693_v52, %v682_v40  ;;  %v725_v13 = vmul.f32 %v693_v52, %v683_v51 }
 0x25e   :  { %v726_v16 = vmul.f32 %v693_v52, %v684_v48  ;;  %v727_v15 = vmul.f32 %v693_v52, %v685_v59  ;;  %v728_v23 = vmul.f32 %v693_v52, %v686_v56  ;;  %v729_v22 = vmul.f32 %v693_v52, %v687_v4 }
 0x25f   :  { %v737_v31 = vmul.f32 %v895_v37, %v694_v1  ;;  %v738_v30 = vmul.f32 %v895_v37, %v695_v53  ;;  %v739_v39 = vmul.f32 %v895_v37, %v696_v57  ;;  %v740_v38 = vmul.f32 %v895_v37, %v697_v18  ;;  %v896_v53 = vld [vmem:[%s1882_s4] ss:$0 sm:$0xff] }
 0x260   :  { %v741_v47 = vmul.f32 %v895_v37, %v698_v58  ;;  %v742_v46 = vmul.f32 %v895_v37, %v699_v61  ;;  %v743_v55 = vmul.f32 %v895_v37, %v700_v9  ;;  %v744_v54 = vmul.f32 %v895_v37, %v701_v62 }
 0x261   :  { %v745_v0 = vmul.f32 %v895_v37, %v702_v2  ;;  %v746_v63 = vmul.f32 %v895_v37, %v703_v3  ;;  %v747_v8 = vmul.f32 %v895_v37, %v704_v26  ;;  %v748_v7 = vmul.f32 %v895_v37, %v705_v5 }
 0x262   :  { %v749_v19 = vmul.f32 %v895_v37, %v706_v6  ;;  %v750_v17 = vmul.f32 %v895_v37, %v707_v21  ;;  %v751_v50 = vmul.f32 %v895_v37, %v708_v10  ;;  %v752_v27 = vmul.f32 %v895_v37, %v709_v44 }
 0x263   :  { %v753_v24 = vmul.f32 %v895_v37, %v710_v42  ;;  %v754_v35 = vmul.f32 %v895_v37, %v711_v14  ;;  %v755_v32 = vmul.f32 %v895_v37, %v712_v33  ;;  %v756_v43 = vmul.f32 %v895_v37, %v713_v34 }
 0x264   :  { %v757_v40 = vmul.f32 %v895_v37, %v714_v20  ;;  %v758_v51 = vmul.f32 %v895_v37, %v715_v11  ;;  %v759_v52 = vmul.f32 %v895_v37, %v716_v12  ;;  %v760_v48 = vmul.f32 %v895_v37, %v717_v25 }
 0x265   :  { %v761_v59 = vmul.f32 %v895_v37, %v718_v60  ;;  %v762_v56 = vmul.f32 %v895_v37, %v719_v28  ;;  %v763_v4 = vmul.f32 %v895_v37, %v720_v29  ;;  %v764_v1 = vmul.f32 %v895_v37, %v721_v36 }
 0x266   :  { %v765_v57 = vmul.f32 %v895_v37, %v722_v41  ;;  %v766_v18 = vmul.f32 %v895_v37, %v723_v45  ;;  %v767_v58 = vmul.f32 %v895_v37, %v724_v49  ;;  %v768_v61 = vmul.f32 %v895_v37, %v725_v13 }
 0x267   :  { %v769_v9 = vmul.f32 %v895_v37, %v726_v16  ;;  %v770_v62 = vmul.f32 %v895_v37, %v727_v15  ;;  %v771_v2 = vmul.f32 %v895_v37, %v728_v23  ;;  %v772_v3 = vmul.f32 %v895_v37, %v729_v22 }
 0x268   :  { %v780_v26 = vadd.f32 %v896_v53, %v737_v31  ;;  %v781_v5 = vadd.f32 %v896_v53, %v738_v30  ;;  %v782_v6 = vadd.f32 %v896_v53, %v739_v39  ;;  %v783_v21 = vadd.f32 %v896_v53, %v740_v38 }
 0x269   :  { %v784_v10 = vadd.f32 %v896_v53, %v741_v47  ;;  %v785_v44 = vadd.f32 %v896_v53, %v742_v46  ;;  %v786_v42 = vadd.f32 %v896_v53, %v743_v55  ;;  %v787_v14 = vadd.f32 %v896_v53, %v744_v54 }
 0x26a   :  { %v788_v33 = vadd.f32 %v896_v53, %v745_v0  ;;  %v789_v34 = vadd.f32 %v896_v53, %v746_v63  ;;  %v790_v20 = vadd.f32 %v896_v53, %v747_v8  ;;  %v791_v11 = vadd.f32 %v896_v53, %v748_v7 }
 0x26b   :  { %v792_v12 = vadd.f32 %v896_v53, %v749_v19  ;;  %v793_v25 = vadd.f32 %v896_v53, %v750_v17  ;;  %v794_v60 = vadd.f32 %v896_v53, %v751_v50  ;;  %v795_v28 = vadd.f32 %v896_v53, %v752_v27 }
 0x26c   :  { %v796_v29 = vadd.f32 %v896_v53, %v753_v24  ;;  %v797_v36 = vadd.f32 %v896_v53, %v754_v35  ;;  %v798_v41 = vadd.f32 %v896_v53, %v755_v32  ;;  %v799_v37 = vadd.f32 %v896_v53, %v756_v43 }
 0x26d   :  { %v800_v45 = vadd.f32 %v896_v53, %v757_v40  ;;  %v801_v49 = vadd.f32 %v896_v53, %v758_v51  ;;  %v802_v13 = vadd.f32 %v896_v53, %v759_v52  ;;  %v803_v16 = vadd.f32 %v896_v53, %v760_v48 }
 0x26e   :  { %v804_v15 = vadd.f32 %v896_v53, %v761_v59  ;;  %v805_v23 = vadd.f32 %v896_v53, %v762_v56  ;;  %v806_v22 = vadd.f32 %v896_v53, %v763_v4  ;;  %v807_v31 = vadd.f32 %v896_v53, %v764_v1 }
 0x26f   :  { %v808_v30 = vadd.f32 %v896_v53, %v765_v57  ;;  %v809_v39 = vadd.f32 %v896_v53, %v766_v18  ;;  %v810_v38 = vadd.f32 %v896_v53, %v767_v58  ;;  %v811_v47 = vadd.f32 %v896_v53, %v768_v61 }
 0x270   :  { %v812_v46 = vadd.f32 %v896_v53, %v769_v9  ;;  %v813_v55 = vadd.f32 %v896_v53, %v770_v62  ;;  %v814_v54 = vadd.f32 %v896_v53, %v771_v2  ;;  %v815_v0 = vadd.f32 %v896_v53, %v772_v3 }
 0x271   :  { %v816_v63 = vmul.f32 %v780_v26, %v780_v26  ;;  %v817_v8 = vmul.f32 %v781_v5, %v781_v5  ;;  %v818_v7 = vmul.f32 %v782_v6, %v782_v6  ;;  %v819_v19 = vmul.f32 %v783_v21, %v783_v21 }
 0x272   :  { %v820_v17 = vmul.f32 %v784_v10, %v784_v10  ;;  %v821_v50 = vmul.f32 %v785_v44, %v785_v44  ;;  %v822_v27 = vmul.f32 %v786_v42, %v786_v42  ;;  %v823_v24 = vmul.f32 %v787_v14, %v787_v14 }
 0x273   :  { %v824_v35 = vmul.f32 %v788_v33, %v788_v33  ;;  %v825_v32 = vmul.f32 %v789_v34, %v789_v34  ;;  %v826_v43 = vmul.f32 %v790_v20, %v790_v20  ;;  %v827_v40 = vmul.f32 %v791_v11, %v791_v11  ;;  %852 = vst [vmem:[%s1883_s5] sm:$0xff] %v816_v63 }
 0x274   :  { %853 = vst [vmem:[%s1883_s5 + $0x8] sm:$0xff] %v817_v8  ;;  %854 = vst [vmem:[%s1883_s5 + $0x10] sm:$0xff] %v818_v7  ;;  %v828_v51 = vmul.f32 %v792_v12, %v792_v12  ;;  %v829_v52 = vmul.f32 %v793_v25, %v793_v25  ;;  %v830_v48 = vmul.f32 %v794_v60, %v794_v60 }
 0x275   :  { %855 = vst [vmem:[%s1883_s5 + $0x18] sm:$0xff] %v819_v19  ;;  %v831_v59 = vmul.f32 %v795_v28, %v795_v28  ;;  %856 = vst [vmem:[%s1883_s5 + $0x20] sm:$0xff] %v820_v17  ;;  %v832_v56 = vmul.f32 %v796_v29, %v796_v29  ;;  %v833_v4 = vmul.f32 %v797_v36, %v797_v36 }
 0x276   :  { %857 = vst [vmem:[%s1883_s5 + $0x28] sm:$0xff] %v821_v50  ;;  %858 = vst [vmem:[%s1883_s5 + $0x30] sm:$0xff] %v822_v27  ;;  %v834_v1 = vmul.f32 %v798_v41, %v798_v41  ;;  %v835_v53 = vmul.f32 %v799_v37, %v799_v37  ;;  %v836_v57 = vmul.f32 %v800_v45, %v800_v45 }
 0x277   :  { %859 = vst [vmem:[%s1883_s5 + $0x38] sm:$0xff] %v823_v24  ;;  %860 = vst [vmem:[%s1883_s5 + $0x40] sm:$0xff] %v824_v35  ;;  %v837_v18 = vmul.f32 %v801_v49, %v801_v49  ;;  %v838_v58 = vmul.f32 %v802_v13, %v802_v13  ;;  %v839_v61 = vmul.f32 %v803_v16, %v803_v16 }
 0x278   :  { %861 = vst [vmem:[%s1883_s5 + $0x48] sm:$0xff] %v825_v32  ;;  %862 = vst [vmem:[%s1883_s5 + $0x50] sm:$0xff] %v826_v43  ;;  %v840_v9 = vmul.f32 %v804_v15, %v804_v15  ;;  %v841_v62 = vmul.f32 %v805_v23, %v805_v23  ;;  %v842_v2 = vmul.f32 %v806_v22, %v806_v22 }
 0x279   :  { %863 = vst [vmem:[%s1883_s5 + $0x58] sm:$0xff] %v827_v40  ;;  %864 = vst [vmem:[%s1883_s5 + $0x60] sm:$0xff] %v828_v51  ;;  %v843_v3 = vmul.f32 %v807_v31, %v807_v31  ;;  %v844_v26 = vmul.f32 %v808_v30, %v808_v30  ;;  %v845_v5 = vmul.f32 %v809_v39, %v809_v39 }
 0x27a   :  { %865 = vst [vmem:[%s1883_s5 + $0x68] sm:$0xff] %v829_v52  ;;  %866 = vst [vmem:[%s1883_s5 + $0x70] sm:$0xff] %v830_v48  ;;  %v846_v6 = vmul.f32 %v810_v38, %v810_v38  ;;  %v847_v21 = vmul.f32 %v811_v47, %v811_v47  ;;  %v848_v10 = vmul.f32 %v812_v46, %v812_v46 }
 0x27b   :  { %867 = vst [vmem:[%s1883_s5 + $0x78] sm:$0xff] %v831_v59  ;;  %868 = vst [vmem:[%s1883_s5 + $0x80] sm:$0xff] %v832_v56  ;;  %v849_v44 = vmul.f32 %v813_v55, %v813_v55  ;;  %v850_v42 = vmul.f32 %v814_v54, %v814_v54  ;;  %v851_v14 = vmul.f32 %v815_v0, %v815_v0 }
 0x27c   :  { %869 = vst [vmem:[%s1883_s5 + $0x88] sm:$0xff] %v833_v4  ;;  %870 = vst [vmem:[%s1883_s5 + $0x90] sm:$0xff] %v834_v1 }
 0x27d   :  { %871 = vst [vmem:[%s1883_s5 + $0x98] sm:$0xff] %v835_v53  ;;  %872 = vst [vmem:[%s1883_s5 + $0xa0] sm:$0xff] %v836_v57 }
 0x27e   :  { %873 = vst [vmem:[%s1883_s5 + $0xa8] sm:$0xff] %v837_v18  ;;  %874 = vst [vmem:[%s1883_s5 + $0xb0] sm:$0xff] %v838_v58 }
 0x27f   :  { %875 = vst [vmem:[%s1883_s5 + $0xb8] sm:$0xff] %v839_v61  ;;  %876 = vst [vmem:[%s1883_s5 + $0xc0] sm:$0xff] %v840_v9 }
 0x280   :  { %877 = vst [vmem:[%s1883_s5 + $0xc8] sm:$0xff] %v841_v62  ;;  %878 = vst [vmem:[%s1883_s5 + $0xd0] sm:$0xff] %v842_v2 }
 0x281   :  { %879 = vst [vmem:[%s1883_s5 + $0xd8] sm:$0xff] %v843_v3  ;;  %880 = vst [vmem:[%s1883_s5 + $0xe0] sm:$0xff] %v844_v26 }
 0x282   :  { %881 = vst [vmem:[%s1883_s5 + $0xe8] sm:$0xff] %v845_v5  ;;  %882 = vst [vmem:[%s1883_s5 + $0xf0] sm:$0xff] %v846_v6 }
 0x283   :  { %883 = vst [vmem:[%s1883_s5 + $0xf8] sm:$0xff] %v847_v21  ;;  %884 = vst [vmem:[%s1883_s5 + $0x100] sm:$0xff] %v848_v10 }
 0x284   :  { %885 = vst [vmem:[%s1883_s5 + $0x108] sm:$0xff] %v849_v44  ;;  %886 = vst [vmem:[%s1883_s5 + $0x110] sm:$0xff] %v850_v42 }
 0x285   :  { %887 = vst [vmem:[%s1883_s5 + $0x118] sm:$0xff] %v851_v14 }

// kernel: convnet_forward.3
= control target key start
LH: loop header
LB: loop body
LE: loop exit
PB: predicated region body
PF: predicated region fallthrough
CT: control target
= control target key end

     0   :  { %s6871_s0 = inlined_call_operand.vmem [shape: f32[32,3200], index: 0, kind: input, shape index: {}]   ;;  %s6872_s1 = inlined_call_operand.vmem [shape: f32[3200,128], index: 1, kind: input, shape index: {}]   ;;  %s6873_s2 = inlined_call_operand.vmem [shape: f32[1,128], index: 2, kind: input, shape index: {}]   ;;  %s6874_s3 = inlined_call_operand.vmem [shape: f32[1,128], index: 3, kind: input, shape index: {}]   ;;  %s6875_s4 = inlined_call_operand.vmem [shape: f32[1,128], index: 4, kind: input, shape index: {}]   ;;  %s6876_s5 = inlined_call_operand.vmem [shape: f32[2048,128], index: 5, kind: input, shape index: {}]   ;;  %s6877_s6 = inlined_call_operand.vmem [shape: f32[1,128], index: 6, kind: input, shape index: {}]   ;;  %s6878_s7 = inlined_call_operand.hbm [shape: f32[2,128], index: 7, kind: output, shape index: {}]  }
   0x1   :  { %v143_v0 = vld [vmem:[%s6872_s1 + $0x80] sm:$0xff]  ;;  %v144_v1 = vld [vmem:[%s6872_s1 + $0x88] sm:$0xff]  ;;  %v145_v11 = vld [vmem:[%s6872_s1 + $0x90] sm:$0xff] }
   0x2   :  { %v127_v2 = vld [vmem:[%s6872_s1] sm:$0xff]  ;;  %v3737_v3 = vpack.c.bf16 %v144_v1, %v143_v0  ;;  %v128_v4 = vld [vmem:[%s6872_s1 + $0x8] sm:$0xff]  ;;  %v146_v13 = vld [vmem:[%s6872_s1 + $0x98] sm:$0xff] }
   0x3   :  { %v175_v5 = vld [vmem:[%s6872_s1 + $0x180] sm:$0xff]  ;;  %v176_v6 = vld [vmem:[%s6872_s1 + $0x188] sm:$0xff]  ;;  %v3739_v7 = vpack.c.bf16 %v128_v4, %v127_v2  ;;  %v129_v14 = vld [vmem:[%s6872_s1 + $0x10] sm:$0xff]  ;;  %v3741_v16 = vpack.c.bf16 %v146_v13, %v145_v11 }
   0x4   :  { %v3769_v8 = vpack.c.bf16 %v176_v6, %v175_v5  ;;  %v159_v9 = vld [vmem:[%s6872_s1 + $0x100] sm:$0xff]  ;;  %v160_v10 = vld [vmem:[%s6872_s1 + $0x108] sm:$0xff]  ;;  %3738 = vmatprep.subr.bf16.mxu0 %v3737_v3  ;;  %v130_v15 = vld [vmem:[%s6872_s1 + $0x18] sm:$0xff] }
   0x5   :  { %v3771_v12 = vpack.c.bf16 %v160_v10, %v159_v9  ;;  %3740 = vmatpush3.bf16.msra.mxu0 %v3739_v7  ;;  %v3743_v17 = vpack.c.bf16 %v130_v15, %v129_v14  ;;  %v177_v18 = vld [vmem:[%s6872_s1 + $0x190] sm:$0xff]  ;;  %v178_v19 = vld [vmem:[%s6872_s1 + $0x198] sm:$0xff]  ;;  %v147_v23 = vld [vmem:[%s6872_s1 + $0xa0] sm:$0xff] }
   0x6   :  { %3770 = vmatprep.subr.bf16.mxu1 %v3769_v8  ;;  %v161_v20 = vld [vmem:[%s6872_s1 + $0x110] sm:$0xff]  ;;  %v3773_v21 = vpack.c.bf16 %v178_v19, %v177_v18  ;;  %v162_v22 = vld [vmem:[%s6872_s1 + $0x118] sm:$0xff]  ;;  %v148_v24 = vld [vmem:[%s6872_s1 + $0xa8] sm:$0xff]  ;;  %3742 = vmatprep.subr.bf16.mxu0 %v3741_v16 }
   0x7   :  { %3772 = vmatpush3.bf16.msra.mxu1 %v3771_v12  ;;  %v3775_v25 = vpack.c.bf16 %v162_v22, %v161_v20  ;;  %v3745_v26 = vpack.c.bf16 %v148_v24, %v147_v23  ;;  %v131_v27 = vld [vmem:[%s6872_s1 + $0x20] sm:$0xff]  ;;  %v132_v28 = vld [vmem:[%s6872_s1 + $0x28] sm:$0xff]  ;;  %v149_v35 = vld [vmem:[%s6872_s1 + $0xb0] sm:$0xff] }
   0x8   :  { %v179_v29 = vld [vmem:[%s6872_s1 + $0x1a0] sm:$0xff]  ;;  %3774 = vmatprep.subr.bf16.mxu1 %v3773_v21  ;;  %v180_v30 = vld [vmem:[%s6872_s1 + $0x1a8] sm:$0xff]  ;;  %v3747_v33 = vpack.c.bf16 %v132_v28, %v131_v27  ;;  %v150_v36 = vld [vmem:[%s6872_s1 + $0xb8] sm:$0xff] }
   0x9   :  { %v163_v31 = vld [vmem:[%s6872_s1 + $0x120] sm:$0xff]  ;;  %v164_v32 = vld [vmem:[%s6872_s1 + $0x128] sm:$0xff]  ;;  %3744 = vmatpush3.bf16.msra.mxu0 %v3743_v17  ;;  %v3777_v34 = vpack.c.bf16 %v180_v30, %v179_v29  ;;  %v133_v37 = vld [vmem:[%s6872_s1 + $0x30] sm:$0xff]  ;;  %v3749_v39 = vpack.c.bf16 %v150_v36, %v149_v35 }
   0xa   :  { %3746 = vmatprep.subr.bf16.mxu0 %v3745_v26  ;;  %v3779_v38 = vpack.c.bf16 %v164_v32, %v163_v31  ;;  %v134_v40 = vld [vmem:[%s6872_s1 + $0x38] sm:$0xff]  ;;  %v181_v41 = vld [vmem:[%s6872_s1 + $0x1b0] sm:$0xff]  ;;  %v151_v46 = vld [vmem:[%s6872_s1 + $0xc0] sm:$0xff] }
   0xb   :  { %3776 = vmatpush3.bf16.msra.mxu1 %v3775_v25  ;;  %v182_v42 = vld [vmem:[%s6872_s1 + $0x1b8] sm:$0xff]  ;;  %v165_v44 = vld [vmem:[%s6872_s1 + $0x130] sm:$0xff]  ;;  %v152_v47 = vld [vmem:[%s6872_s1 + $0xc8] sm:$0xff]  ;;  %v3751_v48 = vpack.c.bf16 %v134_v40, %v133_v37 }
   0xc   :  { %3778 = vmatprep.subr.bf16.mxu1 %v3777_v34  ;;  %v3781_v43 = vpack.c.bf16 %v182_v42, %v181_v41  ;;  %v166_v45 = vld [vmem:[%s6872_s1 + $0x138] sm:$0xff]  ;;  %v183_v49 = vld [vmem:[%s6872_s1 + $0x1c0] sm:$0xff]  ;;  %v184_v50 = vld [vmem:[%s6872_s1 + $0x1c8] sm:$0xff]  ;;  %v3753_v52 = vpack.c.bf16 %v152_v47, %v151_v46 }
   0xd   :  { %3748 = vmatpush3.bf16.msra.mxu0 %v3747_v33  ;;  %v3783_v51 = vpack.c.bf16 %v166_v45, %v165_v44  ;;  %v135_v53 = vld [vmem:[%s6872_s1 + $0x40] sm:$0xff]  ;;  %v136_v54 = vld [vmem:[%s6872_s1 + $0x48] sm:$0xff]  ;;  %v3785_v56 = vpack.c.bf16 %v184_v50, %v183_v49  ;;  %v153_v58 = vld [vmem:[%s6872_s1 + $0xd0] sm:$0xff] }
   0xe   :  { %3750 = vmatprep.subr.bf16.mxu0 %v3749_v39  ;;  %v167_v55 = vld [vmem:[%s6872_s1 + $0x140] sm:$0xff]  ;;  %v168_v57 = vld [vmem:[%s6872_s1 + $0x148] sm:$0xff]  ;;  %v154_v59 = vld [vmem:[%s6872_s1 + $0xd8] sm:$0xff]  ;;  %v3755_v62 = vpack.c.bf16 %v136_v54, %v135_v53 }
   0xf   :  { %3780 = vmatpush3.bf16.msra.mxu1 %v3779_v38  ;;  %v185_v60 = vld [vmem:[%s6872_s1 + $0x1d0] sm:$0xff]  ;;  %v186_v61 = vld [vmem:[%s6872_s1 + $0x1d8] sm:$0xff]  ;;  %v3787_v63 = vpack.c.bf16 %v168_v57, %v167_v55  ;;  %v3757_v0 = vpack.c.bf16 %v154_v59, %v153_v58  ;;  %v155_v6 = vld [vmem:[%s6872_s1 + $0xe0] sm:$0xff] }
  0x10   :  { %3782 = vmatprep.subr.bf16.mxu1 %v3781_v43  ;;  %v137_v1 = vld [vmem:[%s6872_s1 + $0x50] sm:$0xff]  ;;  %v138_v2 = vld [vmem:[%s6872_s1 + $0x58] sm:$0xff]  ;;  %v3789_v4 = vpack.c.bf16 %v186_v61, %v185_v60  ;;  %v156_v7 = vld [vmem:[%s6872_s1 + $0xe8] sm:$0xff] }
  0x11   :  { %3752 = vmatpush3.bf16.msra.mxu0 %v3751_v48  ;;  %v169_v3 = vld [vmem:[%s6872_s1 + $0x150] sm:$0xff]  ;;  %v170_v5 = vld [vmem:[%s6872_s1 + $0x158] sm:$0xff]  ;;  %v187_v8 = vld [vmem:[%s6872_s1 + $0x1e0] sm:$0xff]  ;;  %v3759_v10 = vpack.c.bf16 %v138_v2, %v137_v1  ;;  %v3761_v14 = vpack.c.bf16 %v156_v7, %v155_v6 }
  0x12   :  { %3754 = vmatprep.subr.bf16.mxu0 %v3753_v52  ;;  %v188_v9 = vld [vmem:[%s6872_s1 + $0x1e8] sm:$0xff]  ;;  %v139_v11 = vld [vmem:[%s6872_s1 + $0x60] sm:$0xff]  ;;  %v3791_v13 = vpack.c.bf16 %v170_v5, %v169_v3  ;;  %v157_v19 = vld [vmem:[%s6872_s1 + $0xf0] sm:$0xff] }
  0x13   :  { %3784 = vmatpush3.bf16.msra.mxu1 %v3783_v51  ;;  %v28_v12 = vld [vmem:[%s6871_s0 + $0x8] sm:$0xff]  ;;  %v171_v16 = vld [vmem:[%s6872_s1 + $0x160] sm:$0xff]  ;;  %v3793_v18 = vpack.c.bf16 %v188_v9, %v187_v8  ;;  %v158_v20 = vld [vmem:[%s6872_s1 + $0xf8] sm:$0xff] }
  0x14   :  { %3786 = vmatprep.subr.bf16.mxu1 %v3785_v56  ;;  %v140_v15 = vld [vmem:[%s6872_s1 + $0x68] sm:$0xff]  ;;  %598 = vmatprep.mubr.f32.mxu0 %v28_v12  ;;  %v30_v21 = vld [vmem:[%s6871_s0 + $0x18] sm:$0xff]  ;;  %v189_v22 = vld [vmem:[%s6872_s1 + $0x1f0] sm:$0xff]  ;;  %v3765_v26 = vpack.c.bf16 %v158_v20, %v157_v19 }
  0x15   :  { %3756 = vmatpush3.bf16.msra.mxu0 %v3755_v62  ;;  %v172_v17 = vld [vmem:[%s6872_s1 + $0x168] sm:$0xff]  ;;  %v190_v23 = vld [vmem:[%s6872_s1 + $0x1f8] sm:$0xff]  ;;  %683 = vmatprep.mubr.f32.mxu1 %v30_v21  ;;  %v3763_v24 = vpack.c.bf16 %v140_v15, %v139_v11  ;;  %v141_v27 = vld [vmem:[%s6872_s1 + $0x70] sm:$0xff] }
  0x16   :  { %3758 = vmatprep.subr.bf16.mxu0 %v3757_v0  ;;  %v3795_v25 = vpack.c.bf16 %v172_v17, %v171_v16  ;;  %v142_v28 = vld [vmem:[%s6872_s1 + $0x78] sm:$0xff]  ;;  %v173_v29 = vld [vmem:[%s6872_s1 + $0x170] sm:$0xff]  ;;  %v3797_v30 = vpack.c.bf16 %v190_v23, %v189_v22  ;;  %v207_v32 = vld [vmem:[%s6872_s1 + $0x280] sm:$0xff] }
  0x17   :  { %3788 = vmatpush3.bf16.msra.mxu1 %v3787_v63  ;;  %v174_v31 = vld [vmem:[%s6872_s1 + $0x178] sm:$0xff]  ;;  %v208_v33 = vld [vmem:[%s6872_s1 + $0x288] sm:$0xff]  ;;  %v239_v34 = vld [vmem:[%s6872_s1 + $0x380] sm:$0xff]  ;;  %v3767_v36 = vpack.c.bf16 %v142_v28, %v141_v27 }
  0x18   :  { %3790 = vmatprep.subr.bf16.mxu1 %v3789_v4  ;;  %v240_v35 = vld [vmem:[%s6872_s1 + $0x388] sm:$0xff]  ;;  %v3799_v37 = vpack.c.bf16 %v174_v31, %v173_v29  ;;  %v3801_v38 = vpack.c.bf16 %v208_v33, %v207_v32  ;;  %v191_v39 = vld [vmem:[%s6872_s1 + $0x200] sm:$0xff]  ;;  %v209_v44 = vld [vmem:[%s6872_s1 + $0x290] sm:$0xff] }
  0x19   :  { %3760 = vmatpush3.bf16.msra.mxu0 %v3759_v10  ;;  %v192_v40 = vld [vmem:[%s6872_s1 + $0x208] sm:$0xff]  ;;  %v223_v41 = vld [vmem:[%s6872_s1 + $0x300] sm:$0xff]  ;;  %v3833_v42 = vpack.c.bf16 %v240_v35, %v239_v34  ;;  %v210_v45 = vld [vmem:[%s6872_s1 + $0x298] sm:$0xff] }
  0x1a   :  { %3762 = vmatprep.subr.bf16.mxu0 %v3761_v14  ;;  %v224_v43 = vld [vmem:[%s6872_s1 + $0x308] sm:$0xff]  ;;  %v241_v46 = vld [vmem:[%s6872_s1 + $0x390] sm:$0xff]  ;;  %v242_v47 = vld [vmem:[%s6872_s1 + $0x398] sm:$0xff]  ;;  %v3803_v49 = vpack.c.bf16 %v192_v40, %v191_v39  ;;  %v3805_v52 = vpack.c.bf16 %v210_v45, %v209_v44 }
  0x1b   :  { %3792 = vmatpush3.bf16.msra.mxu1 %v3791_v13  ;;  %v27_v48 = vld [vmem:[%s6871_s0] sm:$0xff]  ;;  %v29_v50 = vld [vmem:[%s6871_s0 + $0x10] sm:$0xff]  ;;  %v3835_v51 = vpack.c.bf16 %v224_v43, %v223_v41  ;;  %v194_v54 = vld [vmem:[%s6872_s1 + $0x218] sm:$0xff]  ;;  %v3837_v56 = vpack.c.bf16 %v242_v47, %v241_v46 }
  0x1c   :  { %3794 = vmatprep.subr.bf16.mxu1 %v3793_v18  ;;  %v193_v53 = vld [vmem:[%s6872_s1 + $0x210] sm:$0xff]  ;;  %v226_v57 = vld [vmem:[%s6872_s1 + $0x318] sm:$0xff]  ;;  %v211_v58 = vld [vmem:[%s6872_s1 + $0x2a0] sm:$0xff] }
  0x1d   :  { %3764 = vmatpush3.bf16.msra.mxu0 %v3763_v24  ;;  %v225_v55 = vld [vmem:[%s6872_s1 + $0x310] sm:$0xff]  ;;  %v212_v59 = vld [vmem:[%s6872_s1 + $0x2a8] sm:$0xff]  ;;  %v243_v60 = vld [vmem:[%s6872_s1 + $0x3a0] sm:$0xff]  ;;  %v3807_v63 = vpack.c.bf16 %v194_v54, %v193_v53 }
  0x1e   :  { %3766 = vmatprep.subr.bf16.mxu0 %v3765_v26  ;;  %v244_v61 = vld [vmem:[%s6872_s1 + $0x3a8] sm:$0xff]  ;;  %v53_v62 = vld [vmem:[%s6871_s0 + $0xd0] sm:$0xff]  ;;  %v195_v0 = vld [vmem:[%s6872_s1 + $0x220] sm:$0xff]  ;;  %v3839_v3 = vpack.c.bf16 %v226_v57, %v225_v55  ;;  %v3809_v4 = vpack.c.bf16 %v212_v59, %v211_v58 }
  0x1f   :  { %3796 = vmatpush3.bf16.msra.mxu1 %v3795_v25  ;;  %v196_v1 = vld [vmem:[%s6872_s1 + $0x228] sm:$0xff]  ;;  %v227_v5 = vld [vmem:[%s6872_s1 + $0x320] sm:$0xff]  ;;  %v3841_v8 = vpack.c.bf16 %v244_v61, %v243_v60  ;;  %v213_v9 = vld [vmem:[%s6872_s1 + $0x2b0] sm:$0xff] }
  0x20   :  { %3798 = vmatprep.subr.bf16.mxu1 %v3797_v30  ;;  %v52_v2 = vld [vmem:[%s6871_s0 + $0xc8] sm:$0xff]  ;;  %v55_v7 = vld [vmem:[%s6871_s0 + $0xe0] sm:$0xff]  ;;  %v214_v10 = vld [vmem:[%s6872_s1 + $0x2b8] sm:$0xff]  ;;  %v3811_v15 = vpack.c.bf16 %v196_v1, %v195_v0 }
  0x21   :  { %3768 = vmatpush3.bf16.msra.mxu0 %v3767_v36  ;;  %v228_v6 = vld [vmem:[%s6872_s1 + $0x328] sm:$0xff]  ;;  %v54_v11 = vld [vmem:[%s6871_s0 + $0xd8] sm:$0xff]  ;;  %v245_v12 = vld [vmem:[%s6872_s1 + $0x3b0] sm:$0xff]  ;;  %v3813_v20 = vpack.c.bf16 %v214_v10, %v213_v9 }
  0x22   :  { %3802 = vmatprep.subr.bf16.mxu0 %v3801_v38  ;;  %v246_v13 = vld [vmem:[%s6872_s1 + $0x3b8] sm:$0xff]  ;;  %v197_v16 = vld [vmem:[%s6872_s1 + $0x230] sm:$0xff]  ;;  %v3843_v19 = vpack.c.bf16 %v228_v6, %v227_v5  ;;  %v80_v23 = vld [vmem:[%s6871_s0 + $0x1a8] sm:$0xff] }
  0x23   :  { %3800 = vmatpush3.bf16.msra.mxu1 %v3799_v37  ;;  %v78_v14 = vld [vmem:[%s6871_s0 + $0x198] sm:$0xff]  ;;  %v77_v18 = vld [vmem:[%s6871_s0 + $0x190] sm:$0xff]  ;;  %v3845_v24 = vpack.c.bf16 %v246_v13, %v245_v12  ;;  %v215_v25 = vld [vmem:[%s6872_s1 + $0x2c0] sm:$0xff] }
  0x24   :  { %3834 = vmatprep.subr.bf16.mxu1 %v3833_v42  ;;  %599 = vmatmul.mubr.f32.vlgmr.msra.gmra.mrb[0].mxu0 %v27_v48  ;;  %v198_v17 = vld [vmem:[%s6872_s1 + $0x238] sm:$0xff]  ;;  %v229_v21 = vld [vmem:[%s6872_s1 + $0x330] sm:$0xff]  ;;  %v216_v26 = vld [vmem:[%s6872_s1 + $0x2c8] sm:$0xff] }
  0x25   :  { %3804 = vmatpush3.bf16.msra.mxu0 %v3803_v49  ;;  %603 = vmatprep.mubr.f32.mxu0 %v53_v62  ;;  %v230_v22 = vld [vmem:[%s6872_s1 + $0x338] sm:$0xff]  ;;  %v79_v27 = vld [vmem:[%s6871_s0 + $0x1a0] sm:$0xff]  ;;  %v248_v29 = vld [vmem:[%s6872_s1 + $0x3c8] sm:$0xff]  ;;  %v3815_v31 = vpack.c.bf16 %v198_v17, %v197_v16  ;;  %v3817_v36 = vpack.c.bf16 %v216_v26, %v215_v25 }
  0x26   :  { %684 = vmatmul.mubr.f32.vlgmr.msra.gmra.mrb[0].mxu1 %v29_v50  ;;  %3806 = vmatprep.subr.bf16.mxu0 %v3805_v52  ;;  %v247_v28 = vld [vmem:[%s6872_s1 + $0x3c0] sm:$0xff]  ;;  %v200_v33 = vld [vmem:[%s6872_s1 + $0x248] sm:$0xff]  ;;  %v102_v34 = vld [vmem:[%s6871_s0 + $0x258] sm:$0xff]  ;;  %v3847_v35 = vpack.c.bf16 %v230_v22, %v229_v21 }
  0x27   :  { %3836 = vmatpush3.bf16.msra.mxu1 %v3835_v51  ;;  %688 = vmatprep.mubr.f32.mxu1 %v55_v7  ;;  %v103_v30 = vld [vmem:[%s6871_s0 + $0x260] sm:$0xff]  ;;  %v232_v38 = vld [vmem:[%s6872_s1 + $0x348] sm:$0xff]  ;;  %v105_v39 = vld [vmem:[%s6871_s0 + $0x270] sm:$0xff]  ;;  %v3849_v40 = vpack.c.bf16 %v248_v29, %v247_v28 }
  0x28   :  { %3838 = vmatprep.subr.bf16.mxu1 %v3837_v56  ;;  %604 = vmatmul.mubr.f32.gmra.mrb[2].mxu0 %v52_v2  ;;  %v199_v32 = vld [vmem:[%s6872_s1 + $0x240] sm:$0xff]  ;;  %v217_v41 = vld [vmem:[%s6872_s1 + $0x2d0] sm:$0xff]  ;;  %v218_v42 = vld [vmem:[%s6872_s1 + $0x2d8] sm:$0xff] }
  0x29   :  { %3808 = vmatpush3.bf16.msra.mxu0 %v3807_v63  ;;  %608 = vmatprep.mubr.f32.mxu0 %v78_v14  ;;  %v231_v37 = vld [vmem:[%s6872_s1 + $0x340] sm:$0xff]  ;;  %v104_v43 = vld [vmem:[%s6871_s0 + $0x268] sm:$0xff]  ;;  %v249_v44 = vld [vmem:[%s6872_s1 + $0x3d0] sm:$0xff]  ;;  %v3819_v47 = vpack.c.bf16 %v200_v33, %v199_v32  ;;  %v3821_v50 = vpack.c.bf16 %v218_v42, %v217_v41 }
  0x2a   :  { %689 = vmatmul.mubr.f32.gmra.mrb[2].mxu1 %v54_v11  ;;  %3810 = vmatprep.subr.bf16.mxu0 %v3809_v4  ;;  %v250_v45 = vld [vmem:[%s6872_s1 + $0x3d8] sm:$0xff]  ;;  %v32_v46 = vld [vmem:[%s6871_s0 + $0x28] sm:$0xff]  ;;  %v201_v48 = vld [vmem:[%s6872_s1 + $0x250] sm:$0xff]  ;;  %v3851_v49 = vpack.c.bf16 %v232_v38, %v231_v37 }
  0x2b   :  { %3840 = vmatpush3.bf16.msra.mxu1 %v3839_v3  ;;  %693 = vmatprep.mubr.f32.mxu1 %v80_v23  ;;  %v202_v51 = vld [vmem:[%s6872_s1 + $0x258] sm:$0xff]  ;;  %v233_v52 = vld [vmem:[%s6872_s1 + $0x350] sm:$0xff]  ;;  %v3853_v54 = vpack.c.bf16 %v250_v45, %v249_v44  ;;  %v219_v56 = vld [vmem:[%s6872_s1 + $0x2e0] sm:$0xff] }
  0x2c   :  { %3842 = vmatprep.subr.bf16.mxu1 %v3841_v8  ;;  %609 = vmatmul.mubr.f32.gmra.mrb[4].mxu0 %v77_v18  ;;  %v34_v53 = vld [vmem:[%s6871_s0 + $0x38] sm:$0xff]  ;;  %v220_v57 = vld [vmem:[%s6872_s1 + $0x2e8] sm:$0xff]  ;;  %v251_v58 = vld [vmem:[%s6872_s1 + $0x3e0] sm:$0xff]  ;;  %v3823_v60 = vpack.c.bf16 %v202_v51, %v201_v48 }
  0x2d   :  { %3812 = vmatpush3.bf16.msra.mxu0 %v3811_v15  ;;  %613 = vmatprep.mubr.f32.mxu0 %v103_v30  ;;  %v234_v55 = vld [vmem:[%s6872_s1 + $0x358] sm:$0xff]  ;;  %v252_v59 = vld [vmem:[%s6872_s1 + $0x3e8] sm:$0xff]  ;;  %v3825_v62 = vpack.c.bf16 %v220_v57, %v219_v56  ;;  %v203_v63 = vld [vmem:[%s6872_s1 + $0x260] sm:$0xff] }
  0x2e   :  { %694 = vmatmul.mubr.f32.gmra.mrb[4].mxu1 %v79_v27  ;;  %3814 = vmatprep.subr.bf16.mxu0 %v3813_v20  ;;  %v3855_v61 = vpack.c.bf16 %v234_v55, %v233_v52  ;;  %v204_v0 = vld [vmem:[%s6872_s1 + $0x268] sm:$0xff]  ;;  %v235_v1 = vld [vmem:[%s6872_s1 + $0x360] sm:$0xff]  ;;  %v3857_v2 = vpack.c.bf16 %v252_v59, %v251_v58  ;;  %v221_v4 = vld [vmem:[%s6872_s1 + $0x2f0] sm:$0xff] }
  0x2f   :  { %3844 = vmatpush3.bf16.msra.mxu1 %v3843_v19  ;;  %698 = vmatprep.mubr.f32.mxu1 %v105_v39  ;;  %v236_v3 = vld [vmem:[%s6872_s1 + $0x368] sm:$0xff]  ;;  %v222_v5 = vld [vmem:[%s6872_s1 + $0x2f8] sm:$0xff]  ;;  %v253_v6 = vld [vmem:[%s6872_s1 + $0x3f0] sm:$0xff]  ;;  %v3827_v8 = vpack.c.bf16 %v204_v0, %v203_v63 }
  0x30   :  { %3846 = vmatprep.subr.bf16.mxu1 %v3845_v24  ;;  %614 = vmatmul.mubr.f32.gmra.mrb[6].mxu0 %v102_v34  ;;  %v254_v7 = vld [vmem:[%s6872_s1 + $0x3f8] sm:$0xff]  ;;  %v3859_v9 = vpack.c.bf16 %v236_v3, %v235_v1  ;;  %v3829_v10 = vpack.c.bf16 %v222_v5, %v221_v4  ;;  %v205_v11 = vld [vmem:[%s6872_s1 + $0x270] sm:$0xff]  ;;  %v271_v16 = vld [vmem:[%s6872_s1 + $0x480] sm:$0xff] }
  0x31   :  { %3816 = vmatpush3.bf16.msra.mxu0 %v3815_v31  ;;  %768 = vmatprep.mubr.f32.mxu0 %v32_v46  ;;  %v206_v12 = vld [vmem:[%s6872_s1 + $0x278] sm:$0xff]  ;;  %v237_v13 = vld [vmem:[%s6872_s1 + $0x370] sm:$0xff]  ;;  %v3861_v14 = vpack.c.bf16 %v254_v7, %v253_v6  ;;  %v272_v17 = vld [vmem:[%s6872_s1 + $0x488] sm:$0xff] }
  0x32   :  { %699 = vmatmul.mubr.f32.gmra.mrb[6].mxu1 %v104_v43  ;;  %3818 = vmatprep.subr.bf16.mxu0 %v3817_v36  ;;  %v238_v15 = vld [vmem:[%s6872_s1 + $0x378] sm:$0xff]  ;;  %v303_v18 = vld [vmem:[%s6872_s1 + $0x580] sm:$0xff]  ;;  %v304_v19 = vld [vmem:[%s6872_s1 + $0x588] sm:$0xff]  ;;  %v3831_v20 = vpack.c.bf16 %v206_v12, %v205_v11  ;;  %v3865_v22 = vpack.c.bf16 %v272_v17, %v271_v16 }
  0x33   :  { %3848 = vmatpush3.bf16.msra.mxu1 %v3847_v35  ;;  %853 = vmatprep.mubr.f32.mxu1 %v34_v53  ;;  %v3863_v21 = vpack.c.bf16 %v238_v15, %v237_v13  ;;  %v255_v23 = vld [vmem:[%s6872_s1 + $0x400] sm:$0xff]  ;;  %v256_v24 = vld [vmem:[%s6872_s1 + $0x408] sm:$0xff]  ;;  %v3897_v25 = vpack.c.bf16 %v304_v19, %v303_v18  ;;  %v273_v29 = vld [vmem:[%s6872_s1 + $0x490] sm:$0xff] }
  0x34   :  { %3850 = vmatprep.subr.bf16.mxu1 %v3849_v40  ;;  %v287_v26 = vld [vmem:[%s6872_s1 + $0x500] sm:$0xff]  ;;  %v288_v27 = vld [vmem:[%s6872_s1 + $0x508] sm:$0xff]  ;;  %v274_v30 = vld [vmem:[%s6872_s1 + $0x498] sm:$0xff]  ;;  %v3867_v31 = vpack.c.bf16 %v256_v24, %v255_v23 }
  0x35   :  { %3820 = vmatpush3.bf16.msra.mxu0 %v3819_v47  ;;  %v31_v28 = vld [vmem:[%s6871_s0 + $0x20] sm:$0xff]  ;;  %v33_v32 = vld [vmem:[%s6871_s0 + $0x30] sm:$0xff]  ;;  %v306_v34 = vld [vmem:[%s6872_s1 + $0x598] sm:$0xff]  ;;  %v3899_v36 = vpack.c.bf16 %v288_v27, %v287_v26  ;;  %v3869_v40 = vpack.c.bf16 %v274_v30, %v273_v29 }
  0x36   :  { %3822 = vmatprep.subr.bf16.mxu0 %v3821_v50  ;;  %v305_v33 = vld [vmem:[%s6872_s1 + $0x590] sm:$0xff]  ;;  %v258_v38 = vld [vmem:[%s6872_s1 + $0x418] sm:$0xff]  ;;  %v56_v39 = vld [vmem:[%s6871_s0 + $0xe8] sm:$0xff] }
  0x37   :  { %3852 = vmatpush3.bf16.msra.mxu1 %v3851_v49  ;;  %v57_v35 = vld [vmem:[%s6871_s0 + $0xf0] sm:$0xff]  ;;  %v290_v42 = vld [vmem:[%s6872_s1 + $0x518] sm:$0xff]  ;;  %v59_v43 = vld [vmem:[%s6871_s0 + $0x100] sm:$0xff]  ;;  %v3901_v44 = vpack.c.bf16 %v306_v34, %v305_v33 }
  0x38   :  { %3854 = vmatprep.subr.bf16.mxu1 %v3853_v54  ;;  %v257_v37 = vld [vmem:[%s6872_s1 + $0x410] sm:$0xff]  ;;  %v275_v45 = vld [vmem:[%s6872_s1 + $0x4a0] sm:$0xff]  ;;  %v276_v46 = vld [vmem:[%s6872_s1 + $0x4a8] sm:$0xff] }
  0x39   :  { %3824 = vmatpush3.bf16.msra.mxu0 %v3823_v60  ;;  %v289_v41 = vld [vmem:[%s6872_s1 + $0x510] sm:$0xff]  ;;  %v3871_v47 = vpack.c.bf16 %v258_v38, %v257_v37  ;;  %v58_v48 = vld [vmem:[%s6871_s0 + $0xf8] sm:$0xff]  ;;  %v307_v49 = vld [vmem:[%s6872_s1 + $0x5a0] sm:$0xff]  ;;  %v3873_v56 = vpack.c.bf16 %v276_v46, %v275_v45 }
  0x3a   :  { %3826 = vmatprep.subr.bf16.mxu0 %v3825_v62  ;;  %v308_v50 = vld [vmem:[%s6872_s1 + $0x5a8] sm:$0xff]  ;;  %v82_v51 = vld [vmem:[%s6871_s0 + $0x1b8] sm:$0xff]  ;;  %v3903_v52 = vpack.c.bf16 %v290_v42, %v289_v41  ;;  %v259_v53 = vld [vmem:[%s6872_s1 + $0x420] sm:$0xff] }
  0x3b   :  { %3856 = vmatpush3.bf16.msra.mxu1 %v3855_v61  ;;  %v260_v54 = vld [vmem:[%s6872_s1 + $0x428] sm:$0xff]  ;;  %v81_v55 = vld [vmem:[%s6871_s0 + $0x1b0] sm:$0xff]  ;;  %v291_v58 = vld [vmem:[%s6872_s1 + $0x520] sm:$0xff]  ;;  %v3905_v61 = vpack.c.bf16 %v308_v50, %v307_v49 }
  0x3c   :  { %3858 = vmatprep.subr.bf16.mxu1 %v3857_v2  ;;  %v84_v57 = vld [vmem:[%s6871_s0 + $0x1c8] sm:$0xff]  ;;  %v83_v60 = vld [vmem:[%s6871_s0 + $0x1c0] sm:$0xff]  ;;  %v277_v62 = vld [vmem:[%s6872_s1 + $0x4b0] sm:$0xff]  ;;  %v3875_v0 = vpack.c.bf16 %v260_v54, %v259_v53 }
  0x3d   :  { %3828 = vmatpush3.bf16.msra.mxu0 %v3827_v8  ;;  %v292_v59 = vld [vmem:[%s6872_s1 + $0x528] sm:$0xff]  ;;  %v278_v63 = vld [vmem:[%s6872_s1 + $0x4b8] sm:$0xff]  ;;  %v107_v1 = vld [vmem:[%s6871_s0 + $0x280] sm:$0xff] }
  0x3e   :  { %3830 = vmatprep.subr.bf16.mxu0 %v3829_v10  ;;  %v309_v2 = vld [vmem:[%s6872_s1 + $0x5b0] sm:$0xff]  ;;  %v310_v3 = vld [vmem:[%s6872_s1 + $0x5b8] sm:$0xff]  ;;  %v3907_v4 = vpack.c.bf16 %v292_v59, %v291_v58  ;;  %v3877_v8 = vpack.c.bf16 %v278_v63, %v277_v62  ;;  %v279_v10 = vld [vmem:[%s6872_s1 + $0x4c0] sm:$0xff] }
  0x3f   :  { %3860 = vmatpush3.bf16.msra.mxu1 %v3859_v9  ;;  %v261_v5 = vld [vmem:[%s6872_s1 + $0x430] sm:$0xff]  ;;  %v262_v6 = vld [vmem:[%s6872_s1 + $0x438] sm:$0xff]  ;;  %v280_v11 = vld [vmem:[%s6872_s1 + $0x4c8] sm:$0xff]  ;;  %v3909_v13 = vpack.c.bf16 %v310_v3, %v309_v2 }
  0x40   :  { %3862 = vmatprep.subr.bf16.mxu1 %v3861_v14  ;;  %v293_v7 = vld [vmem:[%s6872_s1 + $0x530] sm:$0xff]  ;;  %v294_v9 = vld [vmem:[%s6872_s1 + $0x538] sm:$0xff]  ;;  %v311_v14 = vld [vmem:[%s6872_s1 + $0x5c0] sm:$0xff]  ;;  %v3879_v17 = vpack.c.bf16 %v262_v6, %v261_v5 }
  0x41   :  { %3832 = vmatpush3.bf16.msra.mxu0 %v3831_v20  ;;  %v109_v12 = vld [vmem:[%s6871_s0 + $0x290] sm:$0xff]  ;;  %v312_v15 = vld [vmem:[%s6872_s1 + $0x5c8] sm:$0xff]  ;;  %v106_v16 = vld [vmem:[%s6871_s0 + $0x278] sm:$0xff]  ;;  %v3911_v19 = vpack.c.bf16 %v294_v9, %v293_v7  ;;  %v3881_v20 = vpack.c.bf16 %v280_v11, %v279_v10 }
  0x42   :  { %3866 = vmatprep.subr.bf16.mxu0 %v3865_v22  ;;  %v108_v18 = vld [vmem:[%s6871_s0 + $0x288] sm:$0xff]  ;;  %v295_v23 = vld [vmem:[%s6872_s1 + $0x540] sm:$0xff]  ;;  %v3913_v24 = vpack.c.bf16 %v312_v15, %v311_v14  ;;  %v281_v26 = vld [vmem:[%s6872_s1 + $0x4d0] sm:$0xff] }
  0x43   :  { %3864 = vmatpush3.bf16.msra.mxu1 %v3863_v21  ;;  %v263_v21 = vld [vmem:[%s6872_s1 + $0x440] sm:$0xff]  ;;  %v264_v22 = vld [vmem:[%s6872_s1 + $0x448] sm:$0xff]  ;;  %v282_v27 = vld [vmem:[%s6872_s1 + $0x4d8] sm:$0xff] }
  0x44   :  { %3898 = vmatprep.subr.bf16.mxu1 %v3897_v25  ;;  %769 = vmatmul.mubr.f32.vlgmr.msra.gmra.mrb[8].mxu0 %v31_v28  ;;  %v296_v25 = vld [vmem:[%s6872_s1 + $0x548] sm:$0xff]  ;;  %v313_v28 = vld [vmem:[%s6872_s1 + $0x5d0] sm:$0xff]  ;;  %v314_v29 = vld [vmem:[%s6872_s1 + $0x5d8] sm:$0xff]  ;;  %v3885_v34 = vpack.c.bf16 %v282_v27, %v281_v26 }
  0x45   :  { %3868 = vmatpush3.bf16.msra.mxu0 %v3867_v31  ;;  %773 = vmatprep.mubr.f32.mxu0 %v57_v35  ;;  %v36_v30 = vld [vmem:[%s6871_s0 + $0x48] sm:$0xff]  ;;  %v3883_v31 = vpack.c.bf16 %v264_v22, %v263_v21  ;;  %v3915_v33 = vpack.c.bf16 %v296_v25, %v295_v23  ;;  %v265_v35 = vld [vmem:[%s6872_s1 + $0x450] sm:$0xff]  ;;  %v3917_v38 = vpack.c.bf16 %v314_v29, %v313_v28  ;;  %v315_v42 = vld [vmem:[%s6872_s1 + $0x5e0] sm:$0xff] }
  0x46   :  { %854 = vmatmul.mubr.f32.vlgmr.msra.gmra.mrb[8].mxu1 %v33_v32  ;;  %3870 = vmatprep.subr.bf16.mxu0 %v3869_v40  ;;  %v38_v32 = vld [vmem:[%s6871_s0 + $0x58] sm:$0xff]  ;;  %v297_v37 = vld [vmem:[%s6872_s1 + $0x550] sm:$0xff]  ;;  %v283_v40 = vld [vmem:[%s6872_s1 + $0x4e0] sm:$0xff] }
  0x47   :  { %3900 = vmatpush3.bf16.msra.mxu1 %v3899_v36  ;;  %858 = vmatprep.mubr.f32.mxu1 %v59_v43  ;;  %v266_v36 = vld [vmem:[%s6872_s1 + $0x458] sm:$0xff]  ;;  %v284_v41 = vld [vmem:[%s6872_s1 + $0x4e8] sm:$0xff]  ;;  %v299_v49 = vld [vmem:[%s6872_s1 + $0x560] sm:$0xff] }
  0x48   :  { %774 = vmatmul.mubr.f32.gmra.mrb[10].mxu0 %v56_v39  ;;  %3902 = vmatprep.subr.bf16.mxu1 %v3901_v44  ;;  %v298_v39 = vld [vmem:[%s6872_s1 + $0x558] sm:$0xff]  ;;  %v316_v43 = vld [vmem:[%s6872_s1 + $0x5e8] sm:$0xff]  ;;  %v3887_v44 = vpack.c.bf16 %v266_v36, %v265_v35  ;;  %v3889_v46 = vpack.c.bf16 %v284_v41, %v283_v40  ;;  %v317_v54 = vld [vmem:[%s6872_s1 + $0x5f0] sm:$0xff] }
  0x49   :  { %3872 = vmatpush3.bf16.msra.mxu0 %v3871_v47  ;;  %778 = vmatprep.mubr.f32.mxu0 %v82_v51  ;;  %v3919_v45 = vpack.c.bf16 %v298_v39, %v297_v37  ;;  %v267_v47 = vld [vmem:[%s6872_s1 + $0x460] sm:$0xff]  ;;  %v3921_v50 = vpack.c.bf16 %v316_v43, %v315_v42  ;;  %v300_v51 = vld [vmem:[%s6872_s1 + $0x568] sm:$0xff]  ;;  %v286_v53 = vld [vmem:[%s6872_s1 + $0x4f8] sm:$0xff] }
  0x4a   :  { %859 = vmatmul.mubr.f32.gmra.mrb[10].mxu1 %v58_v48  ;;  %3874 = vmatprep.subr.bf16.mxu0 %v3873_v56  ;;  %v268_v48 = vld [vmem:[%s6872_s1 + $0x468] sm:$0xff]  ;;  %v269_v59 = vld [vmem:[%s6872_s1 + $0x470] sm:$0xff]  ;;  %v302_v63 = vld [vmem:[%s6872_s1 + $0x578] sm:$0xff] }
  0x4b   :  { %3904 = vmatpush3.bf16.msra.mxu1 %v3903_v52  ;;  %863 = vmatprep.mubr.f32.mxu1 %v84_v57  ;;  %v285_v52 = vld [vmem:[%s6872_s1 + $0x4f0] sm:$0xff]  ;;  %v3891_v56 = vpack.c.bf16 %v268_v48, %v267_v47  ;;  %v3923_v57 = vpack.c.bf16 %v300_v51, %v299_v49  ;;  %v367_v2 = vld [vmem:[%s6872_s1 + $0x780] sm:$0xff]  ;;  %v368_v3 = vld [vmem:[%s6872_s1 + $0x788] sm:$0xff] }
  0x4c   :  { %779 = vmatmul.mubr.f32.gmra.mrb[12].mxu0 %v81_v55  ;;  %3906 = vmatprep.subr.bf16.mxu1 %v3905_v61  ;;  %v318_v55 = vld [vmem:[%s6872_s1 + $0x5f8] sm:$0xff]  ;;  %v3893_v58 = vpack.c.bf16 %v286_v53, %v285_v52  ;;  %v301_v61 = vld [vmem:[%s6872_s1 + $0x570] sm:$0xff]  ;;  %v319_v7 = vld [vmem:[%s6872_s1 + $0x600] sm:$0xff]  ;;  %v3961_v9 = vpack.c.bf16 %v368_v3, %v367_v2 }
  0x4d   :  { %3876 = vmatpush3.bf16.msra.mxu0 %v3875_v0  ;;  %783 = vmatprep.mubr.f32.mxu0 %v107_v1  ;;  %v3925_v62 = vpack.c.bf16 %v318_v55, %v317_v54  ;;  %v335_v0 = vld [vmem:[%s6872_s1 + $0x680] sm:$0xff]  ;;  %v336_v1 = vld [vmem:[%s6872_s1 + $0x688] sm:$0xff]  ;;  %v3927_v5 = vpack.c.bf16 %v302_v63, %v301_v61  ;;  %v338_v14 = vld [vmem:[%s6872_s1 + $0x698] sm:$0xff] }
  0x4e   :  { %864 = vmatmul.mubr.f32.gmra.mrb[12].mxu1 %v83_v60  ;;  %3878 = vmatprep.subr.bf16.mxu0 %v3877_v8  ;;  %v270_v60 = vld [vmem:[%s6872_s1 + $0x478] sm:$0xff]  ;;  %v3929_v6 = vpack.c.bf16 %v336_v1, %v335_v0  ;;  %v320_v8 = vld [vmem:[%s6872_s1 + $0x608] sm:$0xff]  ;;  %v351_v10 = vld [vmem:[%s6872_s1 + $0x700] sm:$0xff] }
  0x4f   :  { %3908 = vmatpush3.bf16.msra.mxu1 %v3907_v4  ;;  %868 = vmatprep.mubr.f32.mxu1 %v109_v12  ;;  %v3895_v4 = vpack.c.bf16 %v270_v60, %v269_v59  ;;  %v352_v11 = vld [vmem:[%s6872_s1 + $0x708] sm:$0xff]  ;;  %v35_v12 = vld [vmem:[%s6871_s0 + $0x40] sm:$0xff]  ;;  %v3931_v15 = vpack.c.bf16 %v320_v8, %v319_v7  ;;  %v321_v21 = vld [vmem:[%s6872_s1 + $0x610] sm:$0xff] }
  0x50   :  { %784 = vmatmul.mubr.f32.gmra.mrb[14].mxu0 %v106_v16  ;;  %3910 = vmatprep.subr.bf16.mxu1 %v3909_v13  ;;  %v337_v13 = vld [vmem:[%s6872_s1 + $0x690] sm:$0xff]  ;;  %v322_v22 = vld [vmem:[%s6872_s1 + $0x618] sm:$0xff]  ;;  %v60_v23 = vld [vmem:[%s6871_s0 + $0x108] sm:$0xff] }
  0x51   :  { %3880 = vmatpush3.bf16.msra.mxu0 %v3879_v17  ;;  %938 = vmatprep.mubr.f32.mxu0 %v36_v30  ;;  %v37_v16 = vld [vmem:[%s6871_s0 + $0x50] sm:$0xff]  ;;  %v354_v26 = vld [vmem:[%s6872_s1 + $0x718] sm:$0xff]  ;;  %v63_v27 = vld [vmem:[%s6871_s0 + $0x120] sm:$0xff] }
  0x52   :  { %869 = vmatmul.mubr.f32.gmra.mrb[14].mxu1 %v108_v18  ;;  %3882 = vmatprep.subr.bf16.mxu0 %v3881_v20  ;;  %v369_v17 = vld [vmem:[%s6872_s1 + $0x790] sm:$0xff]  ;;  %v370_v18 = vld [vmem:[%s6872_s1 + $0x798] sm:$0xff]  ;;  %v3963_v20 = vpack.c.bf16 %v352_v11, %v351_v10  ;;  %v339_v29 = vld [vmem:[%s6872_s1 + $0x6a0] sm:$0xff] }
  0x53   :  { %3912 = vmatpush3.bf16.msra.mxu1 %v3911_v19  ;;  %1023 = vmatprep.mubr.f32.mxu1 %v38_v32  ;;  %v61_v19 = vld [vmem:[%s6871_s0 + $0x110] sm:$0xff]  ;;  %v3965_v28 = vpack.c.bf16 %v370_v18, %v369_v17  ;;  %v340_v30 = vld [vmem:[%s6872_s1 + $0x6a8] sm:$0xff]  ;;  %v62_v32 = vld [vmem:[%s6871_s0 + $0x118] sm:$0xff] }
  0x54   :  { %3914 = vmatprep.subr.bf16.mxu1 %v3913_v24  ;;  %v3933_v24 = vpack.c.bf16 %v338_v14, %v337_v13  ;;  %v353_v25 = vld [vmem:[%s6872_s1 + $0x710] sm:$0xff]  ;;  %v86_v35 = vld [vmem:[%s6871_s0 + $0x1d8] sm:$0xff]  ;;  %v323_v37 = vld [vmem:[%s6872_s1 + $0x620] sm:$0xff]  ;;  %v3937_v40 = vpack.c.bf16 %v340_v30, %v339_v29 }
  0x55   :  { %3884 = vmatpush3.bf16.msra.mxu0 %v3883_v31  ;;  %v3935_v31 = vpack.c.bf16 %v322_v22, %v321_v21  ;;  %v3967_v36 = vpack.c.bf16 %v354_v26, %v353_v25  ;;  %v85_v39 = vld [vmem:[%s6871_s0 + $0x1d0] sm:$0xff]  ;;  %v88_v41 = vld [vmem:[%s6871_s0 + $0x1e8] sm:$0xff]  ;;  %v355_v42 = vld [vmem:[%s6872_s1 + $0x720] sm:$0xff] }
  0x56   :  { %3886 = vmatprep.subr.bf16.mxu0 %v3885_v34  ;;  %v372_v34 = vld [vmem:[%s6872_s1 + $0x7a8] sm:$0xff]  ;;  %v342_v47 = vld [vmem:[%s6872_s1 + $0x6b8] sm:$0xff]  ;;  %v111_v49 = vld [vmem:[%s6871_s0 + $0x2a0] sm:$0xff] }
  0x57   :  { %3916 = vmatpush3.bf16.msra.mxu1 %v3915_v33  ;;  %v371_v33 = vld [vmem:[%s6872_s1 + $0x7a0] sm:$0xff]  ;;  %v356_v43 = vld [vmem:[%s6872_s1 + $0x728] sm:$0xff]  ;;  %v374_v51 = vld [vmem:[%s6872_s1 + $0x7b8] sm:$0xff] }
  0x58   :  { %3918 = vmatprep.subr.bf16.mxu1 %v3917_v38  ;;  %v324_v38 = vld [vmem:[%s6872_s1 + $0x628] sm:$0xff]  ;;  %v3971_v52 = vpack.c.bf16 %v356_v43, %v355_v42  ;;  %v325_v53 = vld [vmem:[%s6872_s1 + $0x630] sm:$0xff]  ;;  %v326_v54 = vld [vmem:[%s6872_s1 + $0x638] sm:$0xff] }
  0x59   :  { %3888 = vmatpush3.bf16.msra.mxu0 %v3887_v44  ;;  %v87_v44 = vld [vmem:[%s6871_s0 + $0x1e0] sm:$0xff]  ;;  %v3939_v48 = vpack.c.bf16 %v324_v38, %v323_v37  ;;  %v357_v55 = vld [vmem:[%s6872_s1 + $0x730] sm:$0xff]  ;;  %v344_v59 = vld [vmem:[%s6872_s1 + $0x6c8] sm:$0xff]  ;;  %v3943_v1 = vpack.c.bf16 %v326_v54, %v325_v53 }
  0x5a   :  { %3890 = vmatprep.subr.bf16.mxu0 %v3889_v46  ;;  %v341_v46 = vld [vmem:[%s6872_s1 + $0x6b0] sm:$0xff]  ;;  %v376_v63 = vld [vmem:[%s6872_s1 + $0x7c8] sm:$0xff]  ;;  %v110_v0 = vld [vmem:[%s6871_s0 + $0x298] sm:$0xff] }
  0x5b   :  { %3920 = vmatpush3.bf16.msra.mxu1 %v3919_v45  ;;  %v3969_v45 = vpack.c.bf16 %v372_v34, %v371_v33  ;;  %v113_v60 = vld [vmem:[%s6871_s0 + $0x2b0] sm:$0xff]  ;;  %v112_v2 = vld [vmem:[%s6871_s0 + $0x2a8] sm:$0xff]  ;;  %v359_v7 = vld [vmem:[%s6872_s1 + $0x740] sm:$0xff] }
  0x5c   :  { %3922 = vmatprep.subr.bf16.mxu1 %v3921_v50  ;;  %v373_v50 = vld [vmem:[%s6872_s1 + $0x7b0] sm:$0xff]  ;;  %v346_v11 = vld [vmem:[%s6872_s1 + $0x6d8] sm:$0xff]  ;;  %v40_v14 = vld [vmem:[%s6871_s0 + $0x68] sm:$0xff] }
  0x5d   :  { %3892 = vmatpush3.bf16.msra.mxu0 %v3891_v56  ;;  %v3941_v56 = vpack.c.bf16 %v342_v47, %v341_v46  ;;  %v3973_v61 = vpack.c.bf16 %v374_v51, %v373_v50  ;;  %v345_v10 = vld [vmem:[%s6872_s1 + $0x6d0] sm:$0xff]  ;;  %v378_v13 = vld [vmem:[%s6872_s1 + $0x7d8] sm:$0xff]  ;;  %v348_v25 = vld [vmem:[%s6872_s1 + $0x6e8] sm:$0xff] }
  0x5e   :  { %3894 = vmatprep.subr.bf16.mxu0 %v3893_v58  ;;  %v343_v58 = vld [vmem:[%s6872_s1 + $0x6c0] sm:$0xff]  ;;  %v3949_v18 = vpack.c.bf16 %v346_v11, %v345_v10  ;;  %v361_v21 = vld [vmem:[%s6872_s1 + $0x750] sm:$0xff]  ;;  %v350_v37 = vld [vmem:[%s6872_s1 + $0x6f8] sm:$0xff] }
  0x5f   :  { %3924 = vmatpush3.bf16.msra.mxu1 %v3923_v57  ;;  %v358_v57 = vld [vmem:[%s6872_s1 + $0x738] sm:$0xff]  ;;  %v379_v26 = vld [vmem:[%s6872_s1 + $0x7e0] sm:$0xff]  ;;  %v381_v38 = vld [vmem:[%s6872_s1 + $0x7f0] sm:$0xff] }
  0x60   :  { %3926 = vmatprep.subr.bf16.mxu1 %v3925_v62  ;;  %v375_v62 = vld [vmem:[%s6872_s1 + $0x7c0] sm:$0xff]  ;;  %v3975_v3 = vpack.c.bf16 %v358_v57, %v357_v55  ;;  %v333_v43 = vld [vmem:[%s6872_s1 + $0x670] sm:$0xff]  ;;  %v366_v47 = vld [vmem:[%s6872_s1 + $0x778] sm:$0xff] }
  0x61   :  { %3896 = vmatpush3.bf16.msra.mxu0 %v3895_v4  ;;  %v3945_v4 = vpack.c.bf16 %v344_v59, %v343_v58  ;;  %v3977_v8 = vpack.c.bf16 %v376_v63, %v375_v62  ;;  %v363_v33 = vld [vmem:[%s6872_s1 + $0x760] sm:$0xff]  ;;  %v432_v51 = vld [vmem:[%s6872_s1 + $0x988] sm:$0xff]  ;;  %v402_v62 = vld [vmem:[%s6872_s1 + $0x898] sm:$0xff] }
  0x62   :  { %3930 = vmatprep.subr.bf16.mxu0 %v3929_v6  ;;  %v328_v6 = vld [vmem:[%s6872_s1 + $0x648] sm:$0xff]  ;;  %v431_v50 = vld [vmem:[%s6872_s1 + $0x980] sm:$0xff]  ;;  %v418_v10 = vld [vmem:[%s6872_s1 + $0x918] sm:$0xff] }
  0x63   :  { %3928 = vmatpush3.bf16.msra.mxu1 %v3927_v5  ;;  %v327_v5 = vld [vmem:[%s6872_s1 + $0x640] sm:$0xff]  ;;  %v4025_v57 = vpack.c.bf16 %v432_v51, %v431_v50  ;;  %v416_v59 = vld [vmem:[%s6872_s1 + $0x908] sm:$0xff] }
  0x64   :  { %3962 = vmatprep.subr.bf16.mxu1 %v3961_v9  ;;  %939 = vmatmul.mubr.f32.vlgmr.msra.gmra.mrb[16].mxu0 %v35_v12  ;;  %v360_v9 = vld [vmem:[%s6872_s1 + $0x748] sm:$0xff]  ;;  %v377_v12 = vld [vmem:[%s6872_s1 + $0x7d0] sm:$0xff]  ;;  %v383_v55 = vld [vmem:[%s6872_s1 + $0x800] sm:$0xff] }
  0x65   :  { %3932 = vmatpush3.bf16.msra.mxu0 %v3931_v15  ;;  %943 = vmatprep.mubr.f32.mxu0 %v61_v19  ;;  %v3947_v15 = vpack.c.bf16 %v328_v6, %v327_v5  ;;  %v3979_v17 = vpack.c.bf16 %v360_v9, %v359_v7  ;;  %v329_v19 = vld [vmem:[%s6872_s1 + $0x650] sm:$0xff]  ;;  %v3981_v22 = vpack.c.bf16 %v378_v13, %v377_v12  ;;  %v415_v58 = vld [vmem:[%s6872_s1 + $0x900] sm:$0xff]  ;;  %v386_v6 = vld [vmem:[%s6872_s1 + $0x818] sm:$0xff] }
  0x66   :  { %1024 = vmatmul.mubr.f32.vlgmr.msra.gmra.mrb[16].mxu1 %v37_v16  ;;  %3934 = vmatprep.subr.bf16.mxu0 %v3933_v24  ;;  %v42_v16 = vld [vmem:[%s6871_s0 + $0x78] sm:$0xff]  ;;  %v347_v24 = vld [vmem:[%s6872_s1 + $0x6e0] sm:$0xff]  ;;  %v385_v5 = vld [vmem:[%s6872_s1 + $0x810] sm:$0xff] }
  0x67   :  { %3964 = vmatpush3.bf16.msra.mxu1 %v3963_v20  ;;  %1028 = vmatprep.mubr.f32.mxu1 %v63_v27  ;;  %v330_v20 = vld [vmem:[%s6872_s1 + $0x658] sm:$0xff]  ;;  %v380_v27 = vld [vmem:[%s6872_s1 + $0x7e8] sm:$0xff]  ;;  %v3953_v30 = vpack.c.bf16 %v348_v25, %v347_v24  ;;  %v417_v9 = vld [vmem:[%s6872_s1 + $0x910] sm:$0xff] }
  0x68   :  { %944 = vmatmul.mubr.f32.gmra.mrb[18].mxu0 %v60_v23  ;;  %3966 = vmatprep.subr.bf16.mxu1 %v3965_v28  ;;  %v362_v23 = vld [vmem:[%s6872_s1 + $0x758] sm:$0xff]  ;;  %v3951_v28 = vpack.c.bf16 %v330_v20, %v329_v19  ;;  %v3985_v34 = vpack.c.bf16 %v380_v27, %v379_v26  ;;  %v64_v7 = vld [vmem:[%s6871_s0 + $0x128] sm:$0xff]  ;;  %v67_v11 = vld [vmem:[%s6871_s0 + $0x140] sm:$0xff]  ;;  %v4031_v20 = vpack.c.bf16 %v418_v10, %v417_v9 }
  0x69   :  { %3936 = vmatpush3.bf16.msra.mxu0 %v3935_v31  ;;  %948 = vmatprep.mubr.f32.mxu0 %v86_v35  ;;  %v3983_v29 = vpack.c.bf16 %v362_v23, %v361_v21  ;;  %v331_v31 = vld [vmem:[%s6872_s1 + $0x660] sm:$0xff]  ;;  %v364_v35 = vld [vmem:[%s6872_s1 + $0x768] sm:$0xff]  ;;  %v90_v19 = vld [vmem:[%s6871_s0 + $0x1f8] sm:$0xff] }
  0x6a   :  { %1029 = vmatmul.mubr.f32.gmra.mrb[18].mxu1 %v62_v32  ;;  %3938 = vmatprep.subr.bf16.mxu0 %v3937_v40  ;;  %v332_v32 = vld [vmem:[%s6872_s1 + $0x668] sm:$0xff]  ;;  %v403_v13 = vld [vmem:[%s6872_s1 + $0x8a0] sm:$0xff]  ;;  %v89_v23 = vld [vmem:[%s6871_s0 + $0x1f0] sm:$0xff] }
  0x6b   :  { %3968 = vmatpush3.bf16.msra.mxu1 %v3967_v36  ;;  %1033 = vmatprep.mubr.f32.mxu1 %v88_v41  ;;  %v349_v36 = vld [vmem:[%s6872_s1 + $0x6f0] sm:$0xff]  ;;  %v3955_v40 = vpack.c.bf16 %v332_v32, %v331_v31  ;;  %v3987_v41 = vpack.c.bf16 %v364_v35, %v363_v33  ;;  %v387_v21 = vld [vmem:[%s6872_s1 + $0x820] sm:$0xff]  ;;  %v92_v25 = vld [vmem:[%s6871_s0 + $0x208] sm:$0xff] }
  0x6c   :  { %949 = vmatmul.mubr.f32.gmra.mrb[20].mxu0 %v85_v39  ;;  %3970 = vmatprep.subr.bf16.mxu1 %v3969_v45  ;;  %v382_v39 = vld [vmem:[%s6872_s1 + $0x7f8] sm:$0xff]  ;;  %v3957_v42 = vpack.c.bf16 %v350_v37, %v349_v36  ;;  %v365_v45 = vld [vmem:[%s6872_s1 + $0x770] sm:$0xff]  ;;  %v419_v26 = vld [vmem:[%s6872_s1 + $0x920] sm:$0xff] }
  0x6d   :  { %3940 = vmatpush3.bf16.msra.mxu0 %v3939_v48  ;;  %953 = vmatprep.mubr.f32.mxu0 %v111_v49  ;;  %v3989_v46 = vpack.c.bf16 %v382_v39, %v381_v38  ;;  %v399_v48 = vld [vmem:[%s6872_s1 + $0x880] sm:$0xff]  ;;  %v400_v49 = vld [vmem:[%s6872_s1 + $0x888] sm:$0xff]  ;;  %v3991_v53 = vpack.c.bf16 %v366_v47, %v365_v45  ;;  %v406_v31 = vld [vmem:[%s6872_s1 + $0x8b8] sm:$0xff] }
  0x6e   :  { %1034 = vmatmul.mubr.f32.gmra.mrb[20].mxu1 %v87_v44  ;;  %3942 = vmatprep.subr.bf16.mxu0 %v3941_v56  ;;  %v334_v44 = vld [vmem:[%s6872_s1 + $0x678] sm:$0xff]  ;;  %v3993_v54 = vpack.c.bf16 %v400_v49, %v399_v48  ;;  %v384_v56 = vld [vmem:[%s6872_s1 + $0x808] sm:$0xff]  ;;  %v115_v33 = vld [vmem:[%s6871_s0 + $0x2c0] sm:$0xff] }
  0x6f   :  { %3972 = vmatpush3.bf16.msra.mxu1 %v3971_v52  ;;  %1038 = vmatprep.mubr.f32.mxu1 %v113_v60  ;;  %v3959_v52 = vpack.c.bf16 %v334_v44, %v333_v43  ;;  %v39_v60 = vld [vmem:[%s6871_s0 + $0x60] sm:$0xff]  ;;  %v3995_v63 = vpack.c.bf16 %v384_v56, %v383_v55  ;;  %v420_v27 = vld [vmem:[%s6872_s1 + $0x928] sm:$0xff]  ;;  %v438_v35 = vld [vmem:[%s6872_s1 + $0x9b8] sm:$0xff] }
  0x70   :  { %954 = vmatmul.mubr.f32.gmra.mrb[22].mxu0 %v110_v0  ;;  %3974 = vmatprep.subr.bf16.mxu1 %v3973_v61  ;;  %v401_v61 = vld [vmem:[%s6872_s1 + $0x890] sm:$0xff]  ;;  %v4035_v36 = vpack.c.bf16 %v420_v27, %v419_v26  ;;  %v390_v38 = vld [vmem:[%s6872_s1 + $0x838] sm:$0xff]  ;;  %v408_v43 = vld [vmem:[%s6872_s1 + $0x8c8] sm:$0xff] }
  0x71   :  { %3944 = vmatpush3.bf16.msra.mxu0 %v3943_v1  ;;  %1108 = vmatprep.mubr.f32.mxu0 %v40_v14  ;;  %v41_v0 = vld [vmem:[%s6871_s0 + $0x70] sm:$0xff]  ;;  %v404_v14 = vld [vmem:[%s6872_s1 + $0x8a8] sm:$0xff]  ;;  %v114_v48 = vld [vmem:[%s6871_s0 + $0x2b8] sm:$0xff] }
  0x72   :  { %1039 = vmatmul.mubr.f32.gmra.mrb[22].mxu1 %v112_v2  ;;  %3946 = vmatprep.subr.bf16.mxu0 %v3945_v4  ;;  %v433_v1 = vld [vmem:[%s6872_s1 + $0x990] sm:$0xff]  ;;  %v434_v2 = vld [vmem:[%s6872_s1 + $0x998] sm:$0xff]  ;;  %v4027_v4 = vpack.c.bf16 %v416_v59, %v415_v58  ;;  %v4001_v24 = vpack.c.bf16 %v404_v14, %v403_v13  ;;  %v440_v47 = vld [vmem:[%s6872_s1 + $0x9c8] sm:$0xff] }
  0x73   :  { %3976 = vmatpush3.bf16.msra.mxu1 %v3975_v3  ;;  %1193 = vmatprep.mubr.f32.mxu1 %v42_v16  ;;  %v65_v3 = vld [vmem:[%s6871_s0 + $0x130] sm:$0xff]  ;;  %v4029_v12 = vpack.c.bf16 %v434_v2, %v433_v1  ;;  %v66_v16 = vld [vmem:[%s6871_s0 + $0x138] sm:$0xff]  ;;  %v116_v50 = vld [vmem:[%s6871_s0 + $0x2c8] sm:$0xff] }
  0x74   :  { %3978 = vmatprep.subr.bf16.mxu1 %v3977_v8  ;;  %v3997_v8 = vpack.c.bf16 %v402_v62, %v401_v61  ;;  %v389_v37 = vld [vmem:[%s6872_s1 + $0x830] sm:$0xff]  ;;  %v423_v55 = vld [vmem:[%s6872_s1 + $0x940] sm:$0xff]  ;;  %v410_v59 = vld [vmem:[%s6872_s1 + $0x8d8] sm:$0xff] }
  0x75   :  { %3948 = vmatpush3.bf16.msra.mxu0 %v3947_v15  ;;  %v3999_v15 = vpack.c.bf16 %v386_v6, %v385_v5  ;;  %v421_v39 = vld [vmem:[%s6872_s1 + $0x930] sm:$0xff]  ;;  %v4007_v49 = vpack.c.bf16 %v390_v38, %v389_v37  ;;  %v442_v61 = vld [vmem:[%s6872_s1 + $0x9d8] sm:$0xff]  ;;  %v44_v62 = vld [vmem:[%s6871_s0 + $0x88] sm:$0xff] }
  0x76   :  { %3950 = vmatprep.subr.bf16.mxu0 %v3949_v18  ;;  %v436_v18 = vld [vmem:[%s6872_s1 + $0x9a8] sm:$0xff]  ;;  %v117_v44 = vld [vmem:[%s6871_s0 + $0x2d0] sm:$0xff]  ;;  %v443_v10 = vld [vmem:[%s6872_s1 + $0x9e0] sm:$0xff] }
  0x77   :  { %3980 = vmatpush3.bf16.msra.mxu1 %v3979_v17  ;;  %v435_v17 = vld [vmem:[%s6872_s1 + $0x9a0] sm:$0xff]  ;;  %v409_v58 = vld [vmem:[%s6872_s1 + $0x8d0] sm:$0xff]  ;;  %v412_v9 = vld [vmem:[%s6872_s1 + $0x8e8] sm:$0xff] }
  0x78   :  { %3982 = vmatprep.subr.bf16.mxu1 %v3981_v22  ;;  %v388_v22 = vld [vmem:[%s6872_s1 + $0x828] sm:$0xff]  ;;  %v4013_v2 = vpack.c.bf16 %v410_v59, %v409_v58  ;;  %v425_v5 = vld [vmem:[%s6872_s1 + $0x950] sm:$0xff]  ;;  %v482_v58 = vld [vmem:[%s6872_s1 + $0xb18] sm:$0xff] }
  0x79   :  { %3952 = vmatpush3.bf16.msra.mxu0 %v3951_v28  ;;  %v91_v28 = vld [vmem:[%s6871_s0 + $0x200] sm:$0xff]  ;;  %v4003_v32 = vpack.c.bf16 %v388_v22, %v387_v21  ;;  %v414_v21 = vld [vmem:[%s6872_s1 + $0x8f8] sm:$0xff]  ;;  %v445_v22 = vld [vmem:[%s6872_s1 + $0x9f0] sm:$0xff] }
  0x7a   :  { %3954 = vmatprep.subr.bf16.mxu0 %v3953_v30  ;;  %v405_v30 = vld [vmem:[%s6872_s1 + $0x8b0] sm:$0xff]  ;;  %v71_v59 = vld [vmem:[%s6871_s0 + $0x160] sm:$0xff] }
  0x7b   :  { %3984 = vmatpush3.bf16.msra.mxu1 %v3983_v29  ;;  %v4033_v29 = vpack.c.bf16 %v436_v18, %v435_v17  ;;  %v427_v17 = vld [vmem:[%s6872_s1 + $0x960] sm:$0xff]  ;;  %v397_v27 = vld [vmem:[%s6872_s1 + $0x870] sm:$0xff] }
  0x7c   :  { %3986 = vmatprep.subr.bf16.mxu1 %v3985_v34  ;;  %v437_v34 = vld [vmem:[%s6872_s1 + $0x9b0] sm:$0xff] }
  0x7d   :  { %3956 = vmatpush3.bf16.msra.mxu0 %v3955_v40  ;;  %v4005_v40 = vpack.c.bf16 %v406_v31, %v405_v30  ;;  %v4037_v45 = vpack.c.bf16 %v438_v35, %v437_v34  ;;  %v430_v31 = vld [vmem:[%s6872_s1 + $0x978] sm:$0xff]  ;;  %v495_v34 = vld [vmem:[%s6872_s1 + $0xb80] sm:$0xff]  ;;  %v496_v35 = vld [vmem:[%s6872_s1 + $0xb88] sm:$0xff] }
  0x7e   :  { %3958 = vmatprep.subr.bf16.mxu0 %v3957_v42  ;;  %v407_v42 = vld [vmem:[%s6872_s1 + $0x8c0] sm:$0xff] }
  0x7f   :  { %3988 = vmatpush3.bf16.msra.mxu1 %v3987_v41  ;;  %v422_v41 = vld [vmem:[%s6872_s1 + $0x938] sm:$0xff] }
  0x80   :  { %3990 = vmatprep.subr.bf16.mxu1 %v3989_v46  ;;  %v439_v46 = vld [vmem:[%s6872_s1 + $0x9c0] sm:$0xff]  ;;  %v4039_v51 = vpack.c.bf16 %v422_v41, %v421_v39  ;;  %v4089_v41 = vpack.c.bf16 %v496_v35, %v495_v34 }
  0x81   :  { %3960 = vmatpush3.bf16.msra.mxu0 %v3959_v52  ;;  %v4009_v52 = vpack.c.bf16 %v408_v43, %v407_v42  ;;  %v4041_v56 = vpack.c.bf16 %v440_v47, %v439_v46  ;;  %v447_v39 = vld [vmem:[%s6872_s1 + $0xa00] sm:$0xff]  ;;  %v480_v43 = vld [vmem:[%s6872_s1 + $0xb08] sm:$0xff]  ;;  %v466_v46 = vld [vmem:[%s6872_s1 + $0xa98] sm:$0xff] }
  0x82   :  { %3994 = vmatprep.subr.bf16.mxu0 %v3993_v54  ;;  %v392_v54 = vld [vmem:[%s6872_s1 + $0x848] sm:$0xff]  ;;  %v479_v42 = vld [vmem:[%s6872_s1 + $0xb00] sm:$0xff] }
  0x83   :  { %3992 = vmatpush3.bf16.msra.mxu1 %v3991_v53  ;;  %v391_v53 = vld [vmem:[%s6872_s1 + $0x840] sm:$0xff] }
  0x84   :  { %4026 = vmatprep.subr.bf16.mxu1 %v4025_v57  ;;  %1109 = vmatmul.mubr.f32.vlgmr.msra.gmra.mrb[24].mxu0 %v39_v60  ;;  %v424_v57 = vld [vmem:[%s6872_s1 + $0x948] sm:$0xff]  ;;  %v441_v60 = vld [vmem:[%s6872_s1 + $0x9d0] sm:$0xff] }
  0x85   :  { %3996 = vmatpush3.bf16.msra.mxu0 %v3995_v63  ;;  %1113 = vmatprep.mubr.f32.mxu0 %v65_v3  ;;  %v4011_v63 = vpack.c.bf16 %v392_v54, %v391_v53  ;;  %v4043_v1 = vpack.c.bf16 %v424_v57, %v423_v55  ;;  %v393_v3 = vld [vmem:[%s6872_s1 + $0x850] sm:$0xff]  ;;  %v4045_v6 = vpack.c.bf16 %v442_v61, %v441_v60  ;;  %v450_v54 = vld [vmem:[%s6872_s1 + $0xa18] sm:$0xff]  ;;  %v68_v55 = vld [vmem:[%s6871_s0 + $0x148] sm:$0xff] }
  0x86   :  { %1194 = vmatmul.mubr.f32.vlgmr.msra.gmra.mrb[24].mxu1 %v41_v0  ;;  %3998 = vmatprep.subr.bf16.mxu0 %v3997_v8  ;;  %v46_v0 = vld [vmem:[%s6871_s0 + $0x98] sm:$0xff]  ;;  %v411_v8 = vld [vmem:[%s6872_s1 + $0x8e0] sm:$0xff]  ;;  %v449_v53 = vld [vmem:[%s6872_s1 + $0xa10] sm:$0xff] }
  0x87   :  { %4028 = vmatpush3.bf16.msra.mxu1 %v4027_v4  ;;  %1198 = vmatprep.mubr.f32.mxu1 %v67_v11  ;;  %v394_v4 = vld [vmem:[%s6872_s1 + $0x858] sm:$0xff]  ;;  %v444_v11 = vld [vmem:[%s6872_s1 + $0x9e8] sm:$0xff]  ;;  %v4017_v14 = vpack.c.bf16 %v412_v9, %v411_v8  ;;  %v481_v57 = vld [vmem:[%s6872_s1 + $0xb10] sm:$0xff] }
  0x88   :  { %1114 = vmatmul.mubr.f32.gmra.mrb[26].mxu0 %v64_v7  ;;  %4030 = vmatprep.subr.bf16.mxu1 %v4029_v12  ;;  %v426_v7 = vld [vmem:[%s6872_s1 + $0x958] sm:$0xff]  ;;  %v4015_v12 = vpack.c.bf16 %v394_v4, %v393_v3  ;;  %v4049_v18 = vpack.c.bf16 %v444_v11, %v443_v10  ;;  %v467_v61 = vld [vmem:[%s6872_s1 + $0xaa0] sm:$0xff]  ;;  %v4095_v4 = vpack.c.bf16 %v482_v58, %v481_v57  ;;  %v96_v9 = vld [vmem:[%s6871_s0 + $0x228] sm:$0xff] }
  0x89   :  { %4000 = vmatpush3.bf16.msra.mxu0 %v3999_v15  ;;  %1118 = vmatprep.mubr.f32.mxu0 %v90_v19  ;;  %v4047_v13 = vpack.c.bf16 %v426_v7, %v425_v5  ;;  %v395_v15 = vld [vmem:[%s6872_s1 + $0x860] sm:$0xff]  ;;  %v428_v19 = vld [vmem:[%s6872_s1 + $0x968] sm:$0xff]  ;;  %v94_v3 = vld [vmem:[%s6871_s0 + $0x218] sm:$0xff] }
  0x8a   :  { %1199 = vmatmul.mubr.f32.gmra.mrb[26].mxu1 %v66_v16  ;;  %4002 = vmatprep.subr.bf16.mxu0 %v4001_v24  ;;  %v396_v16 = vld [vmem:[%s6872_s1 + $0x868] sm:$0xff]  ;;  %v451_v5 = vld [vmem:[%s6872_s1 + $0xa20] sm:$0xff]  ;;  %v93_v7 = vld [vmem:[%s6871_s0 + $0x210] sm:$0xff] }
  0x8b   :  { %4032 = vmatpush3.bf16.msra.mxu1 %v4031_v20  ;;  %1203 = vmatprep.mubr.f32.mxu1 %v92_v25  ;;  %v413_v20 = vld [vmem:[%s6872_s1 + $0x8f0] sm:$0xff]  ;;  %v4019_v24 = vpack.c.bf16 %v396_v16, %v395_v15  ;;  %v4051_v25 = vpack.c.bf16 %v428_v19, %v427_v17  ;;  %v483_v10 = vld [vmem:[%s6872_s1 + $0xb20] sm:$0xff]  ;;  %v484_v11 = vld [vmem:[%s6872_s1 + $0xb28] sm:$0xff] }
  0x8c   :  { %1119 = vmatmul.mubr.f32.gmra.mrb[28].mxu0 %v89_v23  ;;  %4034 = vmatprep.subr.bf16.mxu1 %v4033_v29  ;;  %v446_v23 = vld [vmem:[%s6872_s1 + $0x9f8] sm:$0xff]  ;;  %v4021_v26 = vpack.c.bf16 %v414_v21, %v413_v20  ;;  %v429_v29 = vld [vmem:[%s6872_s1 + $0x970] sm:$0xff] }
  0x8d   :  { %4004 = vmatpush3.bf16.msra.mxu0 %v4003_v32  ;;  %1123 = vmatprep.mubr.f32.mxu0 %v115_v33  ;;  %v4053_v30 = vpack.c.bf16 %v446_v23, %v445_v22  ;;  %v463_v32 = vld [vmem:[%s6872_s1 + $0xa80] sm:$0xff]  ;;  %v464_v33 = vld [vmem:[%s6872_s1 + $0xa88] sm:$0xff]  ;;  %v4055_v37 = vpack.c.bf16 %v430_v31, %v429_v29  ;;  %v470_v15 = vld [vmem:[%s6872_s1 + $0xab8] sm:$0xff] }
  0x8e   :  { %1204 = vmatmul.mubr.f32.gmra.mrb[28].mxu1 %v91_v28  ;;  %4006 = vmatprep.subr.bf16.mxu0 %v4005_v40  ;;  %v398_v28 = vld [vmem:[%s6872_s1 + $0x878] sm:$0xff]  ;;  %v4057_v38 = vpack.c.bf16 %v464_v33, %v463_v32  ;;  %v448_v40 = vld [vmem:[%s6872_s1 + $0xa08] sm:$0xff] }
  0x8f   :  { %4036 = vmatpush3.bf16.msra.mxu1 %v4035_v36  ;;  %1208 = vmatprep.mubr.f32.mxu1 %v117_v44  ;;  %v4023_v36 = vpack.c.bf16 %v398_v28, %v397_v27  ;;  %v43_v44 = vld [vmem:[%s6871_s0 + $0x80] sm:$0xff]  ;;  %v4059_v47 = vpack.c.bf16 %v448_v40, %v447_v39 }
  0x90   :  { %1124 = vmatmul.mubr.f32.gmra.mrb[30].mxu0 %v114_v48  ;;  %4038 = vmatprep.subr.bf16.mxu1 %v4037_v45  ;;  %v465_v45 = vld [vmem:[%s6872_s1 + $0xa90] sm:$0xff] }
  0x91   :  { %4008 = vmatpush3.bf16.msra.mxu0 %v4007_v49  ;;  %1278 = vmatprep.mubr.f32.mxu0 %v44_v62  ;;  %v45_v48 = vld [vmem:[%s6871_s0 + $0x90] sm:$0xff]  ;;  %v468_v62 = vld [vmem:[%s6872_s1 + $0xaa8] sm:$0xff] }
  0x92   :  { %1209 = vmatmul.mubr.f32.gmra.mrb[30].mxu1 %v116_v50  ;;  %4010 = vmatprep.subr.bf16.mxu0 %v4009_v52  ;;  %v497_v49 = vld [vmem:[%s6872_s1 + $0xb90] sm:$0xff]  ;;  %v498_v50 = vld [vmem:[%s6872_s1 + $0xb98] sm:$0xff]  ;;  %v4091_v52 = vpack.c.bf16 %v480_v43, %v479_v42  ;;  %v4065_v8 = vpack.c.bf16 %v468_v62, %v467_v61 }
  0x93   :  { %4040 = vmatpush3.bf16.msra.mxu1 %v4039_v51  ;;  %1363 = vmatprep.mubr.f32.mxu1 %v46_v0  ;;  %v69_v51 = vld [vmem:[%s6871_s0 + $0x150] sm:$0xff]  ;;  %v4093_v60 = vpack.c.bf16 %v498_v50, %v497_v49  ;;  %v70_v0 = vld [vmem:[%s6871_s0 + $0x158] sm:$0xff] }
  0x94   :  { %4042 = vmatprep.subr.bf16.mxu1 %v4041_v56  ;;  %v4061_v56 = vpack.c.bf16 %v466_v46, %v465_v45 }
  0x95   :  { %4012 = vmatpush3.bf16.msra.mxu0 %v4011_v63  ;;  %v4063_v63 = vpack.c.bf16 %v450_v54, %v449_v53 }
  0x96   :  { %4014 = vmatprep.subr.bf16.mxu0 %v4013_v2  ;;  %v500_v2 = vld [vmem:[%s6872_s1 + $0xba8] sm:$0xff] }
  0x97   :  { %4044 = vmatpush3.bf16.msra.mxu1 %v4043_v1  ;;  %v499_v1 = vld [vmem:[%s6872_s1 + $0xba0] sm:$0xff] }
  0x98   :  { %4046 = vmatprep.subr.bf16.mxu1 %v4045_v6  ;;  %v452_v6 = vld [vmem:[%s6872_s1 + $0xa28] sm:$0xff] }
  0x99   :  { %4016 = vmatpush3.bf16.msra.mxu0 %v4015_v12  ;;  %v95_v12 = vld [vmem:[%s6871_s0 + $0x220] sm:$0xff] }
  0x9a   :  { %4018 = vmatprep.subr.bf16.mxu0 %v4017_v14  ;;  %v469_v14 = vld [vmem:[%s6872_s1 + $0xab0] sm:$0xff] }
  0x9b   :  { %4048 = vmatpush3.bf16.msra.mxu1 %v4047_v13  ;;  %v4097_v13 = vpack.c.bf16 %v500_v2, %v499_v1 }
  0x9c   :  { %4050 = vmatprep.subr.bf16.mxu1 %v4049_v18 }
  0x9d   :  { %4020 = vmatpush3.bf16.msra.mxu0 %v4019_v24 }
  0x9e   :  { %4022 = vmatprep.subr.bf16.mxu0 %v4021_v26 }
  0x9f   :  { %4052 = vmatpush3.bf16.msra.mxu1 %v4051_v25 }
  0xa0   :  { %4054 = vmatprep.subr.bf16.mxu1 %v4053_v30 }
  0xa1   :  { %4024 = vmatpush3.bf16.msra.mxu0 %v4023_v36 }
  0xa2   :  { %4058 = vmatprep.subr.bf16.mxu0 %v4057_v38 }
  0xa3   :  { %4056 = vmatpush3.bf16.msra.mxu1 %v4055_v37 }
  0xa4   :  { %4090 = vmatprep.subr.bf16.mxu1 %v4089_v41  ;;  %1279 = vmatmul.mubr.f32.vlgmr.msra.gmra.mrb[32].mxu0 %v43_v44 }
  0xa5   :  { %4060 = vmatpush3.bf16.msra.mxu0 %v4059_v47  ;;  %1283 = vmatprep.mubr.f32.mxu0 %v69_v51 }
  0xa6   :  { %1364 = vmatmul.mubr.f32.vlgmr.msra.gmra.mrb[32].mxu1 %v45_v48  ;;  %4062 = vmatprep.subr.bf16.mxu0 %v4061_v56 }
  0xa7   :  { %4092 = vmatpush3.bf16.msra.mxu1 %v4091_v52  ;;  %1368 = vmatprep.mubr.f32.mxu1 %v71_v59 }
  0xa8   :  { %1284 = vmatmul.mubr.f32.gmra.mrb[34].mxu0 %v68_v55  ;;  %4094 = vmatprep.subr.bf16.mxu1 %v4093_v60 }
  0xa9   :  { %12 = vsyncpa [#allocation5], 0  ;;  %4064 = vmatpush3.bf16.msra.mxu0 %v4063_v63  ;;  %v4067_v16 = vpack.c.bf16 %v452_v6, %v451_v5  ;;  %v119_v17 = vld [vmem:[%s6871_s0 + $0x2e0] sm:$0xff]  ;;  %v501_v18 = vld [vmem:[%s6872_s1 + $0xbb0] sm:$0xff]  ;;  %1288 = vmatprep.mubr.f32.mxu0 %v94_v3  ;;  %v4099_v20 = vpack.c.bf16 %v484_v11, %v483_v10  ;;  %v4069_v24 = vpack.c.bf16 %v470_v15, %v469_v14  ;;  %vm4458_vm0 = vmmov 0  }
  0xaa   :  { %1369 = vmatmul.mubr.f32.gmra.mrb[34].mxu1 %v70_v0  ;;  %v502_v19 = vld [vmem:[%s6872_s1 + $0xbb8] sm:$0xff]  ;;  %v453_v21 = vld [vmem:[%s6872_s1 + $0xa30] sm:$0xff]  ;;  %4066 = vmatprep.subr.bf16.mxu0 %v4065_v8  ;;  %v471_v26 = vld [vmem:[%s6872_s1 + $0xac0] sm:$0xff]  ;;  %vm1639_vm1 = vcmask 261120  }
  0xab   :  { %4096 = vmatpush3.bf16.msra.mxu1 %v4095_v4  ;;  %v454_v22 = vld [vmem:[%s6872_s1 + $0xa38] sm:$0xff]  ;;  %v485_v23 = vld [vmem:[%s6872_s1 + $0xb30] sm:$0xff]  ;;  %1373 = vmatprep.mubr.f32.mxu1 %v96_v9  ;;  %v472_v27 = vld [vmem:[%s6872_s1 + $0xac8] sm:$0xff]  ;;  %v4101_v29 = vpack.c.bf16 %v502_v19, %v501_v18 }
  0xac   :  { %v486_v25 = vld [vmem:[%s6872_s1 + $0xb38] sm:$0xff]  ;;  %1289 = vmatmul.mubr.f32.gmra.mrb[36].mxu0 %v93_v7  ;;  %4098 = vmatprep.subr.bf16.mxu1 %v4097_v13  ;;  %v121_v28 = vld [vmem:[%s6871_s0 + $0x2f0] sm:$0xff]  ;;  %v503_v30 = vld [vmem:[%s6872_s1 + $0xbc0] sm:$0xff]  ;;  %v4071_v33 = vpack.c.bf16 %v454_v22, %v453_v21  ;;  %v4073_v36 = vpack.c.bf16 %v472_v27, %v471_v26 }
  0xad   :  { %v504_v31 = vld [vmem:[%s6872_s1 + $0xbc8] sm:$0xff]  ;;  %4068 = vmatpush3.bf16.msra.mxu0 %v4067_v16  ;;  %v118_v32 = vld [vmem:[%s6871_s0 + $0x2d8] sm:$0xff]  ;;  %1293 = vmatprep.mubr.f32.mxu0 %v119_v17  ;;  %v4103_v35 = vpack.c.bf16 %v486_v25, %v485_v23  ;;  %v455_v37 = vld [vmem:[%s6872_s1 + $0xa40] sm:$0xff] }
  0xae   :  { %1374 = vmatmul.mubr.f32.gmra.mrb[36].mxu1 %v95_v12  ;;  %v120_v34 = vld [vmem:[%s6871_s0 + $0x2e8] sm:$0xff]  ;;  %v487_v39 = vld [vmem:[%s6872_s1 + $0xb40] sm:$0xff]  ;;  %4070 = vmatprep.subr.bf16.mxu0 %v4069_v24  ;;  %v4105_v40 = vpack.c.bf16 %v504_v31, %v503_v30  ;;  %v473_v42 = vld [vmem:[%s6872_s1 + $0xad0] sm:$0xff] }
  0xaf   :  { %4100 = vmatpush3.bf16.msra.mxu1 %v4099_v20  ;;  %v456_v38 = vld [vmem:[%s6872_s1 + $0xa48] sm:$0xff]  ;;  %1378 = vmatprep.mubr.f32.mxu1 %v121_v28  ;;  %v474_v43 = vld [vmem:[%s6872_s1 + $0xad8] sm:$0xff]  ;;  %v505_v44 = vld [vmem:[%s6872_s1 + $0xbd0] sm:$0xff] }
  0xb0   :  { %v488_v41 = vld [vmem:[%s6872_s1 + $0xb48] sm:$0xff]  ;;  %1294 = vmatmul.mubr.f32.gmra.mrb[38].mxu0 %v118_v32  ;;  %4102 = vmatprep.subr.bf16.mxu1 %v4101_v29  ;;  %v506_v45 = vld [vmem:[%s6872_s1 + $0xbd8] sm:$0xff]  ;;  %v4075_v47 = vpack.c.bf16 %v456_v38, %v455_v37  ;;  %v4077_v50 = vpack.c.bf16 %v474_v43, %v473_v42  ;;  %v457_v51 = vld [vmem:[%s6872_s1 + $0xa50] sm:$0xff] }
  0xb1   :  { %v48_v46 = vld [vmem:[%s6871_s0 + $0xa8] sm:$0xff]  ;;  %4072 = vmatpush3.bf16.msra.mxu0 %v4071_v33  ;;  %v50_v48 = vld [vmem:[%s6871_s0 + $0xb8] sm:$0xff]  ;;  %v4107_v49 = vpack.c.bf16 %v488_v41, %v487_v39  ;;  %v489_v53 = vld [vmem:[%s6872_s1 + $0xb50] sm:$0xff]  ;;  %v4109_v54 = vpack.c.bf16 %v506_v45, %v505_v44 }
  0xb2   :  { %1379 = vmatmul.mubr.f32.gmra.mrb[38].mxu1 %v120_v34  ;;  %4074 = vmatprep.subr.bf16.mxu0 %v4073_v36  ;;  %v458_v52 = vld [vmem:[%s6872_s1 + $0xa58] sm:$0xff]  ;;  %v475_v56 = vld [vmem:[%s6872_s1 + $0xae0] sm:$0xff]  ;;  %v476_v57 = vld [vmem:[%s6872_s1 + $0xae8] sm:$0xff] }
  0xb3   :  { %4104 = vmatpush3.bf16.msra.mxu1 %v4103_v35  ;;  %v490_v55 = vld [vmem:[%s6872_s1 + $0xb58] sm:$0xff]  ;;  %1448 = vmatprep.mubr.f32.mxu0 %v48_v46  ;;  %v507_v58 = vld [vmem:[%s6872_s1 + $0xbe0] sm:$0xff]  ;;  %v508_v59 = vld [vmem:[%s6872_s1 + $0xbe8] sm:$0xff]  ;;  %v4079_v60 = vpack.c.bf16 %v458_v52, %v457_v51  ;;  %v4081_v62 = vpack.c.bf16 %v476_v57, %v475_v56 }
  0xb4   :  { %4106 = vmatprep.subr.bf16.mxu1 %v4105_v40  ;;  %1533 = vmatprep.mubr.f32.mxu1 %v50_v48  ;;  %v4111_v61 = vpack.c.bf16 %v490_v55, %v489_v53  ;;  %v459_v63 = vld [vmem:[%s6872_s1 + $0xa60] sm:$0xff]  ;;  %v460_v0 = vld [vmem:[%s6872_s1 + $0xa68] sm:$0xff]  ;;  %v4113_v2 = vpack.c.bf16 %v508_v59, %v507_v58  ;;  %v477_v4 = vld [vmem:[%s6872_s1 + $0xaf0] sm:$0xff] }
  0xb5   :  { %4076 = vmatpush3.bf16.msra.mxu0 %v4075_v47  ;;  %v491_v1 = vld [vmem:[%s6872_s1 + $0xb60] sm:$0xff]  ;;  %v492_v3 = vld [vmem:[%s6872_s1 + $0xb68] sm:$0xff]  ;;  %v478_v5 = vld [vmem:[%s6872_s1 + $0xaf8] sm:$0xff]  ;;  %v4083_v8 = vpack.c.bf16 %v460_v0, %v459_v63 }
  0xb6   :  { %4078 = vmatprep.subr.bf16.mxu0 %v4077_v50  ;;  %v509_v6 = vld [vmem:[%s6872_s1 + $0xbf0] sm:$0xff]  ;;  %v510_v7 = vld [vmem:[%s6872_s1 + $0xbf8] sm:$0xff]  ;;  %v4115_v9 = vpack.c.bf16 %v492_v3, %v491_v1  ;;  %v4085_v10 = vpack.c.bf16 %v478_v5, %v477_v4  ;;  %v511_v16 = vld [vmem:[%s6872_s1 + $0xc00] sm:$0xff] }
  0xb7   :  { %4108 = vmatpush3.bf16.msra.mxu1 %v4107_v49  ;;  %v461_v11 = vld [vmem:[%s6872_s1 + $0xa70] sm:$0xff]  ;;  %v462_v12 = vld [vmem:[%s6872_s1 + $0xa78] sm:$0xff]  ;;  %v4117_v14 = vpack.c.bf16 %v510_v7, %v509_v6  ;;  %v512_v17 = vld [vmem:[%s6872_s1 + $0xc08] sm:$0xff] }
  0xb8   :  { %4110 = vmatprep.subr.bf16.mxu1 %v4109_v54  ;;  %v493_v13 = vld [vmem:[%s6872_s1 + $0xb70] sm:$0xff]  ;;  %v494_v15 = vld [vmem:[%s6872_s1 + $0xb78] sm:$0xff]  ;;  %v4087_v18 = vpack.c.bf16 %v462_v12, %v461_v11  ;;  %v4121_v20 = vpack.c.bf16 %v512_v17, %v511_v16  ;;  %v47_v23 = vld [vmem:[%s6871_s0 + $0xa0] sm:$0xff] }
  0xb9   :  { %4080 = vmatpush3.bf16.msra.mxu0 %v4079_v60  ;;  %v4119_v19 = vpack.c.bf16 %v494_v15, %v493_v13  ;;  %v513_v21 = vld [vmem:[%s6872_s1 + $0xc10] sm:$0xff]  ;;  %v514_v22 = vld [vmem:[%s6872_s1 + $0xc18] sm:$0xff]  ;;  %v515_v27 = vld [vmem:[%s6872_s1 + $0xc20] sm:$0xff] }
  0xba   :  { %4082 = vmatprep.subr.bf16.mxu0 %v4081_v62  ;;  %v49_v24 = vld [vmem:[%s6871_s0 + $0xb0] sm:$0xff]  ;;  %v4125_v25 = vpack.c.bf16 %v514_v22, %v513_v21  ;;  %v516_v28 = vld [vmem:[%s6872_s1 + $0xc28] sm:$0xff]  ;;  %v75_v29 = vld [vmem:[%s6871_s0 + $0x180] sm:$0xff] }
  0xbb   :  { %4112 = vmatpush3.bf16.msra.mxu1 %v4111_v61  ;;  %v73_v26 = vld [vmem:[%s6871_s0 + $0x170] sm:$0xff]  ;;  %v72_v30 = vld [vmem:[%s6871_s0 + $0x168] sm:$0xff]  ;;  %v74_v31 = vld [vmem:[%s6871_s0 + $0x178] sm:$0xff]  ;;  %v4129_v32 = vpack.c.bf16 %v516_v28, %v515_v27 }
  0xbc   :  { %4114 = vmatprep.subr.bf16.mxu1 %v4113_v2  ;;  %v98_v33 = vld [vmem:[%s6871_s0 + $0x238] sm:$0xff]  ;;  %v517_v34 = vld [vmem:[%s6872_s1 + $0xc30] sm:$0xff]  ;;  %v100_v36 = vld [vmem:[%s6871_s0 + $0x248] sm:$0xff] }
  0xbd   :  { %4084 = vmatpush3.bf16.msra.mxu0 %v4083_v8  ;;  %v518_v35 = vld [vmem:[%s6872_s1 + $0xc38] sm:$0xff]  ;;  %v97_v37 = vld [vmem:[%s6871_s0 + $0x230] sm:$0xff]  ;;  %v99_v38 = vld [vmem:[%s6871_s0 + $0x240] sm:$0xff] }
  0xbe   :  { %4086 = vmatprep.subr.bf16.mxu0 %v4085_v10  ;;  %v4133_v39 = vpack.c.bf16 %v518_v35, %v517_v34  ;;  %v123_v40 = vld [vmem:[%s6871_s0 + $0x300] sm:$0xff]  ;;  %v520_v42 = vld [vmem:[%s6872_s1 + $0xc48] sm:$0xff]  ;;  %v125_v43 = vld [vmem:[%s6871_s0 + $0x310] sm:$0xff] }
  0xbf   :  { %4116 = vmatpush3.bf16.msra.mxu1 %v4115_v9  ;;  %v519_v41 = vld [vmem:[%s6872_s1 + $0xc40] sm:$0xff]  ;;  %v122_v44 = vld [vmem:[%s6871_s0 + $0x2f8] sm:$0xff]  ;;  %v124_v45 = vld [vmem:[%s6871_s0 + $0x308] sm:$0xff] }
  0xc0   :  { %4118 = vmatprep.subr.bf16.mxu1 %v4117_v14  ;;  %v4137_v46 = vpack.c.bf16 %v520_v42, %v519_v41  ;;  %v521_v47 = vld [vmem:[%s6872_s1 + $0xc50] sm:$0xff]  ;;  %v522_v48 = vld [vmem:[%s6872_s1 + $0xc58] sm:$0xff]  ;;  %v51_v49 = vld [vmem:[%s6871_s0 + $0xc0] sm:$0xff] }
  0xc1   :  { %4088 = vmatpush3.bf16.msra.mxu0 %v4087_v18  ;;  %v4141_v50 = vpack.c.bf16 %v522_v48, %v521_v47  ;;  %v523_v51 = vld [vmem:[%s6872_s1 + $0xc60] sm:$0xff]  ;;  %v524_v52 = vld [vmem:[%s6872_s1 + $0xc68] sm:$0xff]  ;;  %v525_v54 = vld [vmem:[%s6872_s1 + $0xc70] sm:$0xff] }
  0xc2   :  { %4122 = vmatprep.subr.bf16.mxu0 %v4121_v20  ;;  %v4145_v53 = vpack.c.bf16 %v524_v52, %v523_v51  ;;  %v526_v55 = vld [vmem:[%s6872_s1 + $0xc78] sm:$0xff]  ;;  %v76_v57 = vld [vmem:[%s6871_s0 + $0x188] sm:$0xff]  ;;  %v101_v58 = vld [vmem:[%s6871_s0 + $0x250] sm:$0xff] }
  0xc3   :  { %4120 = vmatpush3.bf16.msra.mxu1 %v4119_v19  ;;  %v4149_v56 = vpack.c.bf16 %v526_v55, %v525_v54  ;;  %v126_v59 = vld [vmem:[%s6871_s0 + $0x318] sm:$0xff]  ;;  %v2833_v61 = vld [vmem:[%s6873_s2] ss:$0 sm:$0xff] }
  0xc4   :  { %1449 = vmatmul.mubr.f32.vlgmr.msra.gmra.mrb[40].mxu0 %v47_v23 }
  0xc5   :  { %4124 = vmatpush3.bf16.msra.mxu0 %v4121_v20  ;;  %1453 = vmatprep.mubr.f32.mxu0 %v73_v26 }
  0xc6   :  { %1534 = vmatmul.mubr.f32.vlgmr.msra.gmra.mrb[40].mxu1 %v49_v24  ;;  %4126 = vmatprep.subr.bf16.mxu0 %v4125_v25 }
  0xc7   :  { %1538 = vmatprep.mubr.f32.mxu1 %v75_v29 }
  0xc8   :  { %1454 = vmatmul.mubr.f32.gmra.mrb[42].mxu0 %v72_v30 }
  0xc9   :  { %4128 = vmatpush3.bf16.msra.mxu0 %v4125_v25  ;;  %1458 = vmatprep.mubr.f32.mxu0 %v98_v33 }
  0xca   :  { %1539 = vmatmul.mubr.f32.gmra.mrb[42].mxu1 %v74_v31  ;;  %4130 = vmatprep.subr.bf16.mxu0 %v4129_v32 }
  0xcb   :  { %1543 = vmatprep.mubr.f32.mxu1 %v100_v36 }
  0xcc   :  { %1459 = vmatmul.mubr.f32.gmra.mrb[44].mxu0 %v97_v37 }
  0xcd   :  { %4132 = vmatpush3.bf16.msra.mxu0 %v4129_v32  ;;  %1463 = vmatprep.mubr.f32.mxu0 %v123_v40 }
  0xce   :  { %1544 = vmatmul.mubr.f32.gmra.mrb[44].mxu1 %v99_v38  ;;  %4134 = vmatprep.subr.bf16.mxu0 %v4133_v39 }
  0xcf   :  { %1548 = vmatprep.mubr.f32.mxu1 %v125_v43 }
  0xd0   :  { %1464 = vmatmul.mubr.f32.gmra.mrb[46].mxu0 %v122_v44 }
  0xd1   :  { %4136 = vmatpush3.bf16.msra.mxu0 %v4133_v39  ;;  %3709 = vmatprep.mubr.f32.mxu0 %v51_v49 }
  0xd2   :  { %1549 = vmatmul.mubr.f32.gmra.mrb[46].mxu1 %v124_v45  ;;  %4138 = vmatprep.subr.bf16.mxu0 %v4137_v46 }
  0xd5   :  { %4140 = vmatpush3.bf16.msra.mxu0 %v4137_v46 }
  0xd6   :  { %4142 = vmatprep.subr.bf16.mxu0 %v4141_v50 }
  0xd9   :  { %4144 = vmatpush3.bf16.msra.mxu0 %v4141_v50 }
  0xda   :  { %4146 = vmatprep.subr.bf16.mxu0 %v4145_v53 }
  0xdd   :  { %4148 = vmatpush3.bf16.msra.mxu0 %v4145_v53 }
  0xde   :  { %4150 = vmatprep.subr.bf16.mxu0 %v4149_v56 }
  0xe1   :  { %4152 = vmatpush3.bf16.msra.mxu0 %v4149_v56 }
  0xe4   :  { %3710 = vmatmul.mubr.f32.vlgmr.msra.gmra.mrb[48].mxu0 %v76_v57 }
  0xe5   :  { %3712 = vmatprep.mubr.f32.mxu0 %v101_v58 }
  0xe8   :  { %3713 = vmatmul.mubr.f32.gmra.mrb[50].mxu0 %v126_v59 }
  0xf7   :  { %v2871_v60 = vpop.f32.mrb[0].mxu0 }
  0xf8   :  { %v2872_v62 = vpop.f32.mrb[1].mxu0 }
  0xf9   :  { %v2915_v63 = vpop.f32.mrb[0].mxu1  ;;  %v2873_v0 = vadd.f32 %v2872_v62, %v2871_v60 }
  0xfa   :  { %v2916_v1 = vpop.f32.mrb[1].mxu1 }
  0xfb   :  { %v2917_v2 = vadd.f32 %v2916_v1, %v2915_v63  ;;  %v601_v3 = vadd.f32 %v2873_v0, %v2833_v61  ;;  %v2874_v4 = vpop.f32.mrb[2].mxu0 }
  0xfc   :  { %v2875_v5 = vpop.f32.mrb[3].mxu0 }
  0xfd   :  { %v2918_v6 = vpop.f32.mrb[2].mxu1  ;;  %v686_v7 = vadd.f32 %v2917_v2, %v601_v3  ;;  %v2876_v8 = vadd.f32 %v2875_v5, %v2874_v4 }
  0xfe   :  { %v2919_v9 = vpop.f32.mrb[3].mxu1 }
  0xff   :  { %v2920_v10 = vadd.f32 %v2919_v9, %v2918_v6  ;;  %v606_v11 = vadd.f32 %v2876_v8, %v2833_v61  ;;  %v2877_v12 = vpop.f32.mrb[4].mxu0 }
 0x100   :  { %v2878_v13 = vpop.f32.mrb[5].mxu0 }
 0x101   :  { %v2921_v14 = vpop.f32.mrb[4].mxu1  ;;  %v691_v15 = vadd.f32 %v2920_v10, %v606_v11  ;;  %v2879_v16 = vadd.f32 %v2878_v13, %v2877_v12 }
 0x102   :  { %v2922_v17 = vpop.f32.mrb[5].mxu1 }
 0x103   :  { %v2923_v18 = vadd.f32 %v2922_v17, %v2921_v14  ;;  %v611_v19 = vadd.f32 %v2879_v16, %v2833_v61  ;;  %v2880_v20 = vpop.f32.mrb[6].mxu0 }
 0x104   :  { %v2881_v21 = vpop.f32.mrb[7].mxu0 }
 0x105   :  { %v2924_v22 = vpop.f32.mrb[6].mxu1  ;;  %v696_v23 = vadd.f32 %v2923_v18, %v611_v19  ;;  %v2882_v24 = vadd.f32 %v2881_v21, %v2880_v20  ;;  %v4459_v20 = vmov 0.0  }
 0x106   :  { %v2925_v25 = vpop.f32.mrb[7].mxu1  ;;  %3723 = vmatprep.mubr.msk.f32.mxu1 %vm4458_vm0, %v4459_v20 }
 0x107   :  { %v2926_v26 = vadd.f32 %v2925_v25, %v2924_v22  ;;  %v616_v27 = vadd.f32 %v2882_v24, %v2833_v61 }
 0x109   :  { %v701_v28 = vadd.f32 %v2926_v26, %v616_v27 }
 0x117   :  { %v2959_v29 = vpop.f32.mrb[8].mxu0 }
 0x118   :  { %v2960_v30 = vpop.f32.mrb[9].mxu0 }
 0x119   :  { %v3003_v31 = vpop.f32.mrb[8].mxu1  ;;  %v2961_v32 = vadd.f32 %v2960_v30, %v2959_v29 }
 0x11a   :  { %v3004_v33 = vpop.f32.mrb[9].mxu1 }
 0x11b   :  { %v3005_v34 = vadd.f32 %v3004_v33, %v3003_v31  ;;  %v771_v35 = vadd.f32 %v2961_v32, %v686_v7  ;;  %v2962_v36 = vpop.f32.mrb[10].mxu0  ;;  %v4457_v7 = vmov 0.0|0.0  }
 0x11c   :  { %v2963_v37 = vpop.f32.mrb[11].mxu0  ;;  %4153 = vmatprep.subr.bf16.mxu1 %v4457_v7 }
 0x11d   :  { %v3006_v38 = vpop.f32.mrb[10].mxu1  ;;  %v856_v39 = vadd.f32 %v3005_v34, %v771_v35  ;;  %v2964_v40 = vadd.f32 %v2963_v37, %v2962_v36 }
 0x11e   :  { %v3007_v41 = vpop.f32.mrb[11].mxu1 }
 0x11f   :  { %v3008_v42 = vadd.f32 %v3007_v41, %v3006_v38  ;;  %v776_v43 = vadd.f32 %v2964_v40, %v691_v15  ;;  %v2965_v44 = vpop.f32.mrb[12].mxu0 }
 0x120   :  { %v2966_v45 = vpop.f32.mrb[13].mxu0 }
 0x121   :  { %v3009_v46 = vpop.f32.mrb[12].mxu1  ;;  %v861_v47 = vadd.f32 %v3008_v42, %v776_v43  ;;  %v2967_v48 = vadd.f32 %v2966_v45, %v2965_v44 }
 0x122   :  { %v3010_v49 = vpop.f32.mrb[13].mxu1 }
 0x123   :  { %v3011_v50 = vadd.f32 %v3010_v49, %v3009_v46  ;;  %v781_v51 = vadd.f32 %v2967_v48, %v696_v23  ;;  %v2968_v52 = vpop.f32.mrb[14].mxu0 }
 0x124   :  { %v2969_v53 = vpop.f32.mrb[15].mxu0 }
 0x125   :  { %v3012_v54 = vpop.f32.mrb[14].mxu1  ;;  %v866_v55 = vadd.f32 %v3011_v50, %v781_v51  ;;  %v2970_v56 = vadd.f32 %v2969_v53, %v2968_v52 }
 0x126   :  { %v3013_v57 = vpop.f32.mrb[15].mxu1 }
 0x127   :  { %v3014_v58 = vadd.f32 %v3013_v57, %v3012_v54  ;;  %v786_v59 = vadd.f32 %v2970_v56, %v701_v28 }
 0x129   :  { %v871_v60 = vadd.f32 %v3014_v58, %v786_v59 }
 0x137   :  { %v3047_v61 = vpop.f32.mrb[16].mxu0 }
 0x138   :  { %v3048_v62 = vpop.f32.mrb[17].mxu0 }
 0x139   :  { %v3091_v63 = vpop.f32.mrb[16].mxu1  ;;  %v3049_v0 = vadd.f32 %v3048_v62, %v3047_v61 }
 0x13a   :  { %v3092_v1 = vpop.f32.mrb[17].mxu1 }
 0x13b   :  { %v3093_v2 = vadd.f32 %v3092_v1, %v3091_v63  ;;  %v941_v3 = vadd.f32 %v3049_v0, %v856_v39  ;;  %v3050_v4 = vpop.f32.mrb[18].mxu0 }
 0x13c   :  { %v3051_v5 = vpop.f32.mrb[19].mxu0 }
 0x13d   :  { %v3094_v6 = vpop.f32.mrb[18].mxu1  ;;  %v1026_v8 = vadd.f32 %v3093_v2, %v941_v3  ;;  %v3052_v9 = vadd.f32 %v3051_v5, %v3050_v4 }
 0x13e   :  { %v3095_v10 = vpop.f32.mrb[19].mxu1 }
 0x13f   :  { %v3096_v11 = vadd.f32 %v3095_v10, %v3094_v6  ;;  %v946_v12 = vadd.f32 %v3052_v9, %v861_v47  ;;  %v3053_v13 = vpop.f32.mrb[20].mxu0 }
 0x140   :  { %v3054_v14 = vpop.f32.mrb[21].mxu0 }
 0x141   :  { %v3097_v15 = vpop.f32.mrb[20].mxu1  ;;  %v1031_v16 = vadd.f32 %v3096_v11, %v946_v12  ;;  %v3055_v17 = vadd.f32 %v3054_v14, %v3053_v13 }
 0x142   :  { %v3098_v18 = vpop.f32.mrb[21].mxu1 }
 0x143   :  { %v3099_v19 = vadd.f32 %v3098_v18, %v3097_v15  ;;  %v951_v21 = vadd.f32 %v3055_v17, %v866_v55  ;;  %v3056_v22 = vpop.f32.mrb[22].mxu0 }
 0x144   :  { %v3057_v23 = vpop.f32.mrb[23].mxu0 }
 0x145   :  { %v3100_v24 = vpop.f32.mrb[22].mxu1  ;;  %v1036_v25 = vadd.f32 %v3099_v19, %v951_v21  ;;  %v3058_v26 = vadd.f32 %v3057_v23, %v3056_v22 }
 0x146   :  { %v3101_v27 = vpop.f32.mrb[23].mxu1 }
 0x147   :  { %v3102_v28 = vadd.f32 %v3101_v27, %v3100_v24  ;;  %v956_v29 = vadd.f32 %v3058_v26, %v871_v60 }
 0x149   :  { %v1041_v30 = vadd.f32 %v3102_v28, %v956_v29 }
 0x157   :  { %v3135_v31 = vpop.f32.mrb[24].mxu0 }
 0x158   :  { %v3136_v32 = vpop.f32.mrb[25].mxu0 }
 0x159   :  { %v3179_v33 = vpop.f32.mrb[24].mxu1  ;;  %v3137_v34 = vadd.f32 %v3136_v32, %v3135_v31 }
 0x15a   :  { %v3180_v35 = vpop.f32.mrb[25].mxu1 }
 0x15b   :  { %v3181_v36 = vadd.f32 %v3180_v35, %v3179_v33  ;;  %v1111_v37 = vadd.f32 %v3137_v34, %v1026_v8  ;;  %v3138_v38 = vpop.f32.mrb[26].mxu0 }
 0x15c   :  { %v3139_v39 = vpop.f32.mrb[27].mxu0 }
 0x15d   :  { %v3182_v40 = vpop.f32.mrb[26].mxu1  ;;  %v1196_v41 = vadd.f32 %v3181_v36, %v1111_v37  ;;  %v3140_v42 = vadd.f32 %v3139_v39, %v3138_v38 }
 0x15e   :  { %v3183_v43 = vpop.f32.mrb[27].mxu1 }
 0x15f   :  { %v3184_v44 = vadd.f32 %v3183_v43, %v3182_v40  ;;  %v1116_v45 = vadd.f32 %v3140_v42, %v1031_v16  ;;  %v3141_v46 = vpop.f32.mrb[28].mxu0 }
 0x160   :  { %v3142_v47 = vpop.f32.mrb[29].mxu0 }
 0x161   :  { %v3185_v48 = vpop.f32.mrb[28].mxu1  ;;  %v1201_v49 = vadd.f32 %v3184_v44, %v1116_v45  ;;  %v3143_v50 = vadd.f32 %v3142_v47, %v3141_v46 }
 0x162   :  { %v3186_v51 = vpop.f32.mrb[29].mxu1 }
 0x163   :  { %v3187_v52 = vadd.f32 %v3186_v51, %v3185_v48  ;;  %v1121_v53 = vadd.f32 %v3143_v50, %v1036_v25  ;;  %v3144_v54 = vpop.f32.mrb[30].mxu0 }
 0x164   :  { %v3145_v55 = vpop.f32.mrb[31].mxu0 }
 0x165   :  { %v3188_v56 = vpop.f32.mrb[30].mxu1  ;;  %v1206_v57 = vadd.f32 %v3187_v52, %v1121_v53  ;;  %v3146_v58 = vadd.f32 %v3145_v55, %v3144_v54 }
 0x166   :  { %v3189_v59 = vpop.f32.mrb[31].mxu1 }
 0x167   :  { %v3190_v60 = vadd.f32 %v3189_v59, %v3188_v56  ;;  %v1126_v61 = vadd.f32 %v3146_v58, %v1041_v30 }
 0x169   :  { %v1211_v62 = vadd.f32 %v3190_v60, %v1126_v61 }
 0x177   :  { %v3223_v63 = vpop.f32.mrb[32].mxu0 }
 0x178   :  { %v3224_v0 = vpop.f32.mrb[33].mxu0 }
 0x179   :  { %v3267_v1 = vpop.f32.mrb[32].mxu1  ;;  %v3225_v2 = vadd.f32 %v3224_v0, %v3223_v63 }
 0x17a   :  { %v3268_v3 = vpop.f32.mrb[33].mxu1 }
 0x17b   :  { %v3269_v4 = vadd.f32 %v3268_v3, %v3267_v1  ;;  %v1281_v5 = vadd.f32 %v3225_v2, %v1196_v41  ;;  %v3226_v6 = vpop.f32.mrb[34].mxu0 }
 0x17c   :  { %v3227_v8 = vpop.f32.mrb[35].mxu0 }
 0x17d   :  { %v3270_v9 = vpop.f32.mrb[34].mxu1  ;;  %v1366_v10 = vadd.f32 %v3269_v4, %v1281_v5  ;;  %v3228_v11 = vadd.f32 %v3227_v8, %v3226_v6 }
 0x17e   :  { %v3271_v12 = vpop.f32.mrb[35].mxu1 }
 0x17f   :  { %v3272_v13 = vadd.f32 %v3271_v12, %v3270_v9  ;;  %v1286_v14 = vadd.f32 %v3228_v11, %v1201_v49  ;;  %v3229_v15 = vpop.f32.mrb[36].mxu0 }
 0x180   :  { %v3230_v16 = vpop.f32.mrb[37].mxu0 }
 0x181   :  { %v3273_v17 = vpop.f32.mrb[36].mxu1  ;;  %v1371_v18 = vadd.f32 %v3272_v13, %v1286_v14  ;;  %v3231_v19 = vadd.f32 %v3230_v16, %v3229_v15 }
 0x182   :  { %v3274_v21 = vpop.f32.mrb[37].mxu1 }
 0x183   :  { %v3275_v22 = vadd.f32 %v3274_v21, %v3273_v17  ;;  %v1291_v23 = vadd.f32 %v3231_v19, %v1206_v57  ;;  %v3232_v24 = vpop.f32.mrb[38].mxu0  ;;  %v4460_v17 = vmov 1.0   ;;  %v1923_v19 = vld [vmem:[%s6876_s5 + $0x80] sm:$0xff]  ;;  %v1924_v21 = vld [vmem:[%s6876_s5 + $0x88] sm:$0xff] }
 0x184   :  { %v3233_v25 = vpop.f32.mrb[39].mxu0 }
 0x185   :  { %v3276_v26 = vpop.f32.mrb[38].mxu1  ;;  %v1376_v27 = vadd.f32 %v3275_v22, %v1291_v23  ;;  %v3234_v28 = vadd.f32 %v3233_v25, %v3232_v24  ;;  %v4165_v22 = vpack.c.bf16 %v1924_v21, %v1923_v19  ;;  %v1907_v23 = vld [vmem:[%s6876_s5] sm:$0xff]  ;;  %v1956_v25 = vld [vmem:[%s6876_s5 + $0x188] sm:$0xff]  ;;  %v1934_v19 = vld [vmem:[%s6876_s5 + $0xd8] sm:$0xff] }
 0x186   :  { %v3277_v29 = vpop.f32.mrb[39].mxu1  ;;  %v1955_v24 = vld [vmem:[%s6876_s5 + $0x180] sm:$0xff] }
 0x187   :  { %v3278_v30 = vadd.f32 %v3277_v29, %v3276_v26  ;;  %v1296_v31 = vadd.f32 %v3234_v28, %v1211_v62  ;;  %v4197_v26 = vpack.c.bf16 %v1956_v25, %v1955_v24  ;;  %v1940_v28 = vld [vmem:[%s6876_s5 + $0x108] sm:$0xff]  ;;  %v1966_v25 = vld [vmem:[%s6876_s5 + $0x1d8] sm:$0xff] }
 0x189   :  { %v1381_v32 = vadd.f32 %v3278_v30, %v1296_v31  ;;  %v1925_v30 = vld [vmem:[%s6876_s5 + $0x90] sm:$0xff]  ;;  %v1926_v31 = vld [vmem:[%s6876_s5 + $0x98] sm:$0xff]  ;;  %4198 = vmatprep.subr.bf16.mxu0 %v4197_v26 }
 0x18a   :  { %v1949_v26 = vld [vmem:[%s6876_s5 + $0x150] sm:$0xff] }
 0x197   :  { %v3311_v33 = vpop.f32.mrb[40].mxu0 }
 0x198   :  { %v3312_v34 = vpop.f32.mrb[41].mxu0 }
 0x199   :  { %v3355_v35 = vpop.f32.mrb[40].mxu1  ;;  %v3313_v36 = vadd.f32 %v3312_v34, %v3311_v33  ;;  %v1909_v33 = vld [vmem:[%s6876_s5 + $0x10] sm:$0xff]  ;;  %v1910_v34 = vld [vmem:[%s6876_s5 + $0x18] sm:$0xff] }
 0x19a   :  { %v3356_v37 = vpop.f32.mrb[41].mxu1 }
 0x19b   :  { %v3357_v38 = vadd.f32 %v3356_v37, %v3355_v35  ;;  %v1451_v39 = vadd.f32 %v3313_v36, %v1366_v10  ;;  %v3314_v40 = vpop.f32.mrb[42].mxu0  ;;  %v4171_v35 = vpack.c.bf16 %v1910_v34, %v1909_v33  ;;  %v1957_v36 = vld [vmem:[%s6876_s5 + $0x190] sm:$0xff]  ;;  %v1958_v37 = vld [vmem:[%s6876_s5 + $0x198] sm:$0xff]  ;;  %v1920_v34 = vld [vmem:[%s6876_s5 + $0x68] sm:$0xff] }
 0x19c   :  { %v3315_v41 = vpop.f32.mrb[43].mxu0 }
 0x19d   :  { %v3358_v42 = vpop.f32.mrb[42].mxu1  ;;  %v3316_v43 = vadd.f32 %v3315_v41, %v3314_v40  ;;  %v1536_v45 = vadd.f32 %v3357_v38, %v1451_v39  ;;  %v4201_v38 = vpack.c.bf16 %v1958_v37, %v1957_v36  ;;  %v1941_v39 = vld [vmem:[%s6876_s5 + $0x110] sm:$0xff]  ;;  %v1942_v40 = vld [vmem:[%s6876_s5 + $0x118] sm:$0xff]  ;;  %v1968_v36 = vld [vmem:[%s6876_s5 + $0x1e8] sm:$0xff] }
 0x19e   :  { %v3359_v44 = vpop.f32.mrb[43].mxu1  ;;  %v4203_v41 = vpack.c.bf16 %v1942_v40, %v1941_v39  ;;  %v1952_v39 = vld [vmem:[%s6876_s5 + $0x168] sm:$0xff]  ;;  %v1937_v40 = vld [vmem:[%s6876_s5 + $0xf0] sm:$0xff] }
 0x19f   :  { %v3360_v46 = vadd.f32 %v3359_v44, %v3358_v42  ;;  %v1456_v47 = vadd.f32 %v3316_v43, %v1371_v18  ;;  %v3317_v48 = vpop.f32.mrb[44].mxu0  ;;  %v1927_v42 = vld [vmem:[%s6876_s5 + $0xa0] sm:$0xff]  ;;  %v1928_v43 = vld [vmem:[%s6876_s5 + $0xa8] sm:$0xff] }
 0x1a0   :  { %v3318_v49 = vpop.f32.mrb[45].mxu0  ;;  %v4173_v44 = vpack.c.bf16 %v1928_v43, %v1927_v42  ;;  %v1938_v42 = vld [vmem:[%s6876_s5 + $0xf8] sm:$0xff]  ;;  %v1921_v43 = vld [vmem:[%s6876_s5 + $0x70] sm:$0xff] }
 0x1a1   :  { %v3361_v50 = vpop.f32.mrb[44].mxu1  ;;  %v3319_v51 = vadd.f32 %v3318_v49, %v3317_v48  ;;  %v1541_v53 = vadd.f32 %v3360_v46, %v1456_v47  ;;  %v1912_v46 = vld [vmem:[%s6876_s5 + $0x28] sm:$0xff]  ;;  %v1959_v48 = vld [vmem:[%s6876_s5 + $0x1a0] sm:$0xff] }
 0x1a2   :  { %v3362_v52 = vpop.f32.mrb[45].mxu1  ;;  %v1960_v49 = vld [vmem:[%s6876_s5 + $0x1a8] sm:$0xff] }
 0x1a3   :  { %v3363_v54 = vadd.f32 %v3362_v52, %v3361_v50  ;;  %v1461_v55 = vadd.f32 %v3319_v51, %v1376_v27  ;;  %v3320_v56 = vpop.f32.mrb[46].mxu0  ;;  %v1939_v27 = vld [vmem:[%s6876_s5 + $0x100] sm:$0xff]  ;;  %v4205_v50 = vpack.c.bf16 %v1960_v49, %v1959_v48  ;;  %v1944_v52 = vld [vmem:[%s6876_s5 + $0x128] sm:$0xff] }
 0x1a4   :  { %v3321_v57 = vpop.f32.mrb[47].mxu0  ;;  %v4199_v29 = vpack.c.bf16 %v1940_v28, %v1939_v27  ;;  %v1943_v51 = vld [vmem:[%s6876_s5 + $0x120] sm:$0xff]  ;;  %v1950_v27 = vld [vmem:[%s6876_s5 + $0x158] sm:$0xff] }
 0x1a5   :  { %v3364_v58 = vpop.f32.mrb[46].mxu1  ;;  %v3322_v59 = vadd.f32 %v3321_v57, %v3320_v56  ;;  %v1546_v61 = vadd.f32 %v3363_v54, %v1461_v55  ;;  %v1929_v54 = vld [vmem:[%s6876_s5 + $0xb0] sm:$0xff]  ;;  %v1930_v55 = vld [vmem:[%s6876_s5 + $0xb8] sm:$0xff] }
 0x1a6   :  { %v3365_v60 = vpop.f32.mrb[47].mxu1  ;;  %4200 = vmatpush3.bf16.msra.mxu0 %v4199_v29  ;;  %v4177_v56 = vpack.c.bf16 %v1930_v55, %v1929_v54  ;;  %v1913_v57 = vld [vmem:[%s6876_s5 + $0x30] sm:$0xff]  ;;  %v1935_v29 = vld [vmem:[%s6876_s5 + $0xe0] sm:$0xff]  ;;  %v1988_v55 = vld [vmem:[%s6876_s5 + $0x288] sm:$0xff] }
 0x1a7   :  { %v3366_v62 = vadd.f32 %v3365_v60, %v3364_v58  ;;  %v1466_v63 = vadd.f32 %v3322_v59, %v1381_v32  ;;  %v4169_v32 = vpack.c.bf16 %v1926_v31, %v1925_v30  ;;  %4202 = vmatprep.subr.bf16.mxu0 %v4201_v38  ;;  %v1914_v58 = vld [vmem:[%s6876_s5 + $0x38] sm:$0xff]  ;;  %v1961_v60 = vld [vmem:[%s6876_s5 + $0x1b0] sm:$0xff]  ;;  %v1936_v30 = vld [vmem:[%s6876_s5 + $0xe8] sm:$0xff] }
 0x1a8   :  { %v4179_v59 = vpack.c.bf16 %v1914_v58, %v1913_v57  ;;  %v1919_v31 = vld [vmem:[%s6876_s5 + $0x60] sm:$0xff]  ;;  %v4189_v33 = vpack.c.bf16 %v1936_v30, %v1935_v29  ;;  %v2020_v58 = vld [vmem:[%s6876_s5 + $0x388] sm:$0xff] }
 0x1a9   :  { %v1551_v0 = vadd.f32 %v3366_v62, %v1466_v63  ;;  %v1945_v63 = vld [vmem:[%s6876_s5 + $0x130] sm:$0xff]  ;;  %v1951_v38 = vld [vmem:[%s6876_s5 + $0x160] sm:$0xff] }
 0x1aa   :  { %4204 = vmatpush3.bf16.msra.mxu0 %v4203_v41  ;;  %v4191_v41 = vpack.c.bf16 %v1920_v34, %v1919_v31  ;;  %v4223_v48 = vpack.c.bf16 %v1952_v39, %v1951_v38  ;;  %v1987_v54 = vld [vmem:[%s6876_s5 + $0x280] sm:$0xff] }
 0x1ab   :  { %4206 = vmatprep.subr.bf16.mxu0 %v4205_v50  ;;  %v1953_v50 = vld [vmem:[%s6876_s5 + $0x170] sm:$0xff]  ;;  %v2019_v57 = vld [vmem:[%s6876_s5 + $0x380] sm:$0xff] }
 0x1b7   :  { %v3711_v1 = vpop.f32.mrb[48].mxu0 }
 0x1b8   :  { %v6009_v2 = vadd.f32 %v3711_v1, %v1541_v53  ;;  %v1620_v3 = vpop.f32.mrb[49].mxu0  ;;  %v4207_v53 = vpack.c.bf16 %v1944_v52, %v1943_v51  ;;  %v1931_v1 = vld [vmem:[%s6876_s5 + $0xc0] sm:$0xff]  ;;  %v1954_v51 = vld [vmem:[%s6876_s5 + $0x178] sm:$0xff] }
 0x1b9   :  { %v6011_v4 = vadd.f32 %v1620_v3, %v1536_v45  ;;  %v1911_v45 = vld [vmem:[%s6876_s5 + $0x20] sm:$0xff] }
 0x1ba   :  { %v1715_v11 = vmul.f32 %v6009_v2, %v6009_v2  ;;  %v4175_v47 = vpack.c.bf16 %v1912_v46, %v1911_v45  ;;  %4208 = vmatpush3.bf16.msra.mxu0 %v4207_v53  ;;  %v1922_v45 = vld [vmem:[%s6876_s5 + $0x78] sm:$0xff]  ;;  %v1969_v46 = vld [vmem:[%s6876_s5 + $0x1f0] sm:$0xff]  ;;  %v4227_v53 = vpack.c.bf16 %v1954_v51, %v1953_v50 }
 0x1bb   :  { %v4154_v5 = vpack.c.bf16 %v6009_v2, %v6011_v4  ;;  %v3714_v6 = vpop.f32.mrb[50].mxu0  ;;  %v1714_v12 = vmul.f32 %v6011_v4, %v6011_v4  ;;  %v4195_v52 = vpack.c.bf16 %v1922_v45, %v1921_v43 }
 0x1bc   :  { %v6015_v8 = vadd.f32 %v3714_v6, %v1551_v0  ;;  %v1630_v9 = vpop.f32.mrb[51].mxu0  ;;  %v1946_v0 = vld [vmem:[%s6876_s5 + $0x138] sm:$0xff]  ;;  %v1915_v6 = vld [vmem:[%s6876_s5 + $0x40] sm:$0xff] }
 0x1bd   :  { %v6017_v10 = vadd.f32 %v1630_v9, %v1546_v61  ;;  %4155 = vmatpush3.bf16.msra.mxu1 %v4154_v5  ;;  %v4160_v14 = vpack.c.bf16 %v1715_v11, %v1714_v12  ;;  %v1962_v61 = vld [vmem:[%s6876_s5 + $0x1b8] sm:$0xff]  ;;  %v4211_v3 = vpack.c.bf16 %v1946_v0, %v1945_v63  ;;  %v1932_v5 = vld [vmem:[%s6876_s5 + $0xc8] sm:$0xff] }
 0x1be   :  { %4156 = vmatprep.subr.bf16.mxu1 %v4457_v7  ;;  %v1717_v15 = vmul.f32 %v6015_v8, %v6015_v8  ;;  %v4209_v62 = vpack.c.bf16 %v1962_v61, %v1961_v60  ;;  %v1916_v9 = vld [vmem:[%s6876_s5 + $0x48] sm:$0xff]  ;;  %v4181_v11 = vpack.c.bf16 %v1932_v5, %v1931_v1  ;;  %v1791_v1 = vlaneseq }
 0x1bf   :  { %v4157_v13 = vpack.c.bf16 %v6015_v8, %v6017_v10  ;;  %v1716_v16 = vmul.f32 %v6017_v10, %v6017_v10  ;;  %v4183_v12 = vpack.c.bf16 %v1916_v9, %v1915_v6 }
 0x1c0   :  { %4210 = vmatprep.subr.bf16.mxu0 %v4209_v62  ;;  %v6238_v9 = vshrl.u32 %v1791_v1, 7 }
 0x1c1   :  { %4158 = vmatpush3.bf16.msra.mxu1 %v4157_v13  ;;  %v4163_v18 = vpack.c.bf16 %v1717_v15, %v1716_v16  ;;  %v1963_v13 = vld [vmem:[%s6876_s5 + $0x1c0] sm:$0xff]  ;;  %4212 = vmatpush3.bf16.msra.mxu0 %v4211_v3 }
 0x1c2   :  { %4159 = vmatprep.subr.bf16.mxu1 %v4457_v7  ;;  %v1947_v15 = vld [vmem:[%s6876_s5 + $0x140] sm:$0xff] }
 0x1c4   :  { %3724 = vmatmul.mubr.msk.f32.vlgmr.msra.gmra.mrb[48].mxu1 %vm1639_vm1, %v4460_v17 }
 0x1c5   :  { %4161 = vmatpush3.bf16.msra.mxu1 %v4160_v14  ;;  %3734 = vmatprep.mubr.msk.f32.mxu1 %vm4458_vm0, %v4459_v20  ;;  %v1964_v14 = vld [vmem:[%s6876_s5 + $0x1c8] sm:$0xff] }
 0x1c6   :  { %4162 = vmatprep.subr.bf16.mxu1 %v4457_v7  ;;  %v1908_v7 = vld [vmem:[%s6876_s5 + $0x8] sm:$0xff]  ;;  %v4213_v16 = vpack.c.bf16 %v1964_v14, %v1963_v13 }
 0x1c7   :  { %v4167_v20 = vpack.c.bf16 %v1908_v7, %v1907_v23  ;;  %v1917_v23 = vld [vmem:[%s6876_s5 + $0x50] sm:$0xff]  ;;  %v1918_v7 = vld [vmem:[%s6876_s5 + $0x58] sm:$0xff] }
 0x1c8   :  { %4214 = vmatprep.subr.bf16.mxu0 %v4213_v16  ;;  %v4187_v24 = vpack.c.bf16 %v1918_v7, %v1917_v23 }
 0x1c9   :  { %4164 = vmatpush3.bf16.msra.mxu1 %v4163_v18  ;;  %v1933_v18 = vld [vmem:[%s6876_s5 + $0xd0] sm:$0xff] }
 0x1ca   :  { %4166 = vmatprep.subr.bf16.mxu1 %v4165_v22  ;;  %v4185_v22 = vpack.c.bf16 %v1934_v19, %v1933_v18 }
 0x1cc   :  { %3735 = vmatmul.mubr.msk.f32.vlgmr.msra.gmra.mrb[50].mxu1 %vm1639_vm1, %v4460_v17  ;;  %v1948_v17 = vld [vmem:[%s6876_s5 + $0x148] sm:$0xff] }
 0x1cd   :  { %4168 = vmatpush3.bf16.msra.mxu1 %v4167_v20  ;;  %v4215_v21 = vpack.c.bf16 %v1948_v17, %v1947_v15  ;;  %v1965_v20 = vld [vmem:[%s6876_s5 + $0x1d0] sm:$0xff] }
 0x1ce   :  { %4170 = vmatprep.subr.bf16.mxu1 %v4169_v32  ;;  %v4217_v28 = vpack.c.bf16 %v1966_v25, %v1965_v20  ;;  %v4219_v32 = vpack.c.bf16 %v1950_v27, %v1949_v26 }
 0x1cf   :  { %4216 = vmatpush3.bf16.msra.mxu0 %v4215_v21  ;;  %v2836_v21 = vld [vmem:[%s6874_s3] ss:$0 sm:$0xff] }
 0x1d0   :  { %4218 = vmatprep.subr.bf16.mxu0 %v4217_v28 }
 0x1d1   :  { %4172 = vmatpush3.bf16.msra.mxu1 %v4171_v35  ;;  %v1967_v35 = vld [vmem:[%s6876_s5 + $0x1e0] sm:$0xff] }
 0x1d2   :  { %4174 = vmatprep.subr.bf16.mxu1 %v4173_v44  ;;  %v4221_v37 = vpack.c.bf16 %v1968_v36, %v1967_v35  ;;  %v4193_v44 = vpack.c.bf16 %v1938_v42, %v1937_v40 }
 0x1d3   :  { %4220 = vmatpush3.bf16.msra.mxu0 %v4219_v32 }
 0x1d4   :  { %4222 = vmatprep.subr.bf16.mxu0 %v4221_v37 }
 0x1d5   :  { %4176 = vmatpush3.bf16.msra.mxu1 %v4175_v47  ;;  %v1970_v47 = vld [vmem:[%s6876_s5 + $0x1f8] sm:$0xff] }
 0x1d6   :  { %4178 = vmatprep.subr.bf16.mxu1 %v4177_v56  ;;  %v4225_v49 = vpack.c.bf16 %v1970_v47, %v1969_v46  ;;  %v4229_v56 = vpack.c.bf16 %v1988_v55, %v1987_v54 }
 0x1d7   :  { %4224 = vmatpush3.bf16.msra.mxu0 %v4223_v48 }
 0x1d8   :  { %4226 = vmatprep.subr.bf16.mxu0 %v4225_v49 }
 0x1d9   :  { %4180 = vmatpush3.bf16.msra.mxu1 %v4179_v59  ;;  %v4261_v59 = vpack.c.bf16 %v2020_v58, %v2019_v57 }
 0x1da   :  { %4182 = vmatprep.subr.bf16.mxu1 %v4181_v11 }
 0x1db   :  { %4228 = vmatpush3.bf16.msra.mxu0 %v4227_v53 }
 0x1dc   :  { %4262 = vmatprep.subr.bf16.mxu0 %v4261_v59 }
 0x1dd   :  { %4184 = vmatpush3.bf16.msra.mxu1 %v4183_v12  ;;  %v1793_v12 = vsub.s32 0, %v6238_v9 }
 0x1de   :  { %4186 = vmatprep.subr.bf16.mxu1 %v4185_v22 }
 0x1e1   :  { %4188 = vmatpush3.bf16.msra.mxu1 %v4187_v24  ;;  %v2837_v24 = vld [vmem:[%s6875_s4] ss:$0 sm:$0xff] }
 0x1e2   :  { %4190 = vmatprep.subr.bf16.mxu1 %v4189_v33  ;;  %v4461_v33 = vmov 1983009808  }
 0x1e3   :  { %v2176_v34 = vunpack.c.l.s4 %v4461_v33  ;;  %v2006_v33 = vld [vmem:[%s6876_s5 + $0x318] sm:$0xff] }
 0x1e5   :  { %4192 = vmatpush3.bf16.msra.mxu1 %v4191_v41 }
 0x1e6   :  { %4194 = vmatprep.subr.bf16.mxu1 %v4193_v44  ;;  %v2177_v44 = vunpack.c.0.s8 %v2176_v34 }
 0x1e8   :  { %v6252_v57 = vsub.s32 %v2177_v44, %v6238_v9 }
 0x1e9   :  { %4196 = vmatpush3.bf16.msra.mxu1 %v4195_v52 }
 0x1ea   :  { %4230 = vmatprep.subr.bf16.mxu1 %v4229_v56 }
 0x297   :  { %v1709_v60 = vpop.f32.mrb[48].mxu1 }
 0x298   :  { %v3725_v61 = vpop.f32.mrb[49].mxu1  ;;  %v1713_v62 = vmul.f32 0.03125, %v1709_v60 }
 0x299   :  { %v1971_v61 = vld [vmem:[%s6876_s5 + $0x200] sm:$0xff] }
 0x29a   :  { %v1789_v0 = vmul.f32 %v1713_v62, %v1713_v62  ;;  %v1794_v13 = vrot.slane %v1713_v62, %v1793_v12  ;;  %v1972_v62 = vld [vmem:[%s6876_s5 + $0x208] sm:$0xff] }
 0x29c   :  { %v1795_v15 = vsub.f32 %v6011_v4, %v1794_v13  ;;  %v1796_v16 = vsub.f32 %v6009_v2, %v1794_v13  ;;  %v1797_v17 = vsub.f32 %v6017_v10, %v1794_v13  ;;  %v1798_v18 = vsub.f32 %v6015_v8, %v1794_v13 }
 0x29f   :  { %v1784_v63 = vpop.f32.mrb[50].mxu1 }
 0x2a0   :  { %v1788_v3 = vmul.f32 0.03125, %v1784_v63  ;;  %v3736_v5 = vpop.f32.mrb[51].mxu1 }
 0x2a2   :  { %v1790_v6 = vsub.f32 %v1788_v3, %v1789_v0 }
 0x2a4   :  { %v1799_v11 = vadd.f32 1e-05, %v1790_v6 }
 0x2a6   :  { %4431 = vrsqrt.f32 %v1799_v11 }
 0x2b0   :  { %v4432_v14 = vpop.eup %4431 }
 0x2b1   :  { %v1804_v19 = vrot.slane %v4432_v14, %v1793_v12 }
 0x2b3   :  { %v1805_v22 = vmul.f32 %v1804_v19, %v1795_v15  ;;  %v1806_v23 = vmul.f32 %v1804_v19, %v1796_v16  ;;  %v1807_v7 = vmul.f32 %v1804_v19, %v1797_v17  ;;  %v1808_v20 = vmul.f32 %v1804_v19, %v1798_v18  ;;  %v2003_v15 = vld [vmem:[%s6876_s5 + $0x300] sm:$0xff]  ;;  %v2004_v16 = vld [vmem:[%s6876_s5 + $0x308] sm:$0xff]  ;;  %v1989_v17 = vld [vmem:[%s6876_s5 + $0x290] sm:$0xff] }
 0x2b4   :  { %v1990_v18 = vld [vmem:[%s6876_s5 + $0x298] sm:$0xff] }
 0x2b5   :  { %v1816_v4 = vmul.f32 %v2836_v21, %v1805_v22  ;;  %v1817_v25 = vmul.f32 %v2836_v21, %v1806_v23  ;;  %v1818_v2 = vmul.f32 %v2836_v21, %v1807_v7  ;;  %v1819_v26 = vmul.f32 %v2836_v21, %v1808_v20  ;;  %v2021_v7 = vld [vmem:[%s6876_s5 + $0x390] sm:$0xff]  ;;  %v2022_v20 = vld [vmem:[%s6876_s5 + $0x398] sm:$0xff] }
 0x2b6   :  { %v4231_v21 = vpack.c.bf16 %v1972_v62, %v1971_v61  ;;  %v2027_v61 = vld [vmem:[%s6876_s5 + $0x3c0] sm:$0xff]  ;;  %v2028_v62 = vld [vmem:[%s6876_s5 + $0x3c8] sm:$0xff] }
 0x2b7   :  { %v1827_v10 = vadd.f32 %v2837_v24, %v1816_v4  ;;  %v1828_v27 = vadd.f32 %v2837_v24, %v1817_v25  ;;  %v1829_v8 = vadd.f32 %v2837_v24, %v1818_v2  ;;  %v1830_v28 = vadd.f32 %v2837_v24, %v1819_v26  ;;  %v1973_v25 = vld [vmem:[%s6876_s5 + $0x210] sm:$0xff]  ;;  %v1974_v2 = vld [vmem:[%s6876_s5 + $0x218] sm:$0xff] }
 0x2b8   :  { %v4235_v34 = vpack.c.bf16 %v1974_v2, %v1973_v25  ;;  %v2031_v25 = vld [vmem:[%s6876_s5 + $0x3e0] sm:$0xff]  ;;  %v2032_v2 = vld [vmem:[%s6876_s5 + $0x3e8] sm:$0xff] }
 0x2b9   :  { %v1831_v29 = vmul.f32 %v1827_v10, %v1827_v10  ;;  %v1832_v30 = vmul.f32 %v1828_v27, %v1828_v27  ;;  %v1833_v31 = vmul.f32 %v1829_v8, %v1829_v8  ;;  %v1834_v32 = vmul.f32 %v1830_v28, %v1830_v28  ;;  %v1991_v8 = vld [vmem:[%s6876_s5 + $0x2a0] sm:$0xff]  ;;  %v1992_v28 = vld [vmem:[%s6876_s5 + $0x2a8] sm:$0xff] }
 0x2ba   :  { %v4263_v10 = vpack.c.bf16 %v2004_v16, %v2003_v15  ;;  %v4233_v27 = vpack.c.bf16 %v1990_v18, %v1989_v17  ;;  %v2030_v15 = vld [vmem:[%s6876_s5 + $0x3d8] sm:$0xff]  ;;  %v1981_v17 = vld [vmem:[%s6876_s5 + $0x250] sm:$0xff] }
 0x2bb   :  { %1835 = vst [vmem:[#allocation2] sm:$0xff] %v1831_v29  ;;  %1836 = vst [vmem:[#allocation2 + $0x8] sm:$0xff] %v1832_v30  ;;  %v1982_v18 = vld [vmem:[%s6876_s5 + $0x258] sm:$0xff] }
 0x2bc   :  { %1837 = vst [vmem:[#allocation2 + $0x10] sm:$0xff] %v1833_v31  ;;  %1838 = vst [vmem:[#allocation2 + $0x18] sm:$0xff] %v1834_v32  ;;  %v4265_v31 = vpack.c.bf16 %v2022_v20, %v2021_v7  ;;  %v2005_v32 = vld [vmem:[%s6876_s5 + $0x310] sm:$0xff]  ;;  %v2014_v20 = vld [vmem:[%s6876_s5 + $0x358] sm:$0xff] }
 0x2bd   :  { %v2013_v7 = vld [vmem:[%s6876_s5 + $0x350] sm:$0xff] }
 0x2c2   :  { %v1839_v35 = vld [vmem:[#allocation2] sm:$0x1]  ;;  %v1841_v36 = vld [vmem:[#allocation2 + $0x1] sm:$0x1]  ;;  %v1843_v37 = vld [vmem:[#allocation2 + $0x2] sm:$0x1] }
 0x2c3   :  { %1840 = vst [vmem:[#allocation3] sm:$0x1] %v1839_v35  ;;  %1842 = vst [vmem:[#allocation3 + $0x2] sm:$0x1] %v1841_v36  ;;  %v1845_v38 = vld [vmem:[#allocation2 + $0x3] sm:$0x1] }
 0x2c4   :  { %1844 = vst [vmem:[#allocation3 + $0x4] sm:$0x1] %v1843_v37  ;;  %v1871_v39 = vld [vmem:[#allocation2 + $0x10] sm:$0x1]  ;;  %v1873_v40 = vld [vmem:[#allocation2 + $0x11] sm:$0x1] }
 0x2c5   :  { %1846 = vst [vmem:[#allocation3 + $0x6] sm:$0x1] %v1845_v38  ;;  %1872 = vst [vmem:[#allocation3 + $0x1] sm:$0x1] %v1871_v39  ;;  %v1875_v41 = vld [vmem:[#allocation2 + $0x12] sm:$0x1]  ;;  %v4237_v38 = vpack.c.bf16 %v1992_v28, %v1991_v8  ;;  %v4283_v8 = vpack.c.bf16 %v2014_v20, %v2013_v7 }
 0x2c6   :  { %1874 = vst [vmem:[#allocation3 + $0x3] sm:$0x1] %v1873_v40  ;;  %v1877_v42 = vld [vmem:[#allocation2 + $0x13] sm:$0x1]  ;;  %v1847_v43 = vld [vmem:[#allocation2 + $0x4] sm:$0x1] }
 0x2c7   :  { %1876 = vst [vmem:[#allocation3 + $0x5] sm:$0x1] %v1875_v41  ;;  %1878 = vst [vmem:[#allocation3 + $0x7] sm:$0x1] %v1877_v42  ;;  %v1849_v45 = vld [vmem:[#allocation2 + $0x5] sm:$0x1]  ;;  %v4267_v41 = vpack.c.bf16 %v2006_v33, %v2005_v32 }
 0x2c8   :  { %1848 = vst [vmem:[#allocation3 + $0x8] sm:$0x1] %v1847_v43  ;;  %v1851_v46 = vld [vmem:[#allocation2 + $0x6] sm:$0x1]  ;;  %v1853_v47 = vld [vmem:[#allocation2 + $0x7] sm:$0x1] }
 0x2c9   :  { %1850 = vst [vmem:[#allocation3 + $0xa] sm:$0x1] %v1849_v45  ;;  %1852 = vst [vmem:[#allocation3 + $0xc] sm:$0x1] %v1851_v46  ;;  %v1879_v48 = vld [vmem:[#allocation2 + $0x14] sm:$0x1] }
 0x2ca   :  { %1854 = vst [vmem:[#allocation3 + $0xe] sm:$0x1] %v1853_v47  ;;  %v1881_v49 = vld [vmem:[#allocation2 + $0x15] sm:$0x1]  ;;  %v1883_v50 = vld [vmem:[#allocation2 + $0x16] sm:$0x1] }
 0x2cb   :  { %1880 = vst [vmem:[#allocation3 + $0x9] sm:$0x1] %v1879_v48  ;;  %1882 = vst [vmem:[#allocation3 + $0xb] sm:$0x1] %v1881_v49  ;;  %v1885_v51 = vld [vmem:[#allocation2 + $0x17] sm:$0x1] }
 0x2cc   :  { %1884 = vst [vmem:[#allocation3 + $0xd] sm:$0x1] %v1883_v50  ;;  %v1855_v52 = vld [vmem:[#allocation2 + $0x8] sm:$0x1]  ;;  %v1857_v53 = vld [vmem:[#allocation2 + $0x9] sm:$0x1] }
 0x2cd   :  { %1886 = vst [vmem:[#allocation3 + $0xf] sm:$0x1] %v1885_v51  ;;  %1856 = vst [vmem:[#allocation3 + $0x10] sm:$0x1] %v1855_v52  ;;  %v1859_v54 = vld [vmem:[#allocation2 + $0xa] sm:$0x1] }
 0x2ce   :  { %1858 = vst [vmem:[#allocation3 + $0x12] sm:$0x1] %v1857_v53  ;;  %v1861_v55 = vld [vmem:[#allocation2 + $0xb] sm:$0x1]  ;;  %v1887_v56 = vld [vmem:[#allocation2 + $0x18] sm:$0x1] }
 0x2cf   :  { %1860 = vst [vmem:[#allocation3 + $0x14] sm:$0x1] %v1859_v54  ;;  %1862 = vst [vmem:[#allocation3 + $0x16] sm:$0x1] %v1861_v55  ;;  %v1889_v58 = vld [vmem:[#allocation2 + $0x19] sm:$0x1] }
 0x2d0   :  { %1888 = vst [vmem:[#allocation3 + $0x11] sm:$0x1] %v1887_v56  ;;  %v1891_v59 = vld [vmem:[#allocation2 + $0x1a] sm:$0x1]  ;;  %v1893_v60 = vld [vmem:[#allocation2 + $0x1b] sm:$0x1] }
 0x2d1   :  { %1890 = vst [vmem:[#allocation3 + $0x13] sm:$0x1] %v1889_v58  ;;  %1892 = vst [vmem:[#allocation3 + $0x15] sm:$0x1] %v1891_v59  ;;  %v1863_v63 = vld [vmem:[#allocation2 + $0xc] sm:$0x1] }
 0x2d2   :  { %1894 = vst [vmem:[#allocation3 + $0x17] sm:$0x1] %v1893_v60  ;;  %v1865_v0 = vld [vmem:[#allocation2 + $0xd] sm:$0x1]  ;;  %v1867_v1 = vld [vmem:[#allocation2 + $0xe] sm:$0x1] }
 0x2d3   :  { %1864 = vst [vmem:[#allocation3 + $0x18] sm:$0x1] %v1863_v63  ;;  %1866 = vst [vmem:[#allocation3 + $0x1a] sm:$0x1] %v1865_v0  ;;  %v1869_v3 = vld [vmem:[#allocation2 + $0xf] sm:$0x1] }
 0x2d4   :  { %1868 = vst [vmem:[#allocation3 + $0x1c] sm:$0x1] %v1867_v1  ;;  %v1895_v5 = vld [vmem:[#allocation2 + $0x1c] sm:$0x1]  ;;  %v1897_v6 = vld [vmem:[#allocation2 + $0x1d] sm:$0x1] }
 0x2d5   :  { %v1903_v9 = vld [vmem:[#allocation3] sm:$0xff]  ;;  %1870 = vst [vmem:[#allocation3 + $0x1e] sm:$0x1] %v1869_v3  ;;  %1896 = vst [vmem:[#allocation3 + $0x19] sm:$0x1] %v1895_v5  ;;  %v1904_v23 = vld [vmem:[#allocation3 + $0x8] sm:$0xff] }
 0x2d6   :  { %1898 = vst [vmem:[#allocation3 + $0x1b] sm:$0x1] %v1897_v6  ;;  %v1899_v11 = vld [vmem:[#allocation2 + $0x1e] sm:$0x1]  ;;  %v1901_v12 = vld [vmem:[#allocation2 + $0x1f] sm:$0x1]  ;;  %v2181_v13 = vrot.slane %v1903_v9, %v6252_v57  ;;  %v2174_v14 = vcombine.high %v1903_v9, %v1903_v9  ;;  %v6281_v24 = vrot.slane %v1904_v23, %v6252_v57  ;;  %v2191_v4 = vcombine.high %v1904_v23, %v1904_v23 }
 0x2d7   :  { %1900 = vst [vmem:[#allocation3 + $0x1d] sm:$0x1] %v1899_v11  ;;  %1902 = vst [vmem:[#allocation3 + $0x1f] sm:$0x1] %v1901_v12  ;;  %v2023_v35 = vld [vmem:[%s6876_s5 + $0x3a0] sm:$0xff]  ;;  %v2024_v36 = vld [vmem:[%s6876_s5 + $0x3a8] sm:$0xff]  ;;  %v4277_v9 = vpack.c.bf16 %v2028_v62, %v2027_v61 }
 0x2d8   :  { %v2189_v19 = vcombine.high %v2181_v13, %v2181_v13  ;;  %v2188_v22 = vrot.slane %v2174_v14, %v6252_v57  ;;  %v2206_v29 = vcombine.high %v6281_v24, %v6281_v24  ;;  %v6298_v30 = vrot.slane %v2191_v4, %v6252_v57  ;;  %v1975_v39 = vld [vmem:[%s6876_s5 + $0x220] sm:$0xff]  ;;  %v1976_v40 = vld [vmem:[%s6876_s5 + $0x228] sm:$0xff]  ;;  %v1993_v42 = vld [vmem:[%s6876_s5 + $0x2b0] sm:$0xff] }
 0x2d9   :  { %v1994_v43 = vld [vmem:[%s6876_s5 + $0x2b8] sm:$0xff]  ;;  %v4269_v44 = vpack.c.bf16 %v2024_v36, %v2023_v35  ;;  %v2007_v45 = vld [vmem:[%s6876_s5 + $0x320] sm:$0xff]  ;;  %v2008_v46 = vld [vmem:[%s6876_s5 + $0x328] sm:$0xff]  ;;  %v4239_v47 = vpack.c.bf16 %v1976_v40, %v1975_v39  ;;  %v4251_v4 = vpack.c.bf16 %v1982_v18, %v1981_v17 }
 0x2da   :  { %2322 = vmatprep.mubr.f32.mxu1 %v2189_v19  ;;  %v2190_v26 = vcombine.high %v2188_v22, %v2188_v22  ;;  %v2207_v37 = vcombine.high %v6298_v30, %v6298_v30  ;;  %v2025_v48 = vld [vmem:[%s6876_s5 + $0x3b0] sm:$0xff]  ;;  %v2026_v49 = vld [vmem:[%s6876_s5 + $0x3b8] sm:$0xff]  ;;  %v4241_v50 = vpack.c.bf16 %v1994_v43, %v1993_v42  ;;  %v4271_v53 = vpack.c.bf16 %v2008_v46, %v2007_v45  ;;  %v1995_v54 = vld [vmem:[%s6876_s5 + $0x2c0] sm:$0xff] }
 0x2db   :  { %2323 = vmatmul.mubr.f32.vlgmr.msra.gmra.mrb[52].mxu1 %v2181_v13  ;;  %v1977_v51 = vld [vmem:[%s6876_s5 + $0x230] sm:$0xff]  ;;  %v1978_v52 = vld [vmem:[%s6876_s5 + $0x238] sm:$0xff]  ;;  %v1996_v55 = vld [vmem:[%s6876_s5 + $0x2c8] sm:$0xff]  ;;  %v4273_v56 = vpack.c.bf16 %v2026_v49, %v2025_v48 }
 0x2dc   :  { %4232 = vmatpush3.bf16.msra.mxu1 %v4231_v21  ;;  %2392 = vmatprep.mubr.f32.mxu0 %v2190_v26  ;;  %v2009_v58 = vld [vmem:[%s6876_s5 + $0x330] sm:$0xff]  ;;  %v2010_v59 = vld [vmem:[%s6876_s5 + $0x338] sm:$0xff]  ;;  %v4243_v60 = vpack.c.bf16 %v1978_v52, %v1977_v51  ;;  %v4245_v63 = vpack.c.bf16 %v1996_v55, %v1995_v54  ;;  %v1979_v0 = vld [vmem:[%s6876_s5 + $0x240] sm:$0xff] }
 0x2dd   :  { %2462 = vmatprep.mubr.f32.mxu1 %v2206_v29  ;;  %2393 = vmatmul.mubr.f32.vlgmr.msra.gmra.mrb[52].mxu0 %v2188_v22  ;;  %v1980_v1 = vld [vmem:[%s6876_s5 + $0x248] sm:$0xff]  ;;  %v4275_v3 = vpack.c.bf16 %v2010_v59, %v2009_v58  ;;  %v1997_v5 = vld [vmem:[%s6876_s5 + $0x2d0] sm:$0xff]  ;;  %v1998_v6 = vld [vmem:[%s6876_s5 + $0x2d8] sm:$0xff] }
 0x2de   :  { %4264 = vmatpush3.bf16.msra.mxu0 %v4263_v10  ;;  %4234 = vmatprep.subr.bf16.mxu1 %v4233_v27  ;;  %v2011_v11 = vld [vmem:[%s6876_s5 + $0x340] sm:$0xff]  ;;  %v2012_v12 = vld [vmem:[%s6876_s5 + $0x348] sm:$0xff]  ;;  %v4247_v13 = vpack.c.bf16 %v1980_v1, %v1979_v0  ;;  %v2029_v14 = vld [vmem:[%s6876_s5 + $0x3d0] sm:$0xff]  ;;  %v4249_v16 = vpack.c.bf16 %v1998_v6, %v1997_v5 }
 0x2df   :  { %2532 = vmatprep.mubr.f32.mxu0 %v2207_v37  ;;  %4266 = vmatprep.subr.bf16.mxu0 %v4265_v31  ;;  %v4279_v19 = vpack.c.bf16 %v2012_v12, %v2011_v11  ;;  %v1999_v21 = vld [vmem:[%s6876_s5 + $0x2e0] sm:$0xff]  ;;  %v2000_v22 = vld [vmem:[%s6876_s5 + $0x2e8] sm:$0xff]  ;;  %v4281_v23 = vpack.c.bf16 %v2030_v15, %v2029_v14  ;;  %v2001_v28 = vld [vmem:[%s6876_s5 + $0x2f0] sm:$0xff]  ;;  %v4285_v31 = vpack.c.bf16 %v2032_v2, %v2031_v25 }
 0x2e0   :  { %4236 = vmatpush3.bf16.msra.mxu1 %v4235_v34  ;;  %v4253_v26 = vpack.c.bf16 %v2000_v22, %v1999_v21  ;;  %v1983_v10 = vld [vmem:[%s6876_s5 + $0x260] sm:$0xff]  ;;  %v1984_v27 = vld [vmem:[%s6876_s5 + $0x268] sm:$0xff]  ;;  %v2002_v29 = vld [vmem:[%s6876_s5 + $0x2f8] sm:$0xff] }
 0x2e1   :  { %4238 = vmatprep.subr.bf16.mxu1 %v4237_v38  ;;  %v2015_v32 = vld [vmem:[%s6876_s5 + $0x360] sm:$0xff]  ;;  %v2016_v33 = vld [vmem:[%s6876_s5 + $0x368] sm:$0xff]  ;;  %v4255_v34 = vpack.c.bf16 %v1984_v27, %v1983_v10  ;;  %v2033_v35 = vld [vmem:[%s6876_s5 + $0x3f0] sm:$0xff]  ;;  %v4257_v37 = vpack.c.bf16 %v2002_v29, %v2001_v28 }
 0x2e2   :  { %4268 = vmatpush3.bf16.msra.mxu0 %v4267_v41  ;;  %v2034_v36 = vld [vmem:[%s6876_s5 + $0x3f8] sm:$0xff]  ;;  %v1985_v38 = vld [vmem:[%s6876_s5 + $0x270] sm:$0xff]  ;;  %v4287_v41 = vpack.c.bf16 %v2016_v33, %v2015_v32  ;;  %v2051_v42 = vld [vmem:[%s6876_s5 + $0x480] sm:$0xff] }
 0x2e3   :  { %4270 = vmatprep.subr.bf16.mxu0 %v4269_v44  ;;  %v1986_v39 = vld [vmem:[%s6876_s5 + $0x278] sm:$0xff]  ;;  %v1905_v40 = vld [vmem:[#allocation3 + $0x10] sm:$0xff]  ;;  %v2052_v43 = vld [vmem:[%s6876_s5 + $0x488] sm:$0xff]  ;;  %v4289_v44 = vpack.c.bf16 %v2034_v36, %v2033_v35 }
 0x2e4   :  { %4240 = vmatpush3.bf16.msra.mxu1 %v4239_v47  ;;  %v2017_v45 = vld [vmem:[%s6876_s5 + $0x370] sm:$0xff]  ;;  %v2018_v46 = vld [vmem:[%s6876_s5 + $0x378] sm:$0xff]  ;;  %v4259_v47 = vpack.c.bf16 %v1986_v39, %v1985_v38  ;;  %v2083_v48 = vld [vmem:[%s6876_s5 + $0x580] sm:$0xff]  ;;  %v4293_v51 = vpack.c.bf16 %v2052_v43, %v2051_v42  ;;  %v6465_v55 = vrot.slane %v1905_v40, %v6252_v57 }
 0x2e5   :  { %4242 = vmatprep.subr.bf16.mxu1 %v4241_v50  ;;  %v2084_v49 = vld [vmem:[%s6876_s5 + $0x588] sm:$0xff]  ;;  %v2208_v50 = vcombine.high %v1905_v40, %v1905_v40  ;;  %v2035_v52 = vld [vmem:[%s6876_s5 + $0x400] sm:$0xff]  ;;  %v4291_v54 = vpack.c.bf16 %v2018_v46, %v2017_v45  ;;  %v2054_v58 = vld [vmem:[%s6876_s5 + $0x498] sm:$0xff] }
 0x2e6   :  { %4272 = vmatpush3.bf16.msra.mxu0 %v4271_v53  ;;  %v2036_v53 = vld [vmem:[%s6876_s5 + $0x408] sm:$0xff]  ;;  %v4325_v59 = vpack.c.bf16 %v2084_v49, %v2083_v48  ;;  %v2085_v0 = vld [vmem:[%s6876_s5 + $0x590] sm:$0xff]  ;;  %v2086_v1 = vld [vmem:[%s6876_s5 + $0x598] sm:$0xff] }
 0x2e7   :  { %4274 = vmatprep.subr.bf16.mxu0 %v4273_v56  ;;  %v2053_v56 = vld [vmem:[%s6876_s5 + $0x490] sm:$0xff]  ;;  %v2068_v61 = vld [vmem:[%s6876_s5 + $0x508] sm:$0xff]  ;;  %v4295_v62 = vpack.c.bf16 %v2036_v53, %v2035_v52  ;;  %v2038_v6 = vld [vmem:[%s6876_s5 + $0x418] sm:$0xff]  ;;  %v4329_v14 = vpack.c.bf16 %v2086_v1, %v2085_v0 }
 0x2e8   :  { %4244 = vmatpush3.bf16.msra.mxu1 %v4243_v60  ;;  %v2067_v60 = vld [vmem:[%s6876_s5 + $0x500] sm:$0xff]  ;;  %v2037_v5 = vld [vmem:[%s6876_s5 + $0x410] sm:$0xff]  ;;  %v2072_v2 = vld [vmem:[%s6876_s5 + $0x528] sm:$0xff] }
 0x2e9   :  { %4246 = vmatprep.subr.bf16.mxu1 %v4245_v63  ;;  %v6480_v63 = vrot.slane %v2208_v50, %v6252_v57  ;;  %v4327_v11 = vpack.c.bf16 %v2068_v61, %v2067_v60  ;;  %v2055_v12 = vld [vmem:[%s6876_s5 + $0x4a0] sm:$0xff]  ;;  %v2069_v15 = vld [vmem:[%s6876_s5 + $0x510] sm:$0xff]  ;;  %v4299_v18 = vpack.c.bf16 %v2038_v6, %v2037_v5  ;;  %v2090_v27 = vld [vmem:[%s6876_s5 + $0x5b8] sm:$0xff] }
 0x2ea   :  { %4276 = vmatpush3.bf16.msra.mxu0 %v4275_v3  ;;  %v4297_v3 = vpack.c.bf16 %v2054_v58, %v2053_v56  ;;  %v2039_v22 = vld [vmem:[%s6876_s5 + $0x420] sm:$0xff]  ;;  %v2057_v20 = vld [vmem:[%s6876_s5 + $0x4b0] sm:$0xff]  ;;  %v2042_v29 = vld [vmem:[%s6876_s5 + $0x438] sm:$0xff] }
 0x2eb   :  { %4278 = vmatprep.subr.bf16.mxu0 %v4277_v9  ;;  %v2223_v9 = vcombine.high %v6465_v55, %v6465_v55  ;;  %v2224_v17 = vcombine.high %v6480_v63, %v6480_v63  ;;  %v2071_v25 = vld [vmem:[%s6876_s5 + $0x520] sm:$0xff]  ;;  %v2089_v10 = vld [vmem:[%s6876_s5 + $0x5b0] sm:$0xff]  ;;  %v2060_v33 = vld [vmem:[%s6876_s5 + $0x4c8] sm:$0xff] }
 0x2ec   :  { %4248 = vmatpush3.bf16.msra.mxu1 %v4247_v13  ;;  %v2056_v13 = vld [vmem:[%s6876_s5 + $0x4a8] sm:$0xff]  ;;  %v2041_v28 = vld [vmem:[%s6876_s5 + $0x430] sm:$0xff]  ;;  %v2059_v32 = vld [vmem:[%s6876_s5 + $0x4c0] sm:$0xff] }
 0x2ed   :  { %4250 = vmatprep.subr.bf16.mxu1 %v4249_v16  ;;  %v2070_v16 = vld [vmem:[%s6876_s5 + $0x518] sm:$0xff]  ;;  %v4301_v21 = vpack.c.bf16 %v2056_v13, %v2055_v12  ;;  %v2073_v35 = vld [vmem:[%s6876_s5 + $0x530] sm:$0xff]  ;;  %v2091_v38 = vld [vmem:[%s6876_s5 + $0x5c0] sm:$0xff]  ;;  %v4309_v40 = vpack.c.bf16 %v2060_v33, %v2059_v32 }
 0x2ee   :  { %4280 = vmatpush3.bf16.msra.mxu0 %v4279_v19  ;;  %v2088_v19 = vld [vmem:[%s6876_s5 + $0x5a8] sm:$0xff]  ;;  %v4331_v7 = vpack.c.bf16 %v2070_v16, %v2069_v15  ;;  %v2074_v36 = vld [vmem:[%s6876_s5 + $0x538] sm:$0xff]  ;;  %v2093_v50 = vld [vmem:[%s6876_s5 + $0x5d0] sm:$0xff] }
 0x2ef   :  { %4282 = vmatprep.subr.bf16.mxu0 %v4281_v23  ;;  %v2040_v23 = vld [vmem:[%s6876_s5 + $0x428] sm:$0xff]  ;;  %v4339_v43 = vpack.c.bf16 %v2074_v36, %v2073_v35  ;;  %v2062_v45 = vld [vmem:[%s6876_s5 + $0x4d8] sm:$0xff]  ;;  %v2045_v53 = vld [vmem:[%s6876_s5 + $0x450] sm:$0xff] }
 0x2f0   :  { %4252 = vmatpush3.bf16.msra.mxu1 %v4251_v4  ;;  %v2092_v39 = vld [vmem:[%s6876_s5 + $0x5c8] sm:$0xff]  ;;  %v2063_v58 = vld [vmem:[%s6876_s5 + $0x4e0] sm:$0xff]  ;;  %v2077_v61 = vld [vmem:[%s6876_s5 + $0x550] sm:$0xff] }
 0x2f1   :  { %4254 = vmatprep.subr.bf16.mxu1 %v4253_v26  ;;  %v4303_v26 = vpack.c.bf16 %v2040_v23, %v2039_v22  ;;  %v2044_v42 = vld [vmem:[%s6876_s5 + $0x448] sm:$0xff]  ;;  %v4341_v46 = vpack.c.bf16 %v2092_v39, %v2091_v38  ;;  %v2095_v1 = vld [vmem:[%s6876_s5 + $0x5e0] sm:$0xff]  ;;  %v2065_v12 = vld [vmem:[%s6876_s5 + $0x4f0] sm:$0xff] }
 0x2f2   :  { %4284 = vmatpush3.bf16.msra.mxu0 %v4283_v8  ;;  %v2076_v48 = vld [vmem:[%s6876_s5 + $0x548] sm:$0xff]  ;;  %v2047_v6 = vld [vmem:[%s6876_s5 + $0x460] sm:$0xff]  ;;  %v2066_v13 = vld [vmem:[%s6876_s5 + $0x4f8] sm:$0xff] }
 0x2f3   :  { %4286 = vmatprep.subr.bf16.mxu0 %v4285_v31  ;;  %v4335_v31 = vpack.c.bf16 %v2072_v2, %v2071_v25  ;;  %v2079_v15 = vld [vmem:[%s6876_s5 + $0x560] sm:$0xff]  ;;  %v2080_v16 = vld [vmem:[%s6876_s5 + $0x568] sm:$0xff]  ;;  %v2050_v22 = vld [vmem:[%s6876_s5 + $0x478] sm:$0xff] }
 0x2f4   :  { %4256 = vmatpush3.bf16.msra.mxu1 %v4255_v34  ;;  %v4337_v34 = vpack.c.bf16 %v2090_v27, %v2089_v10  ;;  %v1906_v23 = vld [vmem:[#allocation3 + $0x18] sm:$0xff]  ;;  %v2081_v25 = vld [vmem:[%s6876_s5 + $0x570] sm:$0xff]  ;;  %v2147_v10 = vld [vmem:[%s6876_s5 + $0x780] sm:$0xff] }
 0x2f5   :  { %4258 = vmatprep.subr.bf16.mxu1 %v4257_v37  ;;  %v4307_v37 = vpack.c.bf16 %v2042_v29, %v2041_v28  ;;  %v2082_v2 = vld [vmem:[%s6876_s5 + $0x578] sm:$0xff]  ;;  %v2148_v27 = vld [vmem:[%s6876_s5 + $0x788] sm:$0xff]  ;;  %v2099_v29 = vld [vmem:[%s6876_s5 + $0x600] sm:$0xff]  ;;  %v6669_v33 = vrot.slane %v1906_v23, %v6252_v57 }
 0x2f6   :  { %4288 = vmatpush3.bf16.msra.mxu0 %v4287_v41  ;;  %v2043_v41 = vld [vmem:[%s6876_s5 + $0x440] sm:$0xff]  ;;  %v4355_v32 = vpack.c.bf16 %v2082_v2, %v2081_v25  ;;  %v2118_v35 = vld [vmem:[%s6876_s5 + $0x698] sm:$0xff]  ;;  %v4389_v36 = vpack.c.bf16 %v2148_v27, %v2147_v10  ;;  %v2132_v38 = vld [vmem:[%s6876_s5 + $0x708] sm:$0xff] }
 0x2f7   :  { %4290 = vmatprep.subr.bf16.mxu0 %v4289_v44  ;;  %v2061_v44 = vld [vmem:[%s6876_s5 + $0x4d0] sm:$0xff]  ;;  %v4311_v49 = vpack.c.bf16 %v2044_v42, %v2043_v41  ;;  %v2150_v42 = vld [vmem:[%s6876_s5 + $0x798] sm:$0xff]  ;;  %v2139_v2 = vld [vmem:[%s6876_s5 + $0x740] sm:$0xff] }
 0x2f8   :  { %4260 = vmatpush3.bf16.msra.mxu1 %v4259_v47  ;;  %v2075_v47 = vld [vmem:[%s6876_s5 + $0x540] sm:$0xff]  ;;  %v4313_v52 = vpack.c.bf16 %v2062_v45, %v2061_v44  ;;  %v2149_v41 = vld [vmem:[%s6876_s5 + $0x790] sm:$0xff]  ;;  %v2102_v45 = vld [vmem:[%s6876_s5 + $0x618] sm:$0xff] }
 0x2f9   :  { %4294 = vmatprep.subr.bf16.mxu1 %v4293_v51  ;;  %v2094_v51 = vld [vmem:[%s6876_s5 + $0x5d8] sm:$0xff]  ;;  %v4343_v56 = vpack.c.bf16 %v2076_v48, %v2075_v47  ;;  %v2101_v44 = vld [vmem:[%s6876_s5 + $0x610] sm:$0xff]  ;;  %v2119_v47 = vld [vmem:[%s6876_s5 + $0x6a0] sm:$0xff] }
 0x2fa   :  { %4292 = vmatpush3.bf16.msra.mxu0 %v4291_v54  ;;  %v2046_v54 = vld [vmem:[%s6876_s5 + $0x458] sm:$0xff]  ;;  %v4345_v60 = vpack.c.bf16 %v2094_v51, %v2093_v50  ;;  %v2120_v48 = vld [vmem:[%s6876_s5 + $0x6a8] sm:$0xff]  ;;  %v2133_v50 = vld [vmem:[%s6876_s5 + $0x710] sm:$0xff] }
 0x2fb   :  { %2463 = vmatmul.mubr.f32.vlgmr.msra.gmra.mrb[54].mxu1 %v6281_v24  ;;  %4326 = vmatprep.subr.bf16.mxu0 %v4325_v59  ;;  %v2087_v24 = vld [vmem:[%s6876_s5 + $0x5a0] sm:$0xff]  ;;  %v2064_v59 = vld [vmem:[%s6876_s5 + $0x4e8] sm:$0xff]  ;;  %v4315_v0 = vpack.c.bf16 %v2046_v54, %v2045_v53  ;;  %v2134_v51 = vld [vmem:[%s6876_s5 + $0x718] sm:$0xff]  ;;  %v4363_v53 = vpack.c.bf16 %v2102_v45, %v2101_v44 }
 0x2fc   :  { %4296 = vmatpush3.bf16.msra.mxu1 %v4295_v62  ;;  %2602 = vmatprep.mubr.f32.mxu1 %v2223_v9  ;;  %v4333_v4 = vpack.c.bf16 %v2088_v19, %v2087_v24  ;;  %v2078_v62 = vld [vmem:[%s6876_s5 + $0x558] sm:$0xff]  ;;  %v4317_v5 = vpack.c.bf16 %v2064_v59, %v2063_v58  ;;  %v2048_v9 = vld [vmem:[%s6876_s5 + $0x468] sm:$0xff]  ;;  %v4321_v19 = vpack.c.bf16 %v2066_v13, %v2065_v12  ;;  %v2103_v58 = vld [vmem:[%s6876_s5 + $0x620] sm:$0xff] }
 0x2fd   :  { %2533 = vmatmul.mubr.f32.vlgmr.msra.gmra.mrb[54].mxu0 %v6298_v30  ;;  %4298 = vmatprep.subr.bf16.mxu1 %v4297_v3  ;;  %v2058_v30 = vld [vmem:[%s6876_s5 + $0x4b8] sm:$0xff]  ;;  %v2096_v3 = vld [vmem:[%s6876_s5 + $0x5e8] sm:$0xff]  ;;  %v2157_v27 = vld [vmem:[%s6876_s5 + $0x7d0] sm:$0xff] }
 0x2fe   :  { %4328 = vmatpush3.bf16.msra.mxu0 %v4327_v11  ;;  %2672 = vmatprep.mubr.f32.mxu0 %v2224_v17  ;;  %v4305_v8 = vpack.c.bf16 %v2058_v30, %v2057_v20  ;;  %v4347_v11 = vpack.c.bf16 %v2078_v62, %v2077_v61  ;;  %v4319_v17 = vpack.c.bf16 %v2048_v9, %v2047_v6  ;;  %v2098_v24 = vld [vmem:[%s6876_s5 + $0x5f8] sm:$0xff]  ;;  %v2115_v20 = vld [vmem:[%s6876_s5 + $0x680] sm:$0xff]  ;;  %v2116_v30 = vld [vmem:[%s6876_s5 + $0x688] sm:$0xff] }
 0x2ff   :  { %4330 = vmatprep.subr.bf16.mxu0 %v4329_v14  ;;  %v4349_v14 = vpack.c.bf16 %v2096_v3, %v2095_v1  ;;  %v4357_v28 = vpack.c.bf16 %v2116_v30, %v2115_v20  ;;  %v2152_v54 = vld [vmem:[%s6876_s5 + $0x7a8] sm:$0xff]  ;;  %v2121_v61 = vld [vmem:[%s6876_s5 + $0x6b0] sm:$0xff]  ;;  %v2154_v6 = vld [vmem:[%s6876_s5 + $0x7b8] sm:$0xff] }
 0x300   :  { %4300 = vmatpush3.bf16.msra.mxu1 %v4299_v18  ;;  %v2097_v18 = vld [vmem:[%s6876_s5 + $0x5f0] sm:$0xff]  ;;  %v2104_v59 = vld [vmem:[%s6876_s5 + $0x628] sm:$0xff]  ;;  %v2106_v12 = vld [vmem:[%s6876_s5 + $0x638] sm:$0xff] }
 0x301   :  { %4302 = vmatprep.subr.bf16.mxu1 %v4301_v21  ;;  %v2049_v21 = vld [vmem:[%s6876_s5 + $0x470] sm:$0xff]  ;;  %v2136_v1 = vld [vmem:[%s6876_s5 + $0x728] sm:$0xff]  ;;  %v4367_v3 = vpack.c.bf16 %v2104_v59, %v2103_v58  ;;  %v2111_v44 = vld [vmem:[%s6876_s5 + $0x660] sm:$0xff] }
 0x302   :  { %4332 = vmatpush3.bf16.msra.mxu0 %v4331_v7  ;;  %v4351_v7 = vpack.c.bf16 %v2080_v16, %v2079_v15  ;;  %v2124_v15 = vld [vmem:[%s6876_s5 + $0x6c8] sm:$0xff]  ;;  %v2125_v30 = vld [vmem:[%s6876_s5 + $0x6d0] sm:$0xff] }
 0x303   :  { %4334 = vmatprep.subr.bf16.mxu0 %v4333_v4  ;;  %v4353_v4 = vpack.c.bf16 %v2098_v24, %v2097_v18  ;;  %v2138_v18 = vld [vmem:[%s6876_s5 + $0x738] sm:$0xff]  ;;  %v2112_v45 = vld [vmem:[%s6876_s5 + $0x668] sm:$0xff] }
 0x304   :  { %4304 = vmatpush3.bf16.msra.mxu1 %v4303_v26  ;;  %v4323_v26 = vpack.c.bf16 %v2050_v22, %v2049_v21  ;;  %v2156_v21 = vld [vmem:[%s6876_s5 + $0x7c8] sm:$0xff] }
 0x305   :  { %4306 = vmatprep.subr.bf16.mxu1 %v4305_v8  ;;  %v2225_v8 = vcombine.high %v1906_v23, %v1906_v23  ;;  %v2107_v23 = vld [vmem:[%s6876_s5 + $0x640] sm:$0xff] }
 0x306   :  { %4336 = vmatpush3.bf16.msra.mxu0 %v4335_v31  ;;  %v2100_v31 = vld [vmem:[%s6876_s5 + $0x608] sm:$0xff] }
 0x307   :  { %4338 = vmatprep.subr.bf16.mxu0 %v4337_v34  ;;  %v2117_v34 = vld [vmem:[%s6876_s5 + $0x690] sm:$0xff]  ;;  %v4359_v39 = vpack.c.bf16 %v2100_v31, %v2099_v29  ;;  %v2110_v31 = vld [vmem:[%s6876_s5 + $0x658] sm:$0xff] }
 0x308   :  { %4308 = vmatpush3.bf16.msra.mxu1 %v4307_v37  ;;  %v2131_v37 = vld [vmem:[%s6876_s5 + $0x700] sm:$0xff]  ;;  %v2109_v29 = vld [vmem:[%s6876_s5 + $0x650] sm:$0xff] }
 0x309   :  { %4310 = vmatprep.subr.bf16.mxu1 %v4309_v40  ;;  %v6684_v40 = vrot.slane %v2225_v8, %v6252_v57  ;;  %v2240_v57 = vcombine.high %v6669_v33, %v6669_v33  ;;  %v2158_v8 = vld [vmem:[%s6876_s5 + $0x7d8] sm:$0xff] }
 0x30a   :  { %4340 = vmatpush3.bf16.msra.mxu0 %v4339_v43  ;;  %v4361_v43 = vpack.c.bf16 %v2118_v35, %v2117_v34  ;;  %v2127_v34 = vld [vmem:[%s6876_s5 + $0x6e0] sm:$0xff]  ;;  %v2128_v35 = vld [vmem:[%s6876_s5 + $0x6e8] sm:$0xff] }
 0x30b   :  { %4342 = vmatprep.subr.bf16.mxu0 %v4341_v46  ;;  %v4391_v46 = vpack.c.bf16 %v2132_v38, %v2131_v37  ;;  %v2141_v37 = vld [vmem:[%s6876_s5 + $0x750] sm:$0xff]  ;;  %v2142_v38 = vld [vmem:[%s6876_s5 + $0x758] sm:$0xff] }
 0x30c   :  { %4312 = vmatpush3.bf16.msra.mxu1 %v4311_v49  ;;  %v4393_v49 = vpack.c.bf16 %v2150_v42, %v2149_v41  ;;  %v2159_v41 = vld [vmem:[%s6876_s5 + $0x7e0] sm:$0xff]  ;;  %v2160_v42 = vld [vmem:[%s6876_s5 + $0x7e8] sm:$0xff] }
 0x30d   :  { %4314 = vmatprep.subr.bf16.mxu1 %v4313_v52  ;;  %v2241_v52 = vcombine.high %v6684_v40, %v6684_v40 }
 0x30e   :  { %4344 = vmatpush3.bf16.msra.mxu0 %v4343_v56  ;;  %v4365_v56 = vpack.c.bf16 %v2120_v48, %v2119_v47  ;;  %v2130_v47 = vld [vmem:[%s6876_s5 + $0x6f8] sm:$0xff]  ;;  %v4413_v48 = vpack.c.bf16 %v2160_v42, %v2159_v41 }
 0x30f   :  { %4346 = vmatprep.subr.bf16.mxu0 %v4345_v60  ;;  %v4395_v60 = vpack.c.bf16 %v2134_v51, %v2133_v50  ;;  %v2144_v50 = vld [vmem:[%s6876_s5 + $0x768] sm:$0xff]  ;;  %v4383_v51 = vpack.c.bf16 %v2112_v45, %v2111_v44 }
 0x310   :  { %4316 = vmatpush3.bf16.msra.mxu1 %v4315_v0  ;;  %v2135_v0 = vld [vmem:[%s6876_s5 + $0x720] sm:$0xff] }
 0x311   :  { %4318 = vmatprep.subr.bf16.mxu1 %v4317_v5  ;;  %v2153_v5 = vld [vmem:[%s6876_s5 + $0x7b0] sm:$0xff]  ;;  %v4399_v13 = vpack.c.bf16 %v2136_v1, %v2135_v0  ;;  %v2838_v1 = vld [vmem:[%s6877_s6] ss:$0 sm:$0xff] }
 0x312   :  { %4348 = vmatpush3.bf16.msra.mxu0 %v4347_v11  ;;  %v2105_v11 = vld [vmem:[%s6876_s5 + $0x630] sm:$0xff]  ;;  %v4401_v16 = vpack.c.bf16 %v2154_v6, %v2153_v5 }
 0x313   :  { %4350 = vmatprep.subr.bf16.mxu0 %v4349_v14  ;;  %v2123_v14 = vld [vmem:[%s6876_s5 + $0x6c0] sm:$0xff]  ;;  %v4371_v24 = vpack.c.bf16 %v2106_v12, %v2105_v11 }
 0x314   :  { %4320 = vmatpush3.bf16.msra.mxu1 %v4319_v17  ;;  %v2137_v17 = vld [vmem:[%s6876_s5 + $0x730] sm:$0xff]  ;;  %v4373_v22 = vpack.c.bf16 %v2124_v15, %v2123_v14 }
 0x315   :  { %4322 = vmatprep.subr.bf16.mxu1 %v4321_v19  ;;  %v2155_v19 = vld [vmem:[%s6876_s5 + $0x7c0] sm:$0xff]  ;;  %v4403_v20 = vpack.c.bf16 %v2138_v18, %v2137_v17 }
 0x316   :  { %4352 = vmatpush3.bf16.msra.mxu0 %v4351_v7  ;;  %v2108_v7 = vld [vmem:[%s6876_s5 + $0x648] sm:$0xff]  ;;  %v4405_v25 = vpack.c.bf16 %v2156_v21, %v2155_v19 }
 0x317   :  { %4354 = vmatprep.subr.bf16.mxu0 %v4353_v4  ;;  %v2126_v4 = vld [vmem:[%s6876_s5 + $0x6d8] sm:$0xff]  ;;  %v4375_v10 = vpack.c.bf16 %v2108_v7, %v2107_v23 }
 0x318   :  { %4324 = vmatpush3.bf16.msra.mxu1 %v4323_v26  ;;  %v2140_v26 = vld [vmem:[%s6876_s5 + $0x748] sm:$0xff] }
 0x319   :  { %4358 = vmatprep.subr.bf16.mxu1 %v4357_v28  ;;  %v4377_v28 = vpack.c.bf16 %v2126_v4, %v2125_v30 }
 0x31a   :  { %4356 = vmatpush3.bf16.msra.mxu0 %v4355_v32  ;;  %v4407_v32 = vpack.c.bf16 %v2140_v26, %v2139_v2 }
 0x31b   :  { %2603 = vmatmul.mubr.f32.vlgmr.msra.gmra.mrb[56].mxu1 %v6465_v55  ;;  %4390 = vmatprep.subr.bf16.mxu0 %v4389_v36  ;;  %v2151_v55 = vld [vmem:[%s6876_s5 + $0x7a0] sm:$0xff]  ;;  %v4409_v36 = vpack.c.bf16 %v2158_v8, %v2157_v27 }
 0x31c   :  { %4360 = vmatpush3.bf16.msra.mxu1 %v4359_v39  ;;  %2742 = vmatprep.mubr.f32.mxu1 %v2240_v57  ;;  %v4397_v62 = vpack.c.bf16 %v2152_v54, %v2151_v55  ;;  %v4379_v39 = vpack.c.bf16 %v2110_v31, %v2109_v29  ;;  %v4411_v57 = vpack.c.bf16 %v2142_v38, %v2141_v37  ;;  %v2113_v54 = vld [vmem:[%s6876_s5 + $0x670] sm:$0xff] }
 0x31d   :  { %2673 = vmatmul.mubr.f32.vlgmr.msra.gmra.mrb[56].mxu0 %v6480_v63  ;;  %4362 = vmatprep.subr.bf16.mxu1 %v4361_v43  ;;  %v2122_v63 = vld [vmem:[%s6876_s5 + $0x6b8] sm:$0xff]  ;;  %v4381_v43 = vpack.c.bf16 %v2128_v35, %v2127_v34 }
 0x31e   :  { %4392 = vmatpush3.bf16.msra.mxu0 %v4391_v46  ;;  %2812 = vmatprep.mubr.f32.mxu0 %v2241_v52  ;;  %v4369_v9 = vpack.c.bf16 %v2122_v63, %v2121_v61  ;;  %v2129_v46 = vld [vmem:[%s6876_s5 + $0x6f0] sm:$0xff]  ;;  %v2146_v61 = vld [vmem:[%s6876_s5 + $0x778] sm:$0xff] }
 0x31f   :  { %4394 = vmatprep.subr.bf16.mxu0 %v4393_v49  ;;  %v2143_v49 = vld [vmem:[%s6876_s5 + $0x760] sm:$0xff]  ;;  %v2161_v52 = vld [vmem:[%s6876_s5 + $0x7f0] sm:$0xff]  ;;  %v4385_v55 = vpack.c.bf16 %v2130_v47, %v2129_v46 }
 0x320   :  { %4364 = vmatpush3.bf16.msra.mxu1 %v4363_v53  ;;  %v2162_v53 = vld [vmem:[%s6876_s5 + $0x7f8] sm:$0xff]  ;;  %v4415_v58 = vpack.c.bf16 %v2144_v50, %v2143_v49 }
 0x321   :  { %4366 = vmatprep.subr.bf16.mxu1 %v4365_v56  ;;  %v2114_v56 = vld [vmem:[%s6876_s5 + $0x678] sm:$0xff]  ;;  %v4417_v59 = vpack.c.bf16 %v2162_v53, %v2161_v52 }
 0x322   :  { %4396 = vmatpush3.bf16.msra.mxu0 %v4395_v60  ;;  %v2145_v60 = vld [vmem:[%s6876_s5 + $0x770] sm:$0xff]  ;;  %v4387_v63 = vpack.c.bf16 %v2114_v56, %v2113_v54  ;;  %s4462_s5 = smov [#allocation4]  }
 0x323   :  { %4398 = vmatprep.subr.bf16.mxu0 %v4397_v62  ;;  %v4419_v62 = vpack.c.bf16 %v2146_v61, %v2145_v60  ;;  %s2825_s6 = sshll.u32 %s4462_s5, 4  ;;  %s2826_s6 = int_to_ptr.vmem [resolvable:$true] %s2825_s6 }
 0x324   :  { %4368 = vmatpush3.bf16.msra.mxu1 %v4367_v3  ;;  %s4433_s10 = scalar_lea.vmem %s2826_s6, 32  ;;  %p4438_p1 = scmp.lt.s32.totalorder %s2826_s6, %s2826_s6 }
 0x325   :  { %4370 = vmatprep.subr.bf16.mxu1 %v4369_v9  ;;  %p4434_p0 = scmp.ne.s32.totalorder %s2826_s6, %s4433_s10  ;;  %p4439_p2 = scmp.lt.s32.totalorder %s4433_s10, %s4433_s10 }
 0x326   :  { %4400 = vmatpush3.bf16.msra.mxu0 %v4399_v13 }
 0x327   :  { %4402 = vmatprep.subr.bf16.mxu0 %v4401_v16  ;;  %p4440_p3 = por %p4439_p2, %p4438_p1 }
 0x328   :  { %4372 = vmatpush3.bf16.msra.mxu1 %v4371_v24 }
 0x329   :  { %4374 = vmatprep.subr.bf16.mxu1 %v4373_v22  ;;  %p4441_p4 = pnand %p4440_p3, %p4434_p0 }
 0x32a   :  { %4404 = vmatpush3.bf16.msra.mxu0 %v4403_v20 }
 0x32b   :  { %4406 = vmatprep.subr.bf16.mxu0 %v4405_v25 }
 0x32c   :  { %4376 = vmatpush3.bf16.msra.mxu1 %v4375_v10 }
 0x32d   :  { %4378 = vmatprep.subr.bf16.mxu1 %v4377_v28 }
 0x32e   :  { %4408 = vmatpush3.bf16.msra.mxu0 %v4407_v32 }
 0x32f   :  { %4410 = vmatprep.subr.bf16.mxu0 %v4409_v36 }
 0x330   :  { %4380 = vmatpush3.bf16.msra.mxu1 %v4379_v39 }
 0x331   :  { %4382 = vmatprep.subr.bf16.mxu1 %v4381_v43 }
 0x332   :  { %4412 = vmatpush3.bf16.msra.mxu0 %v4411_v57 }
 0x333   :  { %4414 = vmatprep.subr.bf16.mxu0 %v4413_v48 }
 0x334   :  { %4384 = vmatpush3.bf16.msra.mxu1 %v4383_v51 }
 0x335   :  { %4386 = vmatprep.subr.bf16.mxu1 %v4385_v55 }
 0x336   :  { %4416 = vmatpush3.bf16.msra.mxu0 %v4415_v58 }
 0x337   :  { %4418 = vmatprep.subr.bf16.mxu0 %v4417_v59 }
 0x338   :  { %4388 = vmatpush3.bf16.msra.mxu1 %v4387_v63 }
 0x33a   :  { %4420 = vmatpush3.bf16.msra.mxu0 %v4419_v62 }
 0x33b   :  { %2743 = vmatmul.mubr.f32.vlgmr.msra.gmra.mrb[58].mxu1 %v6669_v33 }
 0x33d   :  { %2813 = vmatmul.mubr.f32.vlgmr.msra.gmra.mrb[58].mxu0 %v6684_v40 }
 0x3ae   :  { %v3429_v0 = vpop.f32.mrb[52].mxu1 }
 0x3af   :  { %v3430_v3 = vpop.f32.mrb[53].mxu1 }
 0x3b0   :  { %v3431_v5 = vadd.f32 %v3430_v3, %v3429_v0  ;;  %v3464_v6 = vpop.f32.mrb[52].mxu0 }
 0x3b1   :  { %v3465_v9 = vpop.f32.mrb[53].mxu0 }
 0x3b2   :  { %v2325_v11 = vadd.f32 %v3431_v5, %v2838_v1  ;;  %v3466_v12 = vadd.f32 %v3465_v9, %v3464_v6 }
 0x3b4   :  { %v2395_v13 = vadd.f32 %v3466_v12, %v2325_v11 }
 0x3ce   :  { %v3499_v14 = vpop.f32.mrb[54].mxu1 }
 0x3cf   :  { %v3500_v15 = vpop.f32.mrb[55].mxu1 }
 0x3d0   :  { %v3501_v16 = vadd.f32 %v3500_v15, %v3499_v14  ;;  %v3534_v17 = vpop.f32.mrb[54].mxu0 }
 0x3d1   :  { %v3535_v18 = vpop.f32.mrb[55].mxu0 }
 0x3d2   :  { %v2465_v33 = vadd.f32 %v3501_v16, %v2395_v13  ;;  %v3536_v24 = vadd.f32 %v3535_v18, %v3534_v17 }
 0x3d4   :  { %v2535_v40 = vadd.f32 %v3536_v24, %v2465_v33 }
 0x3ee   :  { %v3569_v19 = vpop.f32.mrb[56].mxu1 }
 0x3ef   :  { %v3570_v21 = vpop.f32.mrb[57].mxu1 }
 0x3f0   :  { %v3571_v22 = vadd.f32 %v3570_v21, %v3569_v19  ;;  %v3604_v23 = vpop.f32.mrb[56].mxu0 }
 0x3f1   :  { %v3605_v7 = vpop.f32.mrb[57].mxu0 }
 0x3f2   :  { %v2605_v20 = vadd.f32 %v3571_v22, %v2535_v40  ;;  %v3606_v30 = vadd.f32 %v3605_v7, %v3604_v23 }
 0x3f4   :  { %v2675_v4 = vadd.f32 %v3606_v30, %v2605_v20 }
 0x40e   :  { %v3639_v25 = vpop.f32.mrb[58].mxu1 }
 0x40f   :  { %v3640_v2 = vpop.f32.mrb[59].mxu1 }
 0x410   :  { %v3641_v26 = vadd.f32 %v3640_v2, %v3639_v25  ;;  %v3674_v10 = vpop.f32.mrb[58].mxu0 }
 0x411   :  { %v3675_v27 = vpop.f32.mrb[59].mxu0 }
 0x412   :  { %v2745_v8 = vadd.f32 %v3641_v26, %v2675_v4  ;;  %v3676_v28 = vadd.f32 %v3675_v27, %v3674_v10 }
 0x414   :  { %v2815_v29 = vadd.f32 %v3676_v28, %v2745_v8 }
 0x416   :  { %2818 = vst [vmem:[#allocation4] sm:$0x3] %v2815_v29 }
 0x417   :  { %4444 = shalt.err (!%p4441_p4)
}
 0x418   :  { %s4445_s12 = scalar_lea.hbm %s6878_s7, 32 }
 0x419   :  { %p4446_p5 = scmp.ne.s32.totalorder %s6878_s7, %s4445_s12  ;;  %p4449_p6 = scmp.lt.u32.totalorder %s4445_s12, %s6878_s7 }
 0x41b   :  { %p4451_p7 = pnand %p4449_p6, %p4446_p5 }
 0x41d   :  { %4454 = shalt.err (!%p4451_p7)
}
 0x41e   :  { %2828 = dma.vmem_to_hbm [thread:$0]  %s2826_s6, 32, %s6878_s7, [#allocation5]  }
 0x41f   :  { %4455 = dma.done.wait [#allocation5], 32  }
 0x420   :  { %4456 = vsyncadd [#allocation5], 4294967264 }
 0x421   :  { %2832 = vsyncpa [#allocation5], 1 }

</bundles_post_ra>
